<compile_context>
chip_gen: v6e
topology: v6e:2x2x1
jax: 0.10.0
libtpu: 0.0.40
codegen_flags: <defaults>
</compile_context>

<pallas_src>
import jax
import jax.numpy as jnp
from jax.experimental import pallas as pl
from jax.experimental.pallas import tpu as pltpu


# ---------------------------------------------------------------------------
# Batch-tile selection (static shapes under jit).
# ---------------------------------------------------------------------------
def _pick_batch_tile(n, max_tile):
    """Largest divisor of n that is <= max_tile, preferring >= 2 grid steps
    (keeps both TensorCores busy on v7x via dimension_semantics='parallel')."""
    best_multi, best_any = None, 1
    for t in range(1, min(n, max_tile) + 1):
        if n % t == 0:
            best_any = t
            if n // t >= 2:
                best_multi = t
    return best_multi if best_multi is not None else best_any


def _pick_conv2_tile(n):
    """conv2 blocks are 2-D (tile, 5760); keep the sublane dim either a multiple
    of 8 or the full batch so the BlockSpec is always tiling-legal."""
    best = None
    t = 8
    while t <= min(n, 128):
        if n % t == 0 and n // t >= 2:
            best = t
        t += 8
    return best if best is not None else n


# ---------------------------------------------------------------------------
# Stage 1: Conv2d(3, 64, (1, 90)) + bias + ReLU   (Wout == 1)
#   one grid step == one tile of B examples; conv1 = per-channel accumulating
#   (90, 90) @ (90, 64) MXU dots directly on raw NCHW f32 input (no im2col).
# ---------------------------------------------------------------------------
def _conv1_kernel(x_ref, w1_ref, b1_ref, y_ref):
    """
    x_ref  : (B, C, H, W)   f32   raw input tile
    w1_ref : (C, W, 64)     bf16  conv1 weight, per-channel (w, co) slabs
    b1_ref : (1, 64)        f32
    y_ref  : (B, H, 64)     bf16  conv1 activation (ReLU'd), fed to stage 2
    """
    B = x_ref.shape[0]
    C = x_ref.shape[1]
    for b in range(B):                       # static unroll: B*C clean 2-D MXU dots
        acc = jnp.dot(x_ref[b, 0].astype(jnp.bfloat16), w1_ref[0],
                      preferred_element_type=jnp.float32)
        for c in range(1, C):
            acc = acc + jnp.dot(x_ref[b, c].astype(jnp.bfloat16), w1_ref[c],
                                preferred_element_type=jnp.float32)
        y_ref[b] = jnp.maximum(acc + b1_ref[...], 0.0).astype(y_ref.dtype)
    # TODO(synk): nn.Dropout(p=0.6) is identity at inference; training-mode RNG dropout not implemented.


# ---------------------------------------------------------------------------
# Stage 2: Conv2d(64, 128, (90, 1)) + bias + ReLU   (Hout == 1)
#   ONE (B, 5760) @ (5760, 128) MXU contraction per grid step.
# ---------------------------------------------------------------------------
def _conv2_kernel(yf_ref, w2_ref, b2_ref, o_ref):
    """
    yf_ref : (B, KH*CI=5760) bf16  flattened conv1 activations
    w2_ref : (5760, 128)     bf16  conv2 weight, K ordered (kh, ci)
    b2_ref : (1, 128)        f32
    o_ref  : (B, 128)        f32   lane-dense output block
    """
    acc = jnp.dot(yf_ref[...], w2_ref[...], preferred_element_type=jnp.float32)
    o_ref[...] = jnp.maximum(acc + b2_ref[...], 0.0).astype(o_ref.dtype)
    # TODO(synk): second nn.Dropout(p=0.6) is identity at inference as well.


# ---------------------------------------------------------------------------
# One-time weight repack: PyTorch layout -> kernel layout (bf16 MXU operands).
# ---------------------------------------------------------------------------
def pack_params(params):
    w1, b1, w2, b2 = params["w1"], params["b1"], params["w2"], params["b2"]
    # w1: (CO1=64, C=3, 1, KW=90) -> (C, KW, CO1)
    w1k = jnp.transpose(w1[:, :, 0, :], (1, 2, 0)).astype(jnp.bfloat16)
    # w2: (CO2=128, CI=64, KH=90, 1) -> (KH, CI, CO2) -> (KH*CI, CO2), k = kh*CI + ci
    kh, ci = w2.shape[2], w2.shape[1]
    w2m = jnp.transpose(w2[:, :, :, 0], (2, 1, 0)).reshape(kh * ci, -1).astype(jnp.bfloat16)
    return dict(
        w1k=w1k,                                            # (3, 90, 64)  bf16
        b1=b1.reshape(1, -1).astype(jnp.float32),           # (1, 64)      f32
        w2m=w2m,                                            # (5760, 128)  bf16
        b2=b2.reshape(1, -1).astype(jnp.float32),           # (1, 128)     f32
    )


# ---------------------------------------------------------------------------
# Forward pass.
# ---------------------------------------------------------------------------
@jax.jit
def feature_extractor_forward(x, packed):
    w1k, b1 = packed["w1k"], packed["b1"]
    w2m, b2 = packed["w2m"], packed["b2"]

    N, C, H, W = x.shape
    Cw, KW, CO1 = w1k.shape
    K2, CO2 = w2m.shape
    KH = K2 // CO1

    assert Cw == C and KW == W, "fused path requires W == 90 (Wout == 1)"
    assert H == KH, "fused path requires H == 90 (Hout == 1)"
    # TODO(synk): general Wout/Hout > 1 path (im2col patch gather) not implemented.

    # ---------------- stage 1: conv1 + ReLU ----------------
    bt1 = _pick_batch_tile(N, 8)
    flops1 = 2 * N * H * (C * W) * CO1
    bytes1 = x.size * 4 + w1k.size * 2 + b1.size * 4 + N * H * CO1 * 2
    y = pl.pallas_call(
        _conv1_kernel,
        out_shape=jax.ShapeDtypeStruct((N, H, CO1), jnp.bfloat16),
        grid=(N // bt1,),
        in_specs=[
            pl.BlockSpec((bt1, C, H, W), lambda n: (n, 0, 0, 0)),   # raw x tile
            pl.BlockSpec((C, KW, CO1), lambda n: (0, 0, 0)),        # w1 (resident)
            pl.BlockSpec((1, CO1), lambda n: (0, 0)),               # b1
        ],
        out_specs=pl.BlockSpec((bt1, H, CO1), lambda n: (n, 0, 0)),
        compiler_params=pltpu.CompilerParams(dimension_semantics=("parallel",)),
        cost_estimate=pl.CostEstimate(flops=flops1, transcendentals=0,
                                      bytes_accessed=bytes1),
    )(x, w1k, b1)

    # Contiguous, free reshape: (N, KH, CI) -> (N, KH*CI); matches w2m's k = kh*CI + ci.
    yf = y.reshape(N, K2)

    # ---------------- stage 2: conv2 + ReLU (single big contraction) ----------------
    bt2 = _pick_conv2_tile(N)
    flops2 = 2 * N * K2 * CO2
    bytes2 = yf.size * 2 + w2m.size * 2 + b2.size * 4 + N * CO2 * 4
    z = pl.pallas_call(
        _conv2_kernel,
        out_shape=jax.ShapeDtypeStruct((N, CO2), jnp.float32),
        grid=(N // bt2,),
        in_specs=[
            pl.BlockSpec((bt2, K2), lambda n: (n, 0)),              # flattened activations
            pl.BlockSpec((K2, CO2), lambda n: (0, 0)),              # w2 (resident, constant index)
            pl.BlockSpec((1, CO2), lambda n: (0, 0)),               # b2
        ],
        out_specs=pl.BlockSpec((bt2, CO2), lambda n: (n, 0)),
        compiler_params=pltpu.CompilerParams(dimension_semantics=("parallel",)),
        cost_estimate=pl.CostEstimate(flops=flops2, transcendentals=0,
                                      bytes_accessed=bytes2),
    )(yf, w2m, b2)

    # (N, 128) -> NCHW (N, 128, Hout=1, Wout=1)
    return z.reshape(N, CO2, 1, 1)


# ---------------------------------------------------------------------------
# Deterministic parameter init (PyTorch Conv2d-style uniform bounds).
# ---------------------------------------------------------------------------
def init_params(key):
    k1, k2, k3, k4 = jax.random.split(key, 4)
    fan1 = 3 * 1 * 90
    bound1 = 1.0 / (fan1 ** 0.5)
    w1 = jax.random.uniform(k1, (64, 3, 1, 90), jnp.float32, -bound1, bound1)
    b1 = jax.random.uniform(k2, (64,), jnp.float32, -bound1, bound1)
    fan2 = 64 * 90 * 1
    bound2 = 1.0 / (fan2 ** 0.5)
    w2 = jax.random.uniform(k3, (128, 64, 90, 1), jnp.float32, -bound2, bound2)
    b2 = jax.random.uniform(k4, (128,), jnp.float32, -bound2, bound2)
    return dict(w1=w1, b1=b1, w2=w2, b2=b2)


def _reference_forward(x, params):
    """Plain-JAX f32 reference (lax conv) for a correctness sanity check."""
    dn = jax.lax.conv_dimension_numbers(x.shape, params["w1"].shape,
                                        ("NCHW", "OIHW", "NCHW"))
    y = jax.lax.conv_general_dilated(x, params["w1"], (1, 1), "VALID",
                                     dimension_numbers=dn)
    y = jnp.maximum(y + params["b1"][None, :, None, None], 0.0)
    dn2 = jax.lax.conv_dimension_numbers(y.shape, params["w2"].shape,
                                         ("NCHW", "OIHW", "NCHW"))
    z = jax.lax.conv_general_dilated(y, params["w2"], (1, 1), "VALID",
                                     dimension_numbers=dn2)
    z = jnp.maximum(z + params["b2"][None, :, None, None], 0.0)
    return z


if __name__ == "__main__":
    key = jax.random.PRNGKey(0)
    kp, kx = jax.random.split(key)
    params = init_params(kp)
    packed = pack_params(params)

    # Smallest valid spatial size for kernels (1,90)/(90,1): H = W = 90.
    # Batch 8 so both stages run with multi-example tiles (stage 1: 2 steps of 4,
    # stage 2: one (8, 5760) @ (5760, 128) contraction).
    x = jax.random.normal(kx, (8, 3, 90, 90), jnp.float32)

    out = jax.block_until_ready(feature_extractor_forward(x, packed))
    assert out.shape == (8, 128, 1, 1), out.shape

    ref = jax.block_until_ready(_reference_forward(x, params))
    err = float(jnp.max(jnp.abs(out - ref)))
    assert jnp.allclose(out, ref, atol=2e-2, rtol=2e-2), err

    print("KERNEL_OK")
</pallas_src>

<mosaic_0001>
module attributes {stable_mosaic.version = 11 : i64} {
  func.func @_conv1_kernel(%arg0: i32, %arg1: memref<4x3x90x90xf32, #tpu.memory_space<vmem>>, %arg2: memref<3x90x64xbf16, #tpu.memory_space<vmem>>, %arg3: memref<1x64xf32, #tpu.memory_space<vmem>>, %arg4: memref<4x90x64xbf16, #tpu.memory_space<vmem>>) attributes {dimension_semantics = [#tpu.dimension_semantics<parallel>], iteration_bounds = array<i64: 2>, scalar_prefetch = 0 : i64, scratch_operands = 0 : i64, tpu.core_type = #tpu.core_type<tc>, window_params = [{transform_indices = @transform_0, window_bounds = array<i64: 4, 3, 90, 90>}, {pipeline_mode = #tpu.pipeline_mode<synchronous>, transform_indices = @transform_1, window_bounds = array<i64: 3, 90, 64>}, {pipeline_mode = #tpu.pipeline_mode<synchronous>, transform_indices = @transform_2, window_bounds = array<i64: 1, 64>}, {transform_indices = @transform_3, window_bounds = array<i64: 4, 90, 64>}]} {
    %c0 = arith.constant 0 : index
    %c0_0 = arith.constant 0 : index
    %c0_1 = arith.constant 0 : index
    %c0_2 = arith.constant 0 : index
    %0 = vector.load %arg1[%c0, %c0_0, %c0_1, %c0_2] : memref<4x3x90x90xf32, #tpu.memory_space<vmem>>, vector<1x1x90x90xf32>
    %1 = vector.shape_cast %0 : vector<1x1x90x90xf32> to vector<90x90xf32>
    %2 = arith.truncf %1 : vector<90x90xf32> to vector<90x90xbf16>
    %c0_3 = arith.constant 0 : index
    %c0_4 = arith.constant 0 : index
    %c0_5 = arith.constant 0 : index
    %3 = vector.load %arg2[%c0_3, %c0_4, %c0_5] : memref<3x90x64xbf16, #tpu.memory_space<vmem>>, vector<1x90x64xbf16>
    %4 = vector.shape_cast %3 : vector<1x90x64xbf16> to vector<90x64xbf16>
    %cst = arith.constant dense<0.000000e+00> : vector<90x64xf32>
    %5 = tpu.matmul %2, %4, %cst {dimension_numbers = #tpu.dot_dimension_numbers<[1], [0], [0], [1], [0, 0, 1, 1], [], []>} : vector<90x90xbf16>, vector<90x64xbf16>, vector<90x64xf32> -> vector<90x64xf32>
    %c0_6 = arith.constant 0 : index
    %c1 = arith.constant 1 : index
    %c0_7 = arith.constant 0 : index
    %c0_8 = arith.constant 0 : index
    %6 = vector.load %arg1[%c0_6, %c1, %c0_7, %c0_8] : memref<4x3x90x90xf32, #tpu.memory_space<vmem>>, vector<1x1x90x90xf32>
    %7 = vector.shape_cast %6 : vector<1x1x90x90xf32> to vector<90x90xf32>
    %8 = arith.truncf %7 : vector<90x90xf32> to vector<90x90xbf16>
    %c1_9 = arith.constant 1 : index
    %c0_10 = arith.constant 0 : index
    %c0_11 = arith.constant 0 : index
    %9 = vector.load %arg2[%c1_9, %c0_10, %c0_11] : memref<3x90x64xbf16, #tpu.memory_space<vmem>>, vector<1x90x64xbf16>
    %10 = vector.shape_cast %9 : vector<1x90x64xbf16> to vector<90x64xbf16>
    %cst_12 = arith.constant dense<0.000000e+00> : vector<90x64xf32>
    %11 = tpu.matmul %8, %10, %cst_12 {dimension_numbers = #tpu.dot_dimension_numbers<[1], [0], [0], [1], [0, 0, 1, 1], [], []>} : vector<90x90xbf16>, vector<90x64xbf16>, vector<90x64xf32> -> vector<90x64xf32>
    %12 = arith.addf %5, %11 : vector<90x64xf32>
    %c0_13 = arith.constant 0 : index
    %c2 = arith.constant 2 : index
    %c0_14 = arith.constant 0 : index
    %c0_15 = arith.constant 0 : index
    %13 = vector.load %arg1[%c0_13, %c2, %c0_14, %c0_15] : memref<4x3x90x90xf32, #tpu.memory_space<vmem>>, vector<1x1x90x90xf32>
    %14 = vector.shape_cast %13 : vector<1x1x90x90xf32> to vector<90x90xf32>
    %15 = arith.truncf %14 : vector<90x90xf32> to vector<90x90xbf16>
    %c2_16 = arith.constant 2 : index
    %c0_17 = arith.constant 0 : index
    %c0_18 = arith.constant 0 : index
    %16 = vector.load %arg2[%c2_16, %c0_17, %c0_18] : memref<3x90x64xbf16, #tpu.memory_space<vmem>>, vector<1x90x64xbf16>
    %17 = vector.shape_cast %16 : vector<1x90x64xbf16> to vector<90x64xbf16>
    %cst_19 = arith.constant dense<0.000000e+00> : vector<90x64xf32>
    %18 = tpu.matmul %15, %17, %cst_19 {dimension_numbers = #tpu.dot_dimension_numbers<[1], [0], [0], [1], [0, 0, 1, 1], [], []>} : vector<90x90xbf16>, vector<90x64xbf16>, vector<90x64xf32> -> vector<90x64xf32>
    %19 = arith.addf %12, %18 : vector<90x64xf32>
    %c0_20 = arith.constant 0 : index
    %c0_21 = arith.constant 0 : index
    %20 = vector.load %arg3[%c0_20, %c0_21] : memref<1x64xf32, #tpu.memory_space<vmem>>, vector<1x64xf32>
    %21 = vector.broadcast %20 : vector<1x64xf32> to vector<90x64xf32>
    %22 = arith.addf %19, %21 : vector<90x64xf32>
    %cst_22 = arith.constant 0.000000e+00 : f32
    %23 = vector.broadcast %cst_22 : f32 to vector<90x64xf32>
    %24 = arith.maximumf %22, %23 : vector<90x64xf32>
    %25 = arith.truncf %24 : vector<90x64xf32> to vector<90x64xbf16>
    %c0_23 = arith.constant 0 : index
    %c0_24 = arith.constant 0 : index
    %c0_25 = arith.constant 0 : index
    %26 = vector.load %arg4[%c0_23, %c0_24, %c0_25] : memref<4x90x64xbf16, #tpu.memory_space<vmem>>, vector<1x90x64xbf16>
    %27 = vector.shape_cast %26 : vector<1x90x64xbf16> to vector<90x64xbf16>
    %28 = vector.shape_cast %25 : vector<90x64xbf16> to vector<1x90x64xbf16>
    tpu.vector_store %arg4[%c0_23, %c0_24, %c0_25], %28 {strides = array<i32>} : memref<4x90x64xbf16, #tpu.memory_space<vmem>>, vector<1x90x64xbf16>,
    %c1_26 = arith.constant 1 : index
    %c0_27 = arith.constant 0 : index
    %c0_28 = arith.constant 0 : index
    %c0_29 = arith.constant 0 : index
    %29 = vector.load %arg1[%c1_26, %c0_27, %c0_28, %c0_29] : memref<4x3x90x90xf32, #tpu.memory_space<vmem>>, vector<1x1x90x90xf32>
    %30 = vector.shape_cast %29 : vector<1x1x90x90xf32> to vector<90x90xf32>
    %31 = arith.truncf %30 : vector<90x90xf32> to vector<90x90xbf16>
    %c0_30 = arith.constant 0 : index
    %c0_31 = arith.constant 0 : index
    %c0_32 = arith.constant 0 : index
    %32 = vector.load %arg2[%c0_30, %c0_31, %c0_32] : memref<3x90x64xbf16, #tpu.memory_space<vmem>>, vector<1x90x64xbf16>
    %33 = vector.shape_cast %32 : vector<1x90x64xbf16> to vector<90x64xbf16>
    %cst_33 = arith.constant dense<0.000000e+00> : vector<90x64xf32>
    %34 = tpu.matmul %31, %33, %cst_33 {dimension_numbers = #tpu.dot_dimension_numbers<[1], [0], [0], [1], [0, 0, 1, 1], [], []>} : vector<90x90xbf16>, vector<90x64xbf16>, vector<90x64xf32> -> vector<90x64xf32>
    %c1_34 = arith.constant 1 : index
    %c1_35 = arith.constant 1 : index
    %c0_36 = arith.constant 0 : index
    %c0_37 = arith.constant 0 : index
    %35 = vector.load %arg1[%c1_34, %c1_35, %c0_36, %c0_37] : memref<4x3x90x90xf32, #tpu.memory_space<vmem>>, vector<1x1x90x90xf32>
    %36 = vector.shape_cast %35 : vector<1x1x90x90xf32> to vector<90x90xf32>
    %37 = arith.truncf %36 : vector<90x90xf32> to vector<90x90xbf16>
    %c1_38 = arith.constant 1 : index
    %c0_39 = arith.constant 0 : index
    %c0_40 = arith.constant 0 : index
    %38 = vector.load %arg2[%c1_38, %c0_39, %c0_40] : memref<3x90x64xbf16, #tpu.memory_space<vmem>>, vector<1x90x64xbf16>
    %39 = vector.shape_cast %38 : vector<1x90x64xbf16> to vector<90x64xbf16>
    %cst_41 = arith.constant dense<0.000000e+00> : vector<90x64xf32>
    %40 = tpu.matmul %37, %39, %cst_41 {dimension_numbers = #tpu.dot_dimension_numbers<[1], [0], [0], [1], [0, 0, 1, 1], [], []>} : vector<90x90xbf16>, vector<90x64xbf16>, vector<90x64xf32> -> vector<90x64xf32>
    %41 = arith.addf %34, %40 : vector<90x64xf32>
    %c1_42 = arith.constant 1 : index
    %c2_43 = arith.constant 2 : index
    %c0_44 = arith.constant 0 : index
    %c0_45 = arith.constant 0 : index
    %42 = vector.load %arg1[%c1_42, %c2_43, %c0_44, %c0_45] : memref<4x3x90x90xf32, #tpu.memory_space<vmem>>, vector<1x1x90x90xf32>
    %43 = vector.shape_cast %42 : vector<1x1x90x90xf32> to vector<90x90xf32>
    %44 = arith.truncf %43 : vector<90x90xf32> to vector<90x90xbf16>
    %c2_46 = arith.constant 2 : index
    %c0_47 = arith.constant 0 : index
    %c0_48 = arith.constant 0 : index
    %45 = vector.load %arg2[%c2_46, %c0_47, %c0_48] : memref<3x90x64xbf16, #tpu.memory_space<vmem>>, vector<1x90x64xbf16>
    %46 = vector.shape_cast %45 : vector<1x90x64xbf16> to vector<90x64xbf16>
    %cst_49 = arith.constant dense<0.000000e+00> : vector<90x64xf32>
    %47 = tpu.matmul %44, %46, %cst_49 {dimension_numbers = #tpu.dot_dimension_numbers<[1], [0], [0], [1], [0, 0, 1, 1], [], []>} : vector<90x90xbf16>, vector<90x64xbf16>, vector<90x64xf32> -> vector<90x64xf32>
    %48 = arith.addf %41, %47 : vector<90x64xf32>
    %c0_50 = arith.constant 0 : index
    %c0_51 = arith.constant 0 : index
    %49 = vector.load %arg3[%c0_50, %c0_51] : memref<1x64xf32, #tpu.memory_space<vmem>>, vector<1x64xf32>
    %50 = vector.broadcast %49 : vector<1x64xf32> to vector<90x64xf32>
    %51 = arith.addf %48, %50 : vector<90x64xf32>
    %cst_52 = arith.constant 0.000000e+00 : f32
    %52 = vector.broadcast %cst_52 : f32 to vector<90x64xf32>
    %53 = arith.maximumf %51, %52 : vector<90x64xf32>
    %54 = arith.truncf %53 : vector<90x64xf32> to vector<90x64xbf16>
    %c1_53 = arith.constant 1 : index
    %c0_54 = arith.constant 0 : index
    %c0_55 = arith.constant 0 : index
    %55 = vector.load %arg4[%c1_53, %c0_54, %c0_55] : memref<4x90x64xbf16, #tpu.memory_space<vmem>>, vector<1x90x64xbf16>
    %56 = vector.shape_cast %55 : vector<1x90x64xbf16> to vector<90x64xbf16>
    %57 = vector.shape_cast %54 : vector<90x64xbf16> to vector<1x90x64xbf16>
    tpu.vector_store %arg4[%c1_53, %c0_54, %c0_55], %57 {strides = array<i32>} : memref<4x90x64xbf16, #tpu.memory_space<vmem>>, vector<1x90x64xbf16>,
    %c2_56 = arith.constant 2 : index
    %c0_57 = arith.constant 0 : index
    %c0_58 = arith.constant 0 : index
    %c0_59 = arith.constant 0 : index
    %58 = vector.load %arg1[%c2_56, %c0_57, %c0_58, %c0_59] : memref<4x3x90x90xf32, #tpu.memory_space<vmem>>, vector<1x1x90x90xf32>
    %59 = vector.shape_cast %58 : vector<1x1x90x90xf32> to vector<90x90xf32>
    %60 = arith.truncf %59 : vector<90x90xf32> to vector<90x90xbf16>
    %c0_60 = arith.constant 0 : index
    %c0_61 = arith.constant 0 : index
    %c0_62 = arith.constant 0 : index
    %61 = vector.load %arg2[%c0_60, %c0_61, %c0_62] : memref<3x90x64xbf16, #tpu.memory_space<vmem>>, vector<1x90x64xbf16>
    %62 = vector.shape_cast %61 : vector<1x90x64xbf16> to vector<90x64xbf16>
    %cst_63 = arith.constant dense<0.000000e+00> : vector<90x64xf32>
    %63 = tpu.matmul %60, %62, %cst_63 {dimension_numbers = #tpu.dot_dimension_numbers<[1], [0], [0], [1], [0, 0, 1, 1], [], []>} : vector<90x90xbf16>, vector<90x64xbf16>, vector<90x64xf32> -> vector<90x64xf32>
    %c2_64 = arith.constant 2 : index
    %c1_65 = arith.constant 1 : index
    %c0_66 = arith.constant 0 : index
    %c0_67 = arith.constant 0 : index
    %64 = vector.load %arg1[%c2_64, %c1_65, %c0_66, %c0_67] : memref<4x3x90x90xf32, #tpu.memory_space<vmem>>, vector<1x1x90x90xf32>
    %65 = vector.shape_cast %64 : vector<1x1x90x90xf32> to vector<90x90xf32>
    %66 = arith.truncf %65 : vector<90x90xf32> to vector<90x90xbf16>
    %c1_68 = arith.constant 1 : index
    %c0_69 = arith.constant 0 : index
    %c0_70 = arith.constant 0 : index
    %67 = vector.load %arg2[%c1_68, %c0_69, %c0_70] : memref<3x90x64xbf16, #tpu.memory_space<vmem>>, vector<1x90x64xbf16>
    %68 = vector.shape_cast %67 : vector<1x90x64xbf16> to vector<90x64xbf16>
    %cst_71 = arith.constant dense<0.000000e+00> : vector<90x64xf32>
    %69 = tpu.matmul %66, %68, %cst_71 {dimension_numbers = #tpu.dot_dimension_numbers<[1], [0], [0], [1], [0, 0, 1, 1], [], []>} : vector<90x90xbf16>, vector<90x64xbf16>, vector<90x64xf32> -> vector<90x64xf32>
    %70 = arith.addf %63, %69 : vector<90x64xf32>
    %c2_72 = arith.constant 2 : index
    %c2_73 = arith.constant 2 : index
    %c0_74 = arith.constant 0 : index
    %c0_75 = arith.constant 0 : index
    %71 = vector.load %arg1[%c2_72, %c2_73, %c0_74, %c0_75] : memref<4x3x90x90xf32, #tpu.memory_space<vmem>>, vector<1x1x90x90xf32>
    %72 = vector.shape_cast %71 : vector<1x1x90x90xf32> to vector<90x90xf32>
    %73 = arith.truncf %72 : vector<90x90xf32> to vector<90x90xbf16>
    %c2_76 = arith.constant 2 : index
    %c0_77 = arith.constant 0 : index
    %c0_78 = arith.constant 0 : index
    %74 = vector.load %arg2[%c2_76, %c0_77, %c0_78] : memref<3x90x64xbf16, #tpu.memory_space<vmem>>, vector<1x90x64xbf16>
    %75 = vector.shape_cast %74 : vector<1x90x64xbf16> to vector<90x64xbf16>
    %cst_79 = arith.constant dense<0.000000e+00> : vector<90x64xf32>
    %76 = tpu.matmul %73, %75, %cst_79 {dimension_numbers = #tpu.dot_dimension_numbers<[1], [0], [0], [1], [0, 0, 1, 1], [], []>} : vector<90x90xbf16>, vector<90x64xbf16>, vector<90x64xf32> -> vector<90x64xf32>
    %77 = arith.addf %70, %76 : vector<90x64xf32>
    %c0_80 = arith.constant 0 : index
    %c0_81 = arith.constant 0 : index
    %78 = vector.load %arg3[%c0_80, %c0_81] : memref<1x64xf32, #tpu.memory_space<vmem>>, vector<1x64xf32>
    %79 = vector.broadcast %78 : vector<1x64xf32> to vector<90x64xf32>
    %80 = arith.addf %77, %79 : vector<90x64xf32>
    %cst_82 = arith.constant 0.000000e+00 : f32
    %81 = vector.broadcast %cst_82 : f32 to vector<90x64xf32>
    %82 = arith.maximumf %80, %81 : vector<90x64xf32>
    %83 = arith.truncf %82 : vector<90x64xf32> to vector<90x64xbf16>
    %c2_83 = arith.constant 2 : index
    %c0_84 = arith.constant 0 : index
    %c0_85 = arith.constant 0 : index
    %84 = vector.load %arg4[%c2_83, %c0_84, %c0_85] : memref<4x90x64xbf16, #tpu.memory_space<vmem>>, vector<1x90x64xbf16>
    %85 = vector.shape_cast %84 : vector<1x90x64xbf16> to vector<90x64xbf16>
    %86 = vector.shape_cast %83 : vector<90x64xbf16> to vector<1x90x64xbf16>
    tpu.vector_store %arg4[%c2_83, %c0_84, %c0_85], %86 {strides = array<i32>} : memref<4x90x64xbf16, #tpu.memory_space<vmem>>, vector<1x90x64xbf16>,
    %c3 = arith.constant 3 : index
    %c0_86 = arith.constant 0 : index
    %c0_87 = arith.constant 0 : index
    %c0_88 = arith.constant 0 : index
    %87 = vector.load %arg1[%c3, %c0_86, %c0_87, %c0_88] : memref<4x3x90x90xf32, #tpu.memory_space<vmem>>, vector<1x1x90x90xf32>
    %88 = vector.shape_cast %87 : vector<1x1x90x90xf32> to vector<90x90xf32>
    %89 = arith.truncf %88 : vector<90x90xf32> to vector<90x90xbf16>
    %c0_89 = arith.constant 0 : index
    %c0_90 = arith.constant 0 : index
    %c0_91 = arith.constant 0 : index
    %90 = vector.load %arg2[%c0_89, %c0_90, %c0_91] : memref<3x90x64xbf16, #tpu.memory_space<vmem>>, vector<1x90x64xbf16>
    %91 = vector.shape_cast %90 : vector<1x90x64xbf16> to vector<90x64xbf16>
    %cst_92 = arith.constant dense<0.000000e+00> : vector<90x64xf32>
    %92 = tpu.matmul %89, %91, %cst_92 {dimension_numbers = #tpu.dot_dimension_numbers<[1], [0], [0], [1], [0, 0, 1, 1], [], []>} : vector<90x90xbf16>, vector<90x64xbf16>, vector<90x64xf32> -> vector<90x64xf32>
    %c3_93 = arith.constant 3 : index
    %c1_94 = arith.constant 1 : index
    %c0_95 = arith.constant 0 : index
    %c0_96 = arith.constant 0 : index
    %93 = vector.load %arg1[%c3_93, %c1_94, %c0_95, %c0_96] : memref<4x3x90x90xf32, #tpu.memory_space<vmem>>, vector<1x1x90x90xf32>
    %94 = vector.shape_cast %93 : vector<1x1x90x90xf32> to vector<90x90xf32>
    %95 = arith.truncf %94 : vector<90x90xf32> to vector<90x90xbf16>
    %c1_97 = arith.constant 1 : index
    %c0_98 = arith.constant 0 : index
    %c0_99 = arith.constant 0 : index
    %96 = vector.load %arg2[%c1_97, %c0_98, %c0_99] : memref<3x90x64xbf16, #tpu.memory_space<vmem>>, vector<1x90x64xbf16>
    %97 = vector.shape_cast %96 : vector<1x90x64xbf16> to vector<90x64xbf16>
    %cst_100 = arith.constant dense<0.000000e+00> : vector<90x64xf32>
    %98 = tpu.matmul %95, %97, %cst_100 {dimension_numbers = #tpu.dot_dimension_numbers<[1], [0], [0], [1], [0, 0, 1, 1], [], []>} : vector<90x90xbf16>, vector<90x64xbf16>, vector<90x64xf32> -> vector<90x64xf32>
    %99 = arith.addf %92, %98 : vector<90x64xf32>
    %c3_101 = arith.constant 3 : index
    %c2_102 = arith.constant 2 : index
    %c0_103 = arith.constant 0 : index
    %c0_104 = arith.constant 0 : index
    %100 = vector.load %arg1[%c3_101, %c2_102, %c0_103, %c0_104] : memref<4x3x90x90xf32, #tpu.memory_space<vmem>>, vector<1x1x90x90xf32>
    %101 = vector.shape_cast %100 : vector<1x1x90x90xf32> to vector<90x90xf32>
    %102 = arith.truncf %101 : vector<90x90xf32> to vector<90x90xbf16>
    %c2_105 = arith.constant 2 : index
    %c0_106 = arith.constant 0 : index
    %c0_107 = arith.constant 0 : index
    %103 = vector.load %arg2[%c2_105, %c0_106, %c0_107] : memref<3x90x64xbf16, #tpu.memory_space<vmem>>, vector<1x90x64xbf16>
    %104 = vector.shape_cast %103 : vector<1x90x64xbf16> to vector<90x64xbf16>
    %cst_108 = arith.constant dense<0.000000e+00> : vector<90x64xf32>
    %105 = tpu.matmul %102, %104, %cst_108 {dimension_numbers = #tpu.dot_dimension_numbers<[1], [0], [0], [1], [0, 0, 1, 1], [], []>} : vector<90x90xbf16>, vector<90x64xbf16>, vector<90x64xf32> -> vector<90x64xf32>
    %106 = arith.addf %99, %105 : vector<90x64xf32>
    %c0_109 = arith.constant 0 : index
    %c0_110 = arith.constant 0 : index
    %107 = vector.load %arg3[%c0_109, %c0_110] : memref<1x64xf32, #tpu.memory_space<vmem>>, vector<1x64xf32>
    %108 = vector.broadcast %107 : vector<1x64xf32> to vector<90x64xf32>
    %109 = arith.addf %106, %108 : vector<90x64xf32>
    %cst_111 = arith.constant 0.000000e+00 : f32
    %110 = vector.broadcast %cst_111 : f32 to vector<90x64xf32>
    %111 = arith.maximumf %109, %110 : vector<90x64xf32>
    %112 = arith.truncf %111 : vector<90x64xf32> to vector<90x64xbf16>
    %c3_112 = arith.constant 3 : index
    %c0_113 = arith.constant 0 : index
    %c0_114 = arith.constant 0 : index
    %113 = vector.load %arg4[%c3_112, %c0_113, %c0_114] : memref<4x90x64xbf16, #tpu.memory_space<vmem>>, vector<1x90x64xbf16>
    %114 = vector.shape_cast %113 : vector<1x90x64xbf16> to vector<90x64xbf16>
    %115 = vector.shape_cast %112 : vector<90x64xbf16> to vector<1x90x64xbf16>
    tpu.vector_store %arg4[%c3_112, %c0_113, %c0_114], %115 {strides = array<i32>} : memref<4x90x64xbf16, #tpu.memory_space<vmem>>, vector<1x90x64xbf16>,
    return
  }
  func.func @transform_0(%arg0: i32) -> (i32, i32, i32, i32) {
    %c0_i32 = arith.constant 0 : i32
    %c0_i32_0 = arith.constant 0 : i32
    %c0_i32_1 = arith.constant 0 : i32
    %c0_i32_2 = arith.constant 0 : i32
    return %arg0, %c0_i32, %c0_i32_0, %c0_i32_1 : i32, i32, i32, i32
  }
  func.func @transform_1(%arg0: i32) -> (i32, i32, i32) {
    %c0_i32 = arith.constant 0 : i32
    %c0_i32_0 = arith.constant 0 : i32
    %c0_i32_1 = arith.constant 0 : i32
    %c0_i32_2 = arith.constant 0 : i32
    return %c0_i32, %c0_i32_0, %c0_i32_1 : i32, i32, i32
  }
  func.func @transform_2(%arg0: i32) -> (i32, i32) {
    %c0_i32 = arith.constant 0 : i32
    %c0_i32_0 = arith.constant 0 : i32
    %c0_i32_1 = arith.constant 0 : i32
    return %c0_i32, %c0_i32_0 : i32, i32
  }
  func.func @transform_3(%arg0: i32) -> (i32, i32, i32) {
    %c0_i32 = arith.constant 0 : i32
    %c0_i32_0 = arith.constant 0 : i32
    %c0_i32_1 = arith.constant 0 : i32
    return %arg0, %c0_i32, %c0_i32_0 : i32, i32, i32
  }
}

module attributes {stable_mosaic.version = 11 : i64} {
  func.func @_conv2_kernel(%arg0: i32, %arg1: memref<8x5760xbf16, #tpu.memory_space<vmem>>, %arg2: memref<5760x128xbf16, #tpu.memory_space<vmem>>, %arg3: memref<1x128xf32, #tpu.memory_space<vmem>>, %arg4: memref<8x128xf32, #tpu.memory_space<vmem>>) attributes {dimension_semantics = [#tpu.dimension_semantics<parallel>], iteration_bounds = array<i64: 1>, scalar_prefetch = 0 : i64, scratch_operands = 0 : i64, tpu.core_type = #tpu.core_type<tc>, window_params = [{transform_indices = @transform_0, window_bounds = array<i64: 8, 5760>}, {pipeline_mode = #tpu.pipeline_mode<synchronous>, transform_indices = @transform_1, window_bounds = array<i64: 5760, 128>}, {pipeline_mode = #tpu.pipeline_mode<synchronous>, transform_indices = @transform_2, window_bounds = array<i64: 1, 128>}, {transform_indices = @transform_3, window_bounds = array<i64: 8, 128>}]} {
    %c0 = arith.constant 0 : index
    %c0_0 = arith.constant 0 : index
    %0 = vector.load %arg1[%c0, %c0_0] : memref<8x5760xbf16, #tpu.memory_space<vmem>>, vector<8x5760xbf16>
    %c0_1 = arith.constant 0 : index
    %c0_2 = arith.constant 0 : index
    %1 = vector.load %arg2[%c0_1, %c0_2] : memref<5760x128xbf16, #tpu.memory_space<vmem>>, vector<5760x128xbf16>
    %cst = arith.constant dense<0.000000e+00> : vector<8x128xf32>
    %2 = tpu.matmul %0, %1, %cst {dimension_numbers = #tpu.dot_dimension_numbers<[1], [0], [0], [1], [0, 0, 1, 1], [], []>} : vector<8x5760xbf16>, vector<5760x128xbf16>, vector<8x128xf32> -> vector<8x128xf32>
    %c0_3 = arith.constant 0 : index
    %c0_4 = arith.constant 0 : index
    %3 = vector.load %arg3[%c0_3, %c0_4] : memref<1x128xf32, #tpu.memory_space<vmem>>, vector<1x128xf32>
    %4 = vector.broadcast %3 : vector<1x128xf32> to vector<8x128xf32>
    %5 = arith.addf %2, %4 : vector<8x128xf32>
    %cst_5 = arith.constant 0.000000e+00 : f32
    %6 = vector.broadcast %cst_5 : f32 to vector<8x128xf32>
    %7 = arith.maximumf %5, %6 : vector<8x128xf32>
    %c0_6 = arith.constant 0 : index
    %c0_7 = arith.constant 0 : index
    %8 = vector.load %arg4[%c0_6, %c0_7] : memref<8x128xf32, #tpu.memory_space<vmem>>, vector<8x128xf32>
    tpu.vector_store %arg4[%c0_6, %c0_7], %7 {strides = array<i32>} : memref<8x128xf32, #tpu.memory_space<vmem>>, vector<8x128xf32>,
    return
  }
  func.func @transform_0(%arg0: i32) -> (i32, i32) {
    %c0_i32 = arith.constant 0 : i32
    %c0_i32_0 = arith.constant 0 : i32
    return %arg0, %c0_i32 : i32, i32
  }
  func.func @transform_1(%arg0: i32) -> (i32, i32) {
    %c0_i32 = arith.constant 0 : i32
    %c0_i32_0 = arith.constant 0 : i32
    %c0_i32_1 = arith.constant 0 : i32
    return %c0_i32, %c0_i32_0 : i32, i32
  }
  func.func @transform_2(%arg0: i32) -> (i32, i32) {
    %c0_i32 = arith.constant 0 : i32
    %c0_i32_0 = arith.constant 0 : i32
    %c0_i32_1 = arith.constant 0 : i32
    return %c0_i32, %c0_i32_0 : i32, i32
  }
  func.func @transform_3(%arg0: i32) -> (i32, i32) {
    %c0_i32 = arith.constant 0 : i32
    %c0_i32_0 = arith.constant 0 : i32
    return %arg0, %c0_i32 : i32, i32
  }
}

</mosaic_0001>

<bundles_post_ra>
// kernel: feature_extractor_forward.2
= control target key start
LH: loop header
LB: loop body
LE: loop exit
PB: predicated region body
PF: predicated region fallthrough
CT: control target
= control target key end

     0   :  { %s3747_s12 = smov 0   ;;  %s4479_s0 = inlined_call_operand.vmem [shape: f32[8,3,90,90], index: 0, kind: input, shape index: {}]   ;;  %s4480_s1 = inlined_call_operand.vmem [shape: bf16[3,90,64], index: 1, kind: input, shape index: {}]   ;;  %s4481_s2 = inlined_call_operand.vmem [shape: f32[1,64], index: 2, kind: input, shape index: {}]   ;;  %s4482_s3 = inlined_call_operand.vmem [shape: bf16[8,90,64], index: 3, kind: output, shape index: {}]  }
   0x1 LB: > { %s2674_s13 = sadd.s32 4294967295, %s3725_s12   ;;  %p2678_p0 = scmp.ge.s32.totalorder %s3725_s12, 1  ;;  %s3725_s12 = sphi %s3747_s12, %s13_s12  }
   0x2   : > { %p139_p1 = scmp.lt.s32.totalorder %s3725_s12, 3 }
   0x4   : > { %p140_p2 = pnand %p2678_p0, %p139_p1 }
   0x5   : > { %s2679_s24 = sshll.u32 (!%p140_p2), %s2674_s13, 2 }
   0x6   : > { %143 = sbr.rel (%p140_p2) target bundleno = 382 (0x17e), region = 32  ;;  %p166_p3 = scmp.lt.s32.totalorder (!%p140_p2), %s2679_s24, 7 }
   0xb   : > { %v3647_v0 = vld [vmem:[%s4480_s1 + $0x58] sm:$0x1f]   ;;  %vm296_vm0 = vcmask 1044480   ;;  %v3649_v1 = vld [vmem:[%s4480_s1 + $0x50] sm:$0xff]   ;;  %v3648_v2 = vld [vmem:[%s4480_s1 + $0x28] sm:$0x1f]  }
   0xc   : > { %3625 = vmatprep.subr.msk.bf16.mxu0 %vm296_vm0, %v3647_v0  ;;  %v298_v3 = vsel %vm296_vm0, %v3647_v0, 0  ;;  %v3650_v4 = vld [vmem:[%s4480_s1 + $0x20] sm:$0xff]   ;;  %3626 = vmatprep.subr.msk.bf16.mxu1 %vm296_vm0, %v3648_v2  ;;  %v435_v5 = vsel %vm296_vm0, %v3648_v2, 0  ;;  %v3651_v6 = vld [vmem:[%s4480_s1 + $0x48] sm:$0xff]   ;;  %v3652_v7 = vld [vmem:[%s4480_s1 + $0x18] sm:$0xff]   ;;  %s4484_s24 = smov (!%p166_p3, %s2679_s24), 7 }
   0xd   : > { %3338 = vmatpush3.bf16.msra.mxu0 %v298_v3  ;;  %3362 = vmatpush3.bf16.msra.mxu1 %v435_v5  ;;  %v3653_v8 = vld [vmem:[%s4480_s1 + $0x40] sm:$0xff]   ;;  %v3654_v9 = vld [vmem:[%s4480_s1 + $0x10] sm:$0xff]   ;;  %s3637_s4 = smul.u32 288, %s4484_s24  ;;  %v3655_v10 = vld [vmem:[%s4480_s1 + $0x38] sm:$0xff]   ;;  %vm277_vm1 = vcmask 736256   ;;  %vm778_vm2 = vcmask 519168  }
   0xe   : > { %3339 = vmatprep.subr.bf16.mxu0 %v3649_v1  ;;  %3363 = vmatprep.subr.bf16.mxu1 %v3650_v4  ;;  %v3656_v14 = vld [vmem:[%s4480_s1 + $0x8] sm:$0xff]   ;;  %v3657_v18 = vld [vmem:[%s4480_s1 + $0x30] sm:$0xff]   ;;  %v3658_v19 = vld [vmem:[%s4480_s1] sm:$0xff]   ;;  %s3638_s18 = smul.u32 48, %s4484_s24  ;;  %vm790_vm3 = vcmask 516096  }
   0xf   : > { %s3792_s9 = scalar_lea.vmem %s4479_s0, %s3637_s4  ;;  %v3659_v21 = vld [vmem:[%s4480_s1 + $0x88] sm:$0x1f]   ;;  %v3660_v25 = vld [vmem:[%s4480_s1 + $0x58] sm:$0x1f]   ;;  %v3661_v34 = vld [vmem:[%s4480_s1 + $0x80] sm:$0xff]  }
  0x10   : > { %v2683_v11 = vld [vmem:[%s3792_s9 + $0x60] sm:$0xff]  ;;  %v2684_v12 = vld [vmem:[%s3792_s9 + $0x68] sm:$0xff]  ;;  %v2685_v20 = vld [vmem:[%s3792_s9 + $0x70] sm:$0xff]  ;;  %v604_v33 = vsel %vm296_vm0, %v3659_v21, 0  ;;  %v908_v36 = vsel %vm296_vm0, %v3660_v25, 0  ;;  %s4246_s24 = scalar_lea.vmem %s4482_s3, %s3638_s18 }
  0x11   : > { %3340 = vmatpush3.bf16.msra.mxu0 %v3649_v1  ;;  %3364 = vmatpush3.bf16.msra.mxu1 %v3650_v4  ;;  %v180_v13 = vld [vmem:[%s3792_s9] sm:$0xff]  ;;  %v223_v15 = vpack.c.bf16 %v2684_v12, %v2683_v11  ;;  %v181_v16 = vld [vmem:[%s3792_s9 + $0x8] sm:$0xff]  ;;  %v2686_v22 = vld [vmem:[%s3792_s9 + $0x78] sm:$0xff] }
  0x12   : > { %3341 = vmatprep.subr.bf16.mxu0 %v3651_v6  ;;  %3365 = vmatprep.subr.bf16.mxu1 %v3652_v7  ;;  %v192_v17 = vpack.c.bf16 %v181_v16, %v180_v13  ;;  %v182_v23 = vld [vmem:[%s3792_s9 + $0x10] sm:$0xff]  ;;  %v183_v24 = vld [vmem:[%s3792_s9 + $0x18] sm:$0xff]  ;;  %v2687_v26 = vld [vmem:[%s3792_s9 + $0x80] sm:$0xff]  ;;  %v224_v29 = vpack.c.bf16 %v2686_v22, %v2685_v20 }
  0x13   : > { %3349 = vmatprep.mubr.msk.bf16.mxu0 %vm277_vm1, %v223_v15  ;;  %v2688_v27 = vld [vmem:[%s3792_s9 + $0x88] sm:$0xff]  ;;  %v184_v28 = vld [vmem:[%s3792_s9 + $0x20] sm:$0xff]  ;;  %v193_v32 = vpack.c.bf16 %v183_v24, %v182_v23  ;;  %v3662_v37 = vld [vmem:[%s4480_s1 + $0x50] sm:$0xff]  }
  0x14   : > { %3373 = vmatprep.mubr.msk.bf16.mxu1 %vm277_vm1, %v192_v17  ;;  %v185_v30 = vld [vmem:[%s3792_s9 + $0x28] sm:$0xff]  ;;  %v225_v31 = vpack.c.bf16 %v2688_v27, %v2687_v26  ;;  %v2689_v38 = vld [vmem:[%s3792_s9 + $0x90] sm:$0xff]  ;;  %v2690_v39 = vld [vmem:[%s3792_s9 + $0x98] sm:$0xff] }
  0x15   : > { %3342 = vmatpush3.bf16.msra.mxu0 %v3651_v6  ;;  %3366 = vmatpush3.bf16.msra.mxu1 %v3652_v7  ;;  %v194_v35 = vpack.c.bf16 %v185_v30, %v184_v28  ;;  %v186_v40 = vld [vmem:[%s3792_s9 + $0x30] sm:$0xff]  ;;  %v187_v41 = vld [vmem:[%s3792_s9 + $0x38] sm:$0xff]  ;;  %v2691_v43 = vld [vmem:[%s3792_s9 + $0xa0] sm:$0xff]  ;;  %v226_v47 = vpack.c.bf16 %v2690_v39, %v2689_v38 }
  0x16   : > { %3343 = vmatprep.subr.bf16.mxu0 %v3653_v8  ;;  %3367 = vmatprep.subr.bf16.mxu1 %v3654_v9  ;;  %v3663_v42 = vld [vmem:[%s4480_s1 + $0x78] sm:$0xff]   ;;  %v3664_v44 = vld [vmem:[%s4480_s1 + $0x48] sm:$0xff]   ;;  %v188_v46 = vld [vmem:[%s3792_s9 + $0x40] sm:$0xff]  ;;  %v195_v50 = vpack.c.bf16 %v187_v41, %v186_v40 }
  0x17   : > { %v2692_v45 = vld [vmem:[%s3792_s9 + $0xa8] sm:$0xff]  ;;  %v3665_v51 = vld [vmem:[%s4480_s1 + $0x70] sm:$0xff]   ;;  %v3666_v52 = vld [vmem:[%s4480_s1 + $0x40] sm:$0xff]  }
  0x18   : > { %v189_v48 = vld [vmem:[%s3792_s9 + $0x48] sm:$0xff]  ;;  %v227_v49 = vpack.c.bf16 %v2692_v45, %v2691_v43  ;;  %v2693_v54 = vld [vmem:[%s3792_s9 + $0xb0] sm:$0xff]  ;;  %v2694_v55 = vld [vmem:[%s3792_s9 + $0xb8] sm:$0x3] }
  0x19   : > { %3344 = vmatpush3.bf16.msra.mxu0 %v3653_v8  ;;  %3368 = vmatpush3.bf16.msra.mxu1 %v3654_v9  ;;  %v196_v53 = vpack.c.bf16 %v189_v48, %v188_v46  ;;  %v3667_v56 = vld [vmem:[%s4480_s1 + $0x68] sm:$0xff]   ;;  %v190_v57 = vld [vmem:[%s3792_s9 + $0x50] sm:$0xff]  ;;  %v191_v58 = vld [vmem:[%s3792_s9 + $0x58] sm:$0x3]  ;;  %v228_v62 = vpack.c.bf16 %v2694_v55, %v2693_v54 }
  0x1a   : > { %3345 = vmatprep.subr.bf16.mxu0 %v3655_v10  ;;  %3369 = vmatprep.subr.bf16.mxu1 %v3656_v14  ;;  %v2731_v59 = vld [vmem:[%s3792_s9 + $0xc0] sm:$0xff]  ;;  %v2732_v60 = vld [vmem:[%s3792_s9 + $0xc8] sm:$0xff]  ;;  %v3668_v61 = vld [vmem:[%s4480_s1 + $0x38] sm:$0xff]   ;;  %v197_v2 = vpack.c.bf16 %v191_v58, %v190_v57 }
  0x1b   : > { %v2792_v63 = vld [vmem:[%s3792_s9 + $0x180] sm:$0xff]  ;;  %v2793_v0 = vld [vmem:[%s3792_s9 + $0x188] sm:$0xff]  ;;  %v531_v1 = vpack.c.bf16 %v2732_v60, %v2731_v59  ;;  %v3670_v4 = vld [vmem:[%s4480_s1 + $0x30] sm:$0xff]  }
  0x1c   : > { %v3669_v3 = vld [vmem:[%s4480_s1 + $0x60] sm:$0xff]   ;;  %v836_v5 = vpack.c.bf16 %v2793_v0, %v2792_v63  ;;  %v2733_v6 = vld [vmem:[%s3792_s9 + $0xd0] sm:$0xff]  ;;  %v2734_v7 = vld [vmem:[%s3792_s9 + $0xd8] sm:$0xff] }
  0x1d   : > { %3346 = vmatpush3.bf16.msra.mxu0 %v3655_v10  ;;  %3370 = vmatpush3.bf16.msra.mxu1 %v3656_v14  ;;  %v3671_v8 = vld [vmem:[%s4480_s1 + $0x28] sm:$0x1f]   ;;  %v2735_v9 = vld [vmem:[%s3792_s9 + $0xe0] sm:$0xff]  ;;  %v2794_v11 = vld [vmem:[%s3792_s9 + $0x190] sm:$0xff]  ;;  %v532_v13 = vpack.c.bf16 %v2734_v7, %v2733_v6 }
  0x1e   : > { %3347 = vmatprep.subr.bf16.mxu0 %v3657_v18  ;;  %3371 = vmatprep.subr.bf16.mxu1 %v3658_v19  ;;  %v2736_v10 = vld [vmem:[%s3792_s9 + $0xe8] sm:$0xff]  ;;  %v2795_v12 = vld [vmem:[%s3792_s9 + $0x198] sm:$0xff]  ;;  %v2796_v15 = vld [vmem:[%s3792_s9 + $0x1a0] sm:$0xff] }
  0x1f   : > { %v3672_v14 = vld [vmem:[%s4480_s1 + $0x88] sm:$0x1f]   ;;  %v533_v17 = vpack.c.bf16 %v2736_v10, %v2735_v9  ;;  %v3673_v20 = vld [vmem:[%s4480_s1 + $0x20] sm:$0xff]   ;;  %v2737_v24 = vld [vmem:[%s3792_s9 + $0xf0] sm:$0xff] }
  0x20   : > { %v2797_v16 = vld [vmem:[%s3792_s9 + $0x1a8] sm:$0xff]  ;;  %v1213_v23 = vsel %vm296_vm0, %v3672_v14, 0  ;;  %v3675_v26 = vld [vmem:[%s4480_s1 + $0x18] sm:$0xff]   ;;  %v2739_v27 = vld [vmem:[%s3792_s9 + $0x100] sm:$0xff] }
  0x21   : > { %3348 = vmatpush3.bf16.msra.mxu0 %v3657_v18  ;;  %3372 = vmatpush3.bf16.msra.mxu1 %v3658_v19  ;;  %v837_v18 = vpack.c.bf16 %v2795_v12, %v2794_v11  ;;  %v1045_v19 = vsel %vm296_vm0, %v3671_v8, 0  ;;  %v838_v22 = vpack.c.bf16 %v2797_v16, %v2796_v15  ;;  %v2740_v28 = vld [vmem:[%s3792_s9 + $0x108] sm:$0xff]  ;;  %v2799_v30 = vld [vmem:[%s3792_s9 + $0x1b8] sm:$0xff]  ;;  %v3678_v38 = vld [vmem:[%s4480_s1 + $0x70] sm:$0xff]  }
  0x22   : > { %3627 = vmatprep.subr.msk.bf16.mxu0 %vm296_vm0, %v3659_v21  ;;  %3628 = vmatprep.subr.msk.bf16.mxu1 %vm296_vm0, %v3660_v25  ;;  %v3674_v21 = vld [vmem:[%s4480_s1 + $0x80] sm:$0xff]   ;;  %v2738_v25 = vld [vmem:[%s3792_s9 + $0xf8] sm:$0xff]  ;;  %v2741_v40 = vld [vmem:[%s3792_s9 + $0x110] sm:$0xff] }
  0x23   : > { %v2742_v41 = vld [vmem:[%s3792_s9 + $0x118] sm:$0x3]  ;;  %v3680_v45 = vld [vmem:[%s4480_s1 + $0x68] sm:$0xff]   ;;  %v2780_v46 = vld [vmem:[%s3792_s9 + $0x120] sm:$0xff] }
  0x24   : > { %3350 = vmatmul.mubr.msk.bf16.vlgmr.msra.gmra.mxu0 %vm277_vm1, %v224_v29  ;;  %3374 = vmatmul.mubr.msk.bf16.vlgmr.msra.gmra.mxu1 %vm277_vm1, %v193_v32  ;;  %v2798_v29 = vld [vmem:[%s3792_s9 + $0x1b0] sm:$0xff]  ;;  %v534_v32 = vpack.c.bf16 %v2738_v25, %v2737_v24  ;;  %v2803_v43 = vld [vmem:[%s3792_s9 + $0x1d8] sm:$0x3]  ;;  %v2840_v48 = vld [vmem:[%s3792_s9 + $0x1e0] sm:$0xff] }
  0x25   : > { %3386 = vmatpush3.bf16.msra.mxu0 %v604_v33  ;;  %3353 = vmatprep.mubr.msk.bf16.mxu0 %vm277_vm1, %v225_v31  ;;  %v3676_v31 = vld [vmem:[%s4480_s1 + $0x78] sm:$0xff]   ;;  %v2800_v33 = vld [vmem:[%s3792_s9 + $0x1c0] sm:$0xff]  ;;  %v2842_v58 = vld [vmem:[%s3792_s9 + $0x1f0] sm:$0xff] }
  0x26   : > { %3387 = vmatprep.subr.bf16.mxu0 %v3661_v34  ;;  %3410 = vmatpush3.bf16.msra.mxu1 %v908_v36  ;;  %v839_v36 = vpack.c.bf16 %v2799_v30, %v2798_v29  ;;  %v3682_v55 = vld [vmem:[%s4480_s1 + $0x60] sm:$0xff]   ;;  %v2783_v57 = vld [vmem:[%s3792_s9 + $0x138] sm:$0xff]  ;;  %v2785_v63 = vld [vmem:[%s3792_s9 + $0x148] sm:$0xff] }
  0x27   : > { %3377 = vmatprep.mubr.msk.bf16.mxu1 %vm277_vm1, %v194_v35  ;;  %3411 = vmatprep.subr.bf16.mxu1 %v3662_v37  ;;  %v535_v35 = vpack.c.bf16 %v2740_v28, %v2739_v27  ;;  %v2843_v59 = vld [vmem:[%s3792_s9 + $0x1f8] sm:$0xff]  ;;  %v2844_v0 = vld [vmem:[%s3792_s9 + $0x200] sm:$0xff]  ;;  %v3685_v6 = vld [vmem:[%s4480_s1 + $0x50] sm:$0xff]  }
  0x28   : > { %v3683_v60 = vld [vmem:[%s4480_s1 + $0x58] sm:$0x1f]   ;;  %v3686_v7 = vld [vmem:[%s4480_s1 + $0x20] sm:$0xff]   ;;  %v2786_v9 = vld [vmem:[%s3792_s9 + $0x150] sm:$0xff] }
  0x29   : > { %3388 = vmatpush3.bf16.msra.mxu0 %v3661_v34  ;;  %v2801_v34 = vld [vmem:[%s3792_s9 + $0x1c8] sm:$0xff]  ;;  %v2787_v11 = vld [vmem:[%s3792_s9 + $0x158] sm:$0xff]  ;;  %v2788_v15 = vld [vmem:[%s3792_s9 + $0x160] sm:$0xff] }
  0x2a   : > { %3389 = vmatprep.subr.bf16.mxu0 %v3663_v42  ;;  %3412 = vmatpush3.bf16.msra.mxu1 %v3662_v37  ;;  %v3677_v37 = vld [vmem:[%s4480_s1 + $0x10] sm:$0xff]   ;;  %v840_v39 = vpack.c.bf16 %v2801_v34, %v2800_v33  ;;  %v3687_v12 = vld [vmem:[%s4480_s1 + $0x48] sm:$0xff]   ;;  %v2791_v27 = vld [vmem:[%s3792_s9 + $0x178] sm:$0x3] }
  0x2b   : > { %3413 = vmatprep.subr.bf16.mxu1 %v3664_v44  ;;  %v2789_v16 = vld [vmem:[%s3792_s9 + $0x168] sm:$0xff]  ;;  %v3690_v24 = vld [vmem:[%s4480_s1 + $0x10] sm:$0xff]   ;;  %v3691_v28 = vld [vmem:[%s4480_s1 + $0x38] sm:$0xff]  }
  0x2c   : > { %3354 = vmatmul.mubr.msk.bf16.gmra.mxu0 %vm277_vm1, %v226_v47  ;;  %3378 = vmatmul.mubr.msk.bf16.gmra.mxu1 %vm277_vm1, %v195_v50  ;;  %v2781_v47 = vld [vmem:[%s3792_s9 + $0x128] sm:$0xff]  ;;  %v2913_v29 = vld [vmem:[%s3792_s9 + $0x2a0] sm:$0xff] }
  0x2d   : > { %3390 = vmatpush3.bf16.msra.mxu0 %v3663_v42  ;;  %3357 = vmatprep.mubr.msk.bf16.mxu0 %vm277_vm1, %v227_v49  ;;  %v2802_v42 = vld [vmem:[%s3792_s9 + $0x1d0] sm:$0xff]  ;;  %v536_v49 = vpack.c.bf16 %v2742_v41, %v2741_v40  ;;  %v2841_v50 = vld [vmem:[%s3792_s9 + $0x1e8] sm:$0xff]  ;;  %v3694_v40 = vld [vmem:[%s4480_s1] sm:$0xff]  }
  0x2e   : > { %3391 = vmatprep.subr.bf16.mxu0 %v3665_v51  ;;  %3414 = vmatpush3.bf16.msra.mxu1 %v3664_v44  ;;  %v3679_v44 = vld [vmem:[%s4480_s1 + $0x8] sm:$0xff]   ;;  %v1141_v54 = vpack.c.bf16 %v2841_v50, %v2840_v48  ;;  %v2904_v48 = vld [vmem:[%s3792_s9 + $0x258] sm:$0xff] }
  0x2f   : > { %3381 = vmatprep.mubr.msk.bf16.mxu1 %vm277_vm1, %v196_v53  ;;  %3415 = vmatprep.subr.bf16.mxu1 %v3666_v52  ;;  %v3681_v53 = vld [vmem:[%s4480_s1] sm:$0xff]   ;;  %v2914_v30 = vld [vmem:[%s3792_s9 + $0x2a8] sm:$0xff] }
  0x30   : > { %v3692_v34 = vld [vmem:[%s4480_s1 + $0x8] sm:$0xff]  }
  0x31   : > { %3392 = vmatpush3.bf16.msra.mxu0 %v3665_v51  ;;  %v805_v51 = vpack.c.bf16 %v2781_v47, %v2780_v46  ;;  %v2918_v46 = vld [vmem:[%s3792_s9 + $0x2c8] sm:$0xff]  ;;  %v2903_v47 = vld [vmem:[%s3792_s9 + $0x250] sm:$0xff] }
  0x32   : > { %3393 = vmatprep.subr.bf16.mxu0 %v3667_v56  ;;  %3416 = vmatpush3.bf16.msra.mxu1 %v3666_v52  ;;  %v841_v52 = vpack.c.bf16 %v2803_v43, %v2802_v42  ;;  %v2915_v42 = vld [vmem:[%s3792_s9 + $0x2b0] sm:$0xff]  ;;  %v2916_v43 = vld [vmem:[%s3792_s9 + $0x2b8] sm:$0xff] }
  0x33   : > { %3417 = vmatprep.subr.bf16.mxu1 %v3668_v61  ;;  %v1445_v50 = vpack.c.bf16 %v2916_v43, %v2915_v42  ;;  %v3709_v42 = vld [vmem:[%s4480_s1 + $0x20] sm:$0xff]  }
  0x34   : > { %3358 = vmatmul.mubr.msk.bf16.gmra.mxu0 %vm277_vm1, %v228_v62  ;;  %3382 = vmatmul.mubr.msk.bf16.gmra.mxu1 %vm277_vm1, %v197_v2  ;;  %v3684_v62 = vld [vmem:[%s4480_s1 + $0x28] sm:$0x1f]  }
  0x35   : > { %3394 = vmatpush3.bf16.msra.mxu0 %v3667_v56  ;;  %3397 = vmatprep.mubr.msk.bf16.mxu0 %vm277_vm1, %v531_v1  ;;  %v2782_v56 = vld [vmem:[%s3792_s9 + $0x130] sm:$0xff]  ;;  %v2845_v2 = vld [vmem:[%s3792_s9 + $0x208] sm:$0xff]  ;;  %v1653_v10 = vsel %vm296_vm0, %v3684_v62, 0 }
  0x36   : > { %3395 = vmatprep.subr.bf16.mxu0 %v3669_v3  ;;  %3418 = vmatpush3.bf16.msra.mxu1 %v3668_v61  ;;  %v2784_v61 = vld [vmem:[%s3792_s9 + $0x140] sm:$0xff]  ;;  %v806_v1 = vpack.c.bf16 %v2783_v57, %v2782_v56  ;;  %v3698_v57 = vld [vmem:[%s4480_s1 + $0x50] sm:$0xff]  }
  0x37   : > { %3421 = vmatprep.mubr.msk.bf16.mxu1 %vm277_vm1, %v836_v5  ;;  %3419 = vmatprep.subr.bf16.mxu1 %v3670_v4  ;;  %v1516_v5 = vsel %vm296_vm0, %v3683_v60, 0  ;;  %v3697_v56 = vld [vmem:[%s4480_s1 + $0x80] sm:$0xff]  }
  0x39   : > { %3396 = vmatpush3.bf16.msra.mxu0 %v3669_v3  ;;  %v807_v3 = vpack.c.bf16 %v2785_v63, %v2784_v61  ;;  %v2920_v61 = vld [vmem:[%s3792_s9 + $0x2d8] sm:$0xff] }
  0x3a   : > { %3629 = vmatprep.subr.msk.bf16.mxu0 %vm296_vm0, %v3671_v8  ;;  %3420 = vmatpush3.bf16.msra.mxu1 %v3670_v4  ;;  %v1142_v4 = vpack.c.bf16 %v2843_v59, %v2842_v58  ;;  %v1143_v8 = vpack.c.bf16 %v2845_v2, %v2844_v0  ;;  %v2908_v63 = vld [vmem:[%s3792_s9 + $0x278] sm:$0xff]  ;;  %v2921_v2 = vld [vmem:[%s3792_s9 + $0x2e0] sm:$0xff] }
  0x3b   : > { %3630 = vmatprep.subr.msk.bf16.mxu1 %vm296_vm0, %v3672_v14  ;;  %v2847_v14 = vld [vmem:[%s3792_s9 + $0x218] sm:$0xff] }
  0x3c   : > { %3398 = vmatmul.mubr.msk.bf16.vlgmr.msra.gmra.mxu0 %vm277_vm1, %v532_v13  ;;  %v2846_v13 = vld [vmem:[%s3792_s9 + $0x210] sm:$0xff]  ;;  %v3699_v0 = vld [vmem:[%s4480_s1 + $0x78] sm:$0xff]  }
  0x3d   : > { %3434 = vmatpush3.bf16.msra.mxu0 %v1045_v19  ;;  %3401 = vmatprep.mubr.msk.bf16.mxu0 %vm277_vm1, %v533_v17  ;;  %v3688_v17 = vld [vmem:[%s4480_s1 + $0x18] sm:$0xff]   ;;  %v2848_v19 = vld [vmem:[%s3792_s9 + $0x220] sm:$0xff] }
  0x3e   : > { %3422 = vmatmul.mubr.msk.bf16.vlgmr.msra.gmra.mxu1 %vm277_vm1, %v837_v18  ;;  %3435 = vmatprep.subr.bf16.mxu0 %v3673_v20  ;;  %v808_v18 = vpack.c.bf16 %v2787_v11, %v2786_v9  ;;  %v3701_v9 = vld [vmem:[%s4480_s1 + $0x70] sm:$0xff]   ;;  %v3702_v11 = vld [vmem:[%s4480_s1 + $0x40] sm:$0xff]  }
  0x3f   : > { %3458 = vmatpush3.bf16.msra.mxu1 %v1213_v23  ;;  %3425 = vmatprep.mubr.msk.bf16.mxu1 %vm277_vm1, %v838_v22  ;;  %v1144_v22 = vpack.c.bf16 %v2847_v14, %v2846_v13  ;;  %v3689_v23 = vld [vmem:[%s4480_s1 + $0x40] sm:$0xff]   ;;  %v2924_v13 = vld [vmem:[%s3792_s9 + $0x2f8] sm:$0x3]  ;;  %v2911_v14 = vld [vmem:[%s3792_s9 + $0x290] sm:$0xff] }
  0x40   : > { %3459 = vmatprep.subr.bf16.mxu1 %v3674_v21 }
  0x41   : > { %3436 = vmatpush3.bf16.msra.mxu0 %v3673_v20  ;;  %v2849_v20 = vld [vmem:[%s3792_s9 + $0x228] sm:$0xff] }
  0x42   : > { %3437 = vmatprep.subr.bf16.mxu0 %v3675_v26  ;;  %v1145_v25 = vpack.c.bf16 %v2849_v20, %v2848_v19  ;;  %v2962_v19 = vld [vmem:[%s3792_s9 + $0x308] sm:$0xff]  ;;  %v3034_v20 = vld [vmem:[%s3792_s9 + $0x3c0] sm:$0xff] }
  0x43   : > { %3460 = vmatpush3.bf16.msra.mxu1 %v3674_v21  ;;  %v809_v21 = vpack.c.bf16 %v2789_v16, %v2788_v15  ;;  %v2912_v15 = vld [vmem:[%s3792_s9 + $0x298] sm:$0x3]  ;;  %v3703_v16 = vld [vmem:[%s4480_s1 + $0x68] sm:$0xff]  }
  0x44   : > { %3402 = vmatmul.mubr.msk.bf16.gmra.mxu0 %vm277_vm1, %v534_v32  ;;  %3461 = vmatprep.subr.bf16.mxu1 %v3676_v31  ;;  %v2851_v32 = vld [vmem:[%s3792_s9 + $0x238] sm:$0x3] }
  0x45   : > { %3438 = vmatpush3.bf16.msra.mxu0 %v3675_v26  ;;  %3405 = vmatprep.mubr.msk.bf16.mxu0 %vm277_vm1, %v535_v35  ;;  %v2790_v26 = vld [vmem:[%s3792_s9 + $0x170] sm:$0xff]  ;;  %v2901_v35 = vld [vmem:[%s3792_s9 + $0x240] sm:$0xff] }
  0x46   : > { %3426 = vmatmul.mubr.msk.bf16.gmra.mxu1 %vm277_vm1, %v839_v36  ;;  %3439 = vmatprep.subr.bf16.mxu0 %v3677_v37  ;;  %v810_v33 = vpack.c.bf16 %v2791_v27, %v2790_v26  ;;  %v2902_v36 = vld [vmem:[%s3792_s9 + $0x248] sm:$0xff]  ;;  %v3706_v27 = vld [vmem:[%s4480_s1 + $0x30] sm:$0xff]  }
  0x47   : > { %3462 = vmatpush3.bf16.msra.mxu1 %v3676_v31  ;;  %3429 = vmatprep.mubr.msk.bf16.mxu1 %vm277_vm1, %v840_v39  ;;  %v2850_v31 = vld [vmem:[%s3792_s9 + $0x230] sm:$0xff]  ;;  %v1413_v41 = vpack.c.bf16 %v2902_v36, %v2901_v35  ;;  %v3708_v36 = vld [vmem:[%s4480_s1 + $0x88] sm:$0x1f]  }
  0x48   : > { %3463 = vmatprep.subr.bf16.mxu1 %v3678_v38  ;;  %v3693_v39 = vld [vmem:[%s4480_s1 + $0x30] sm:$0xff]  }
  0x49   : > { %3440 = vmatpush3.bf16.msra.mxu0 %v3677_v37  ;;  %v1444_v37 = vpack.c.bf16 %v2914_v30, %v2913_v29  ;;  %v2964_v29 = vld [vmem:[%s3792_s9 + $0x318] sm:$0xff]  ;;  %v3707_v30 = vld [vmem:[%s4480_s1 + $0x28] sm:$0x1f]  }
  0x4a   : > { %3441 = vmatprep.subr.bf16.mxu0 %v3679_v44 }
  0x4b   : > { %3464 = vmatpush3.bf16.msra.mxu1 %v3678_v38  ;;  %v1146_v38 = vpack.c.bf16 %v2851_v32, %v2850_v31  ;;  %v2965_v31 = vld [vmem:[%s3792_s9 + $0x320] sm:$0xff]  ;;  %v2966_v32 = vld [vmem:[%s3792_s9 + $0x328] sm:$0xff] }
  0x4c   : > { %3406 = vmatmul.mubr.msk.bf16.gmra.mxu0 %vm277_vm1, %v536_v49  ;;  %3465 = vmatprep.subr.bf16.mxu1 %v3680_v45  ;;  %v3696_v49 = vld [vmem:[%s4480_s1 + $0x58] sm:$0x1f]  }
  0x4d   : > { %3442 = vmatpush3.bf16.msra.mxu0 %v3679_v44  ;;  %3445 = vmatprep.mubr.msk.bf16.mxu0 %vm277_vm1, %v805_v51  ;;  %v3695_v44 = vld [vmem:[%s4480_s1 + $0x88] sm:$0x1f]   ;;  %v2905_v51 = vld [vmem:[%s3792_s9 + $0x260] sm:$0xff]  ;;  %v2124_v59 = vsel %vm296_vm0, %v3696_v49, 0 }
  0x4e   : > { %3430 = vmatmul.mubr.msk.bf16.gmra.mxu1 %vm277_vm1, %v841_v52  ;;  %3443 = vmatprep.subr.bf16.mxu0 %v3681_v53  ;;  %v2906_v52 = vld [vmem:[%s3792_s9 + $0x268] sm:$0xff] }
  0x4f   : > { %3466 = vmatpush3.bf16.msra.mxu1 %v3680_v45  ;;  %3469 = vmatprep.mubr.msk.bf16.mxu1 %vm277_vm1, %v1141_v54  ;;  %v2917_v45 = vld [vmem:[%s3792_s9 + $0x2c0] sm:$0xff]  ;;  %v1414_v54 = vpack.c.bf16 %v2904_v48, %v2903_v47  ;;  %v1415_v58 = vpack.c.bf16 %v2906_v52, %v2905_v51  ;;  %v2968_v47 = vld [vmem:[%s3792_s9 + $0x338] sm:$0xff]  ;;  %v3040_v51 = vld [vmem:[%s3792_s9 + $0x3f0] sm:$0xff] }
  0x50   : > { %3467 = vmatprep.subr.bf16.mxu1 %v3682_v55  ;;  %v3711_v48 = vld [vmem:[%s4480_s1 + $0x18] sm:$0xff]  }
  0x51   : > { %3444 = vmatpush3.bf16.msra.mxu0 %v3681_v53  ;;  %v1446_v53 = vpack.c.bf16 %v2918_v46, %v2917_v45  ;;  %v3710_v45 = vld [vmem:[%s4480_s1 + $0x80] sm:$0xff]   ;;  %v2967_v46 = vld [vmem:[%s3792_s9 + $0x330] sm:$0xff]  ;;  %v3041_v52 = vld [vmem:[%s3792_s9 + $0x3f8] sm:$0xff] }
  0x52   : > { %3631 = vmatprep.subr.msk.bf16.mxu0 %vm296_vm0, %v3683_v60  ;;  %v2919_v60 = vld [vmem:[%s3792_s9 + $0x2d0] sm:$0xff] }
  0x53   : > { %3468 = vmatpush3.bf16.msra.mxu1 %v3682_v55  ;;  %v1821_v55 = vsel %vm296_vm0, %v3695_v44, 0 }
  0x54   : > { %3446 = vmatmul.mubr.msk.bf16.vlgmr.msra.gmra.mxu0 %vm277_vm1, %v806_v1  ;;  %3632 = vmatprep.subr.msk.bf16.mxu1 %vm296_vm0, %v3684_v62  ;;  %v2907_v62 = vld [vmem:[%s3792_s9 + $0x270] sm:$0xff]  ;;  %v3700_v1 = vld [vmem:[%s4480_s1 + $0x48] sm:$0xff]  }
  0x55   : > { %3482 = vmatpush3.bf16.msra.mxu0 %v1516_v5  ;;  %3449 = vmatprep.mubr.msk.bf16.mxu0 %vm277_vm1, %v807_v3  ;;  %v2922_v3 = vld [vmem:[%s3792_s9 + $0x2e8] sm:$0xff]  ;;  %v1447_v5 = vpack.c.bf16 %v2920_v61, %v2919_v60  ;;  %v3714_v61 = vld [vmem:[%s4480_s1 + $0x70] sm:$0xff]  }
  0x56   : > { %3470 = vmatmul.mubr.msk.bf16.vlgmr.msra.gmra.mxu1 %vm277_vm1, %v1142_v4  ;;  %3483 = vmatprep.subr.bf16.mxu0 %v3685_v6  ;;  %v2909_v4 = vld [vmem:[%s3792_s9 + $0x280] sm:$0xff] }
  0x57   : > { %3506 = vmatpush3.bf16.msra.mxu1 %v1653_v10  ;;  %3473 = vmatprep.mubr.msk.bf16.mxu1 %vm277_vm1, %v1143_v8  ;;  %v1416_v8 = vpack.c.bf16 %v2908_v63, %v2907_v62  ;;  %v2971_v62 = vld [vmem:[%s3792_s9 + $0x350] sm:$0xff]  ;;  %v2972_v63 = vld [vmem:[%s3792_s9 + $0x358] sm:$0x3] }
  0x58   : > { %3507 = vmatprep.subr.bf16.mxu1 %v3686_v7 }
  0x59   : > { %3484 = vmatpush3.bf16.msra.mxu0 %v3685_v6  ;;  %v2910_v6 = vld [vmem:[%s3792_s9 + $0x288] sm:$0xff] }
  0x5a   : > { %3485 = vmatprep.subr.bf16.mxu0 %v3687_v12  ;;  %v1417_v10 = vpack.c.bf16 %v2910_v6, %v2909_v4  ;;  %v3045_v4 = vld [vmem:[%s3792_s9 + $0x418] sm:$0x3]  ;;  %v3716_v6 = vld [vmem:[%s4480_s1 + $0x68] sm:$0xff]  }
  0x5b   : > { %3508 = vmatpush3.bf16.msra.mxu1 %v3686_v7  ;;  %v1448_v7 = vpack.c.bf16 %v2922_v3, %v2921_v2  ;;  %v3023_v2 = vld [vmem:[%s3792_s9 + $0x368] sm:$0xff]  ;;  %v3044_v3 = vld [vmem:[%s3792_s9 + $0x410] sm:$0xff] }
  0x5c   : > { %3450 = vmatmul.mubr.msk.bf16.gmra.mxu0 %vm277_vm1, %v808_v18  ;;  %3509 = vmatprep.subr.bf16.mxu1 %v3688_v17  ;;  %v3704_v18 = vld [vmem:[%s4480_s1 + $0x38] sm:$0xff]  }
  0x5d   : > { %3486 = vmatpush3.bf16.msra.mxu0 %v3687_v12  ;;  %3453 = vmatprep.mubr.msk.bf16.mxu0 %vm277_vm1, %v809_v21  ;;  %v2923_v12 = vld [vmem:[%s3792_s9 + $0x2f0] sm:$0xff] }
  0x5e   : > { %3474 = vmatmul.mubr.msk.bf16.gmra.mxu1 %vm277_vm1, %v1144_v22  ;;  %3487 = vmatprep.subr.bf16.mxu0 %v3689_v23  ;;  %v1449_v21 = vpack.c.bf16 %v2924_v13, %v2923_v12  ;;  %v3035_v22 = vld [vmem:[%s3792_s9 + $0x3c8] sm:$0xff]  ;;  %v3718_v13 = vld [vmem:[%s4480_s1 + $0x60] sm:$0xff]  }
  0x5f   : > { %3510 = vmatpush3.bf16.msra.mxu1 %v3688_v17  ;;  %3477 = vmatprep.mubr.msk.bf16.mxu1 %vm277_vm1, %v1145_v25  ;;  %v2961_v17 = vld [vmem:[%s3792_s9 + $0x300] sm:$0xff]  ;;  %v2052_v26 = vpack.c.bf16 %v3035_v22, %v3034_v20  ;;  %v3087_v22 = vld [vmem:[%s3792_s9 + $0x448] sm:$0xff] }
  0x60   : > { %3511 = vmatprep.subr.bf16.mxu1 %v3690_v24  ;;  %v3705_v25 = vld [vmem:[%s4480_s1 + $0x60] sm:$0xff]  }
  0x61   : > { %3488 = vmatpush3.bf16.msra.mxu0 %v3689_v23  ;;  %v1749_v23 = vpack.c.bf16 %v2962_v19, %v2961_v17  ;;  %v3027_v17 = vld [vmem:[%s3792_s9 + $0x388] sm:$0xff]  ;;  %v3085_v19 = vld [vmem:[%s3792_s9 + $0x438] sm:$0xff] }
  0x62   : > { %3489 = vmatprep.subr.bf16.mxu0 %v3691_v28 }
  0x63   : > { %3512 = vmatpush3.bf16.msra.mxu1 %v3690_v24  ;;  %v1418_v24 = vpack.c.bf16 %v2912_v15, %v2911_v14  ;;  %v3024_v14 = vld [vmem:[%s3792_s9 + $0x370] sm:$0xff]  ;;  %v3025_v15 = vld [vmem:[%s3792_s9 + $0x378] sm:$0xff] }
  0x64   : > { %3454 = vmatmul.mubr.msk.bf16.gmra.mxu0 %vm277_vm1, %v810_v33  ;;  %3513 = vmatprep.subr.bf16.mxu1 %v3692_v34  ;;  %v3036_v33 = vld [vmem:[%s3792_s9 + $0x3d0] sm:$0xff]  ;;  %v2022_v20 = vpack.c.bf16 %v3025_v15, %v3024_v14 }
  0x65   : > { %3490 = vmatpush3.bf16.msra.mxu0 %v3691_v28  ;;  %3493 = vmatprep.mubr.msk.bf16.mxu0 %vm277_vm1, %v1444_v37  ;;  %v2963_v28 = vld [vmem:[%s3792_s9 + $0x310] sm:$0xff]  ;;  %v3038_v37 = vld [vmem:[%s3792_s9 + $0x3e0] sm:$0xff] }
  0x66   : > { %3478 = vmatmul.mubr.msk.bf16.gmra.mxu1 %vm277_vm1, %v1146_v38  ;;  %3491 = vmatprep.subr.bf16.mxu0 %v3693_v39  ;;  %v1750_v35 = vpack.c.bf16 %v2964_v29, %v2963_v28  ;;  %v3039_v38 = vld [vmem:[%s3792_s9 + $0x3e8] sm:$0xff]  ;;  %v3030_v28 = vld [vmem:[%s3792_s9 + $0x3a0] sm:$0xff] }
  0x67   : > { %3514 = vmatpush3.bf16.msra.mxu1 %v3692_v34  ;;  %3517 = vmatprep.mubr.msk.bf16.mxu1 %vm277_vm1, %v1413_v41  ;;  %v3037_v34 = vld [vmem:[%s3792_s9 + $0x3d8] sm:$0xff]  ;;  %v2261_v41 = vsel %vm296_vm0, %v3707_v30, 0  ;;  %v2054_v43 = vpack.c.bf16 %v3039_v38, %v3038_v37  ;;  %v3031_v29 = vld [vmem:[%s3792_s9 + $0x3a8] sm:$0xff]  ;;  %v3032_v38 = vld [vmem:[%s3792_s9 + $0x3b0] sm:$0xff] }
  0x68   : > { %3515 = vmatprep.subr.bf16.mxu1 %v3694_v40 }
  0x69   : > { %3492 = vmatpush3.bf16.msra.mxu0 %v3693_v39  ;;  %v1751_v39 = vpack.c.bf16 %v2966_v32, %v2965_v31  ;;  %v3089_v31 = vld [vmem:[%s3792_s9 + $0x458] sm:$0xff] }
  0x6a   : > { %3633 = vmatprep.subr.msk.bf16.mxu0 %vm296_vm0, %v3695_v44  ;;  %v2429_v44 = vsel %vm296_vm0, %v3708_v36, 0 }
  0x6b   : > { %3516 = vmatpush3.bf16.msra.mxu1 %v3694_v40  ;;  %v2053_v40 = vpack.c.bf16 %v3037_v34, %v3036_v33  ;;  %v3090_v33 = vld [vmem:[%s3792_s9 + $0x460] sm:$0xff]  ;;  %v3091_v34 = vld [vmem:[%s3792_s9 + $0x468] sm:$0xff] }
  0x6c   : > { %3494 = vmatmul.mubr.msk.bf16.vlgmr.msra.gmra.mxu0 %vm277_vm1, %v1445_v50  ;;  %3634 = vmatprep.subr.msk.bf16.mxu1 %vm296_vm0, %v3696_v49  ;;  %v2969_v49 = vld [vmem:[%s3792_s9 + $0x340] sm:$0xff]  ;;  %v2970_v50 = vld [vmem:[%s3792_s9 + $0x348] sm:$0xff]  ;;  %v2361_v37 = vpack.c.bf16 %v3091_v34, %v3090_v33 }
  0x6d   : > { %3530 = vmatpush3.bf16.msra.mxu0 %v1821_v55  ;;  %3497 = vmatprep.mubr.msk.bf16.mxu0 %vm277_vm1, %v1446_v53  ;;  %v1752_v53 = vpack.c.bf16 %v2968_v47, %v2967_v46  ;;  %v3042_v55 = vld [vmem:[%s3792_s9 + $0x400] sm:$0xff] }
  0x6e   : > { %3518 = vmatmul.mubr.msk.bf16.vlgmr.msra.gmra.mxu1 %vm277_vm1, %v1414_v54  ;;  %3531 = vmatprep.subr.bf16.mxu0 %v3697_v56  ;;  %v3712_v54 = vld [vmem:[%s4480_s1 + $0x78] sm:$0xff]  }
  0x6f   : > { %3554 = vmatpush3.bf16.msra.mxu1 %v2124_v59  ;;  %3521 = vmatprep.mubr.msk.bf16.mxu1 %vm277_vm1, %v1415_v58  ;;  %v2055_v58 = vpack.c.bf16 %v3041_v52, %v3040_v51  ;;  %v3713_v59 = vld [vmem:[%s4480_s1 + $0x10] sm:$0xff]  }
  0x70   : > { %3555 = vmatprep.subr.bf16.mxu1 %v3698_v57 }
  0x71   : > { %3532 = vmatpush3.bf16.msra.mxu0 %v3697_v56  ;;  %v3043_v56 = vld [vmem:[%s3792_s9 + $0x408] sm:$0xff] }
  0x72   : > { %3533 = vmatprep.subr.bf16.mxu0 %v3699_v0  ;;  %v2056_v60 = vpack.c.bf16 %v3043_v56, %v3042_v55 }
  0x73   : > { %3556 = vmatpush3.bf16.msra.mxu1 %v3698_v57  ;;  %v1753_v57 = vpack.c.bf16 %v2970_v50, %v2969_v49 }
  0x74   : > { %3498 = vmatmul.mubr.msk.bf16.gmra.mxu0 %vm277_vm1, %v1447_v5  ;;  %3557 = vmatprep.subr.bf16.mxu1 %v3700_v1  ;;  %v1754_v5 = vpack.c.bf16 %v2972_v63, %v2971_v62 }
  0x75   : > { %3534 = vmatpush3.bf16.msra.mxu0 %v3699_v0  ;;  %3501 = vmatprep.mubr.msk.bf16.mxu0 %vm277_vm1, %v1448_v7  ;;  %v3715_v0 = vld [vmem:[%s4480_s1 + $0x8] sm:$0xff]   ;;  %v3082_v7 = vld [vmem:[%s3792_s9 + $0x420] sm:$0xff] }
  0x76   : > { %3522 = vmatmul.mubr.msk.bf16.gmra.mxu1 %vm277_vm1, %v1416_v8  ;;  %3535 = vmatprep.subr.bf16.mxu0 %v3701_v9  ;;  %v3083_v8 = vld [vmem:[%s3792_s9 + $0x428] sm:$0xff] }
  0x77   : > { %3558 = vmatpush3.bf16.msra.mxu1 %v3700_v1  ;;  %3525 = vmatprep.mubr.msk.bf16.mxu1 %vm277_vm1, %v1417_v10  ;;  %v3022_v1 = vld [vmem:[%s3792_s9 + $0x360] sm:$0xff]  ;;  %v2057_v10 = vpack.c.bf16 %v3045_v4, %v3044_v3  ;;  %v2357_v12 = vpack.c.bf16 %v3083_v8, %v3082_v7 }
  0x78   : > { %3559 = vmatprep.subr.bf16.mxu1 %v3702_v11 }
  0x79   : > { %3536 = vmatpush3.bf16.msra.mxu0 %v3701_v9  ;;  %v2021_v9 = vpack.c.bf16 %v3023_v2, %v3022_v1 }
  0x7a   : > { %3537 = vmatprep.subr.bf16.mxu0 %v3703_v16 }
  0x7b   : > { %3560 = vmatpush3.bf16.msra.mxu1 %v3702_v11  ;;  %v3717_v11 = vld [vmem:[%s4480_s1] sm:$0xff]  }
  0x7c   : > { %3502 = vmatmul.mubr.msk.bf16.gmra.mxu0 %vm277_vm1, %v1449_v21  ;;  %3561 = vmatprep.subr.bf16.mxu1 %v3704_v18  ;;  %v3086_v21 = vld [vmem:[%s3792_s9 + $0x440] sm:$0xff] }
  0x7d   : > { %3538 = vmatpush3.bf16.msra.mxu0 %v3703_v16  ;;  %3541 = vmatprep.mubr.msk.bf16.mxu0 %vm277_vm1, %v1749_v23  ;;  %v3026_v16 = vld [vmem:[%s3792_s9 + $0x380] sm:$0xff] }
  0x7e   : > { %3526 = vmatmul.mubr.msk.bf16.gmra.mxu1 %vm277_vm1, %v1418_v24  ;;  %3539 = vmatprep.subr.bf16.mxu0 %v3705_v25  ;;  %v2023_v23 = vpack.c.bf16 %v3027_v17, %v3026_v16 }
  0x7f   : > { %3562 = vmatpush3.bf16.msra.mxu1 %v3704_v18  ;;  %3565 = vmatprep.mubr.msk.bf16.mxu1 %vm277_vm1, %v2052_v26  ;;  %v3084_v18 = vld [vmem:[%s3792_s9 + $0x430] sm:$0xff] }
  0x80   : > { %3563 = vmatprep.subr.bf16.mxu1 %v3706_v27  ;;  %v2358_v24 = vpack.c.bf16 %v3085_v19, %v3084_v18  ;;  %v3028_v26 = vld [vmem:[%s3792_s9 + $0x390] sm:$0xff] }
  0x81   : > { %3540 = vmatpush3.bf16.msra.mxu0 %v3705_v25  ;;  %v2359_v25 = vpack.c.bf16 %v3087_v22, %v3086_v21 }
  0x82   : > { %3635 = vmatprep.subr.msk.bf16.mxu0 %vm296_vm0, %v3707_v30  ;;  %v3088_v30 = vld [vmem:[%s3792_s9 + $0x450] sm:$0xff] }
  0x83   : > { %3564 = vmatpush3.bf16.msra.mxu1 %v3706_v27  ;;  %v3029_v27 = vld [vmem:[%s3792_s9 + $0x398] sm:$0xff] }
  0x84   : > { %3542 = vmatmul.mubr.msk.bf16.vlgmr.msra.gmra.mxu0 %vm277_vm1, %v1750_v35  ;;  %3636 = vmatprep.subr.msk.bf16.mxu1 %vm296_vm0, %v3708_v36  ;;  %v2024_v32 = vpack.c.bf16 %v3029_v27, %v3028_v26  ;;  %v2025_v35 = vpack.c.bf16 %v3031_v29, %v3030_v28  ;;  %v2360_v36 = vpack.c.bf16 %v3089_v31, %v3088_v30 }
  0x85   : > { %3578 = vmatpush3.bf16.msra.mxu0 %v2261_v41  ;;  %3545 = vmatprep.mubr.msk.bf16.mxu0 %vm277_vm1, %v1751_v39  ;;  %v3033_v39 = vld [vmem:[%s3792_s9 + $0x3b8] sm:$0x3] }
  0x86   : > { %3566 = vmatmul.mubr.msk.bf16.vlgmr.msra.gmra.mxu1 %vm277_vm1, %v2053_v40  ;;  %3579 = vmatprep.subr.bf16.mxu0 %v3709_v42  ;;  %v3092_v40 = vld [vmem:[%s3792_s9 + $0x470] sm:$0xff]  ;;  %v3093_v41 = vld [vmem:[%s3792_s9 + $0x478] sm:$0x3] }
  0x87   : > { %3602 = vmatpush3.bf16.msra.mxu1 %v2429_v44  ;;  %3569 = vmatprep.mubr.msk.bf16.mxu1 %vm277_vm1, %v2054_v43  ;;  %v2362_v43 = vpack.c.bf16 %v3093_v41, %v3092_v40 }
  0x88   : > { %3603 = vmatprep.subr.bf16.mxu1 %v3710_v45 }
  0x89   : > { %3580 = vmatpush3.bf16.msra.mxu0 %v3709_v42  ;;  %v2026_v42 = vpack.c.bf16 %v3033_v39, %v3032_v38 }
  0x8a   : > { %3581 = vmatprep.subr.bf16.mxu0 %v3711_v48 }
  0x8b   : > { %3604 = vmatpush3.bf16.msra.mxu1 %v3710_v45 }
  0x8c   : > { %3546 = vmatmul.mubr.msk.bf16.gmra.mxu0 %vm277_vm1, %v1752_v53  ;;  %3605 = vmatprep.subr.bf16.mxu1 %v3712_v54 }
  0x8d   : > { %3582 = vmatpush3.bf16.msra.mxu0 %v3711_v48  ;;  %3549 = vmatprep.mubr.msk.bf16.mxu0 %vm277_vm1, %v1753_v57 }
  0x8e   : > { %3570 = vmatmul.mubr.msk.bf16.gmra.mxu1 %vm277_vm1, %v2055_v58  ;;  %3583 = vmatprep.subr.bf16.mxu0 %v3713_v59 }
  0x8f   : > { %3606 = vmatpush3.bf16.msra.mxu1 %v3712_v54  ;;  %3573 = vmatprep.mubr.msk.bf16.mxu1 %vm277_vm1, %v2056_v60 }
  0x90   : > { %3607 = vmatprep.subr.bf16.mxu1 %v3714_v61 }
  0x91   : > { %3584 = vmatpush3.bf16.msra.mxu0 %v3713_v59 }
  0x92   : > { %3585 = vmatprep.subr.bf16.mxu0 %v3715_v0 }
  0x93   : > { %3608 = vmatpush3.bf16.msra.mxu1 %v3714_v61 }
  0x94   : > { %3550 = vmatmul.mubr.msk.bf16.gmra.mxu0 %vm277_vm1, %v1754_v5  ;;  %3609 = vmatprep.subr.bf16.mxu1 %v3716_v6 }
  0x95   : > { %3586 = vmatpush3.bf16.msra.mxu0 %v3715_v0  ;;  %3589 = vmatprep.mubr.msk.bf16.mxu0 %vm277_vm1, %v2021_v9 }
  0x96   : > { %3574 = vmatmul.mubr.msk.bf16.gmra.mxu1 %vm277_vm1, %v2057_v10  ;;  %3587 = vmatprep.subr.bf16.mxu0 %v3717_v11 }
  0x97   : > { %3610 = vmatpush3.bf16.msra.mxu1 %v3716_v6  ;;  %3613 = vmatprep.mubr.msk.bf16.mxu1 %vm277_vm1, %v2357_v12  ;;  %v4234_v6 = vld [vmem:[%s4481_s2] ss:$0 sm:$0xff] }
  0x98   : > { %3611 = vmatprep.subr.bf16.mxu1 %v3718_v13 }
  0x99   : > { %3588 = vmatpush3.bf16.msra.mxu0 %v3717_v11 }
  0x9b   : > { %3612 = vmatpush3.bf16.msra.mxu1 %v3718_v13 }
  0x9c   : > { %3590 = vmatmul.mubr.msk.bf16.vlgmr.msra.gmra.mxu0 %vm277_vm1, %v2022_v20 }
  0x9d   : > { %3593 = vmatprep.mubr.msk.bf16.mxu0 %vm277_vm1, %v2023_v23 }
  0x9e   : > { %3614 = vmatmul.mubr.msk.bf16.vlgmr.msra.gmra.mxu1 %vm277_vm1, %v2358_v24 }
  0x9f   : > { %3617 = vmatprep.mubr.msk.bf16.mxu1 %vm277_vm1, %v2359_v25 }
  0xa4   : > { %3594 = vmatmul.mubr.msk.bf16.gmra.mxu0 %vm277_vm1, %v2024_v32 }
  0xa5   : > { %3597 = vmatprep.mubr.msk.bf16.mxu0 %vm277_vm1, %v2025_v35 }
  0xa6   : > { %3618 = vmatmul.mubr.msk.bf16.gmra.mxu1 %vm277_vm1, %v2360_v36 }
  0xa7   : > { %3621 = vmatprep.mubr.msk.bf16.mxu1 %vm277_vm1, %v2361_v37 }
  0xac   : > { %3598 = vmatmul.mubr.msk.bf16.gmra.mxu0 %vm277_vm1, %v2026_v42 }
  0xae   : > { %3622 = vmatmul.mubr.msk.bf16.gmra.mxu1 %vm277_vm1, %v2362_v43 }
  0xe4   : > { %v3351_v44 = vpop.f32.mrf.mxu0  ;;  %v3375_v45 = vpop.f32.mrf.mxu1 }
  0xe5   : > { %v480_v3 = vadd.f32 %v3375_v45, %v3351_v44 }
  0xe6   : > { %v334_v46 = vpop.f32.mrf.mxu0  ;;  %v471_v47 = vpop.f32.mrf.mxu1 }
  0xe7   : > { %v472_v7 = vadd.f32 %v471_v47, %v334_v46 }
  0xe8   : > { %v3352_v48 = vpop.f32.mrf.mxu0  ;;  %v3376_v49 = vpop.f32.mrf.mxu1 }
  0xe9   : > { %v483_v11 = vadd.f32 %v3376_v49, %v3352_v48 }
  0xea   : > { %v337_v50 = vpop.f32.mrf.mxu0  ;;  %v474_v51 = vpop.f32.mrf.mxu1 }
  0xeb   : > { %v475_v16 = vadd.f32 %v474_v51, %v337_v50 }
  0xec   : > { %v3355_v52 = vpop.f32.mrf.mxu0  ;;  %v3379_v53 = vpop.f32.mrf.mxu1 }
  0xed   : > { %v496_v20 = vadd.f32 %v3379_v53, %v3355_v52 }
  0xee   : > { %v350_v54 = vpop.f32.mrf.mxu0  ;;  %v487_v55 = vpop.f32.mrf.mxu1 }
  0xef   : > { %v488_v27 = vadd.f32 %v487_v55, %v350_v54 }
  0xf0   : > { %v3356_v56 = vpop.f32.mrf.mxu0  ;;  %v3380_v57 = vpop.f32.mrf.mxu1 }
  0xf1   : > { %v499_v34 = vadd.f32 %v3380_v57, %v3356_v56 }
  0xf2   : > { %v353_v58 = vpop.f32.mrf.mxu0  ;;  %v490_v59 = vpop.f32.mrf.mxu1 }
  0xf3   : > { %v491_v41 = vadd.f32 %v490_v59, %v353_v58 }
  0xf4   : > { %v3359_v60 = vpop.f32.mrf.mxu0  ;;  %v3383_v61 = vpop.f32.mrf.mxu1 }
  0xf5   : > { %v512_v48 = vadd.f32 %v3383_v61, %v3359_v60 }
  0xf6   : > { %v4219_v62 = vpop.f32.mrf.mxu0  ;;  %v4221_v63 = vpop.f32.mrf.mxu1 }
  0xf7   : > { %v504_v55 = vadd.f32 %v4221_v63, %v4219_v62 }
  0xf8   : > { %v4223_v0 = vpop.f32.mrf.mxu0  ;;  %v4225_v1 = vpop.f32.mrf.mxu1 }
  0xfa   : > { %v4227_v2 = vpop.f32.mrf.mxu0  ;;  %v4229_v4 = vpop.f32.mrf.mxu1 }
  0xfc   : > { %v3399_v5 = vpop.f32.mrf.mxu0 }
  0xfd   : > { %v689_v8 = vadd.f32 %v3399_v5, %v480_v3  ;;  %v515_v3 = vadd.f32 %v4225_v1, %v4223_v0 }
  0xfe   : > { %v4237_v9 = vpop.f32.mrf.mxu1  ;;  %v640_v10 = vpop.f32.mrf.mxu0 }
  0xff   : > { %v708_v12 = vadd.f32 %v4234_v6, %v689_v8  ;;  %v687_v13 = vadd.f32 %v640_v10, %v472_v7 }
 0x100   : > { %v4240_v14 = vpop.f32.mrf.mxu1  ;;  %v3400_v15 = vpop.f32.mrf.mxu0 }
 0x101   : > { %v720_v17 = vmax.f32 %v708_v12, 0.0  ;;  %v706_v18 = vadd.f32 %v4234_v6, %v687_v13  ;;  %v690_v19 = vadd.f32 %v3400_v15, %v483_v11  ;;  %v507_v11 = vadd.f32 %v4229_v4, %v4227_v2 }
 0x102   : > { %v4248_v21 = vpop.f32.mrf.mxu1  ;;  %v643_v22 = vpop.f32.mrf.mxu0 }
 0x103   : > { %v3147_v23 = vpack.c.bf16 %v720_v17, %v720_v17  ;;  %v718_v24 = vmax.f32 %v706_v18, 0.0  ;;  %v709_v25 = vadd.f32 %v4234_v6, %v690_v19  ;;  %v688_v26 = vadd.f32 %v643_v22, %v475_v16 }
 0x104   : > { %v4251_v28 = vpop.f32.mrf.mxu1  ;;  %v3403_v29 = vpop.f32.mrf.mxu0 }
 0x105   : > { %781 = vst.msk [vmem:[%s4246_s24 + $0x8] sm:$0xf] %vm778_vm2, %v3147_v23  ;;  %v3145_v30 = vpack.c.bf16 %v718_v24, %v718_v24  ;;  %v721_v31 = vmax.f32 %v709_v25, 0.0  ;;  %v707_v32 = vadd.f32 %v4234_v6, %v688_v26  ;;  %v693_v33 = vadd.f32 %v3403_v29, %v496_v20 }
 0x106   : > { %v4256_v35 = vpop.f32.mrf.mxu1  ;;  %v656_v36 = vpop.f32.mrf.mxu0 }
 0x107   : > { %779 = vst.msk [vmem:[%s4246_s24] sm:$0xf] %vm778_vm2, %v3145_v30  ;;  %v3148_v37 = vpack.c.bf16 %v721_v31, %v721_v31  ;;  %v719_v38 = vmax.f32 %v707_v32, 0.0  ;;  %v712_v39 = vadd.f32 %v4234_v6, %v693_v33  ;;  %v691_v40 = vadd.f32 %v656_v36, %v488_v27 }
 0x108   : > { %v4261_v42 = vpop.f32.mrf.mxu1  ;;  %v3404_v43 = vpop.f32.mrf.mxu0 }
 0x109   : > { %782 = vst.msk [vmem:[%s4246_s24 + $0xc] sm:$0xf] %vm778_vm2, %v3148_v37  ;;  %v3146_v44 = vpack.c.bf16 %v719_v38, %v719_v38  ;;  %v724_v45 = vmax.f32 %v712_v39, 0.0  ;;  %v710_v46 = vadd.f32 %v4234_v6, %v691_v40  ;;  %v694_v47 = vadd.f32 %v3404_v43, %v499_v34 }
 0x10a   : > { %v4266_v49 = vpop.f32.mrf.mxu1  ;;  %v659_v50 = vpop.f32.mrf.mxu0 }
 0x10b   : > { %780 = vst.msk [vmem:[%s4246_s24 + $0x4] sm:$0xf] %vm778_vm2, %v3146_v44  ;;  %v3151_v51 = vpack.c.bf16 %v724_v45, %v724_v45  ;;  %v722_v52 = vmax.f32 %v710_v46, 0.0  ;;  %v713_v53 = vadd.f32 %v4234_v6, %v694_v47  ;;  %v692_v54 = vadd.f32 %v659_v50, %v491_v41 }
 0x10c   : > { %v4273_v56 = vpop.f32.mrf.mxu1  ;;  %v3407_v57 = vpop.f32.mrf.mxu0 }
 0x10d   : > { %785 = vst.msk [vmem:[%s4246_s24 + $0x18] sm:$0xf] %vm778_vm2, %v3151_v51  ;;  %v3149_v58 = vpack.c.bf16 %v722_v52, %v722_v52  ;;  %v725_v59 = vmax.f32 %v713_v53, 0.0  ;;  %v711_v60 = vadd.f32 %v4234_v6, %v692_v54  ;;  %v697_v61 = vadd.f32 %v3407_v57, %v512_v48 }
 0x10e   : > { %v4280_v5 = vpop.f32.mrf.mxu1  ;;  %v672_v7 = vpop.f32.mrf.mxu0 }
 0x10f   : > { %783 = vst.msk [vmem:[%s4246_s24 + $0x10] sm:$0xf] %vm778_vm2, %v3149_v58  ;;  %v3152_v62 = vpack.c.bf16 %v725_v59, %v725_v59  ;;  %v723_v63 = vmax.f32 %v711_v60, 0.0  ;;  %v716_v8 = vadd.f32 %v4234_v6, %v697_v61  ;;  %v695_v10 = vadd.f32 %v672_v7, %v504_v55 }
 0x110   : > { %v4287_v12 = vpop.f32.mrf.mxu1  ;;  %v3408_v13 = vpop.f32.mrf.mxu0 }
 0x111   : > { %786 = vst.msk [vmem:[%s4246_s24 + $0x1c] sm:$0xf] %vm778_vm2, %v3152_v62  ;;  %v3150_v0 = vpack.c.bf16 %v723_v63, %v723_v63  ;;  %v728_v1 = vmax.f32 %v716_v8, 0.0  ;;  %v714_v15 = vadd.f32 %v4234_v6, %v695_v10  ;;  %v698_v16 = vadd.f32 %v3408_v13, %v515_v3 }
 0x112   : > { %v4292_v17 = vpop.f32.mrf.mxu1  ;;  %v675_v18 = vpop.f32.mrf.mxu0 }
 0x113   : > { %784 = vst.msk [vmem:[%s4246_s24 + $0x14] sm:$0xf] %vm778_vm2, %v3150_v0  ;;  %v3155_v19 = vpack.c.bf16 %v728_v1, %v728_v1  ;;  %v726_v20 = vmax.f32 %v714_v15, 0.0  ;;  %v717_v2 = vadd.f32 %v4234_v6, %v698_v16  ;;  %v696_v4 = vadd.f32 %v675_v18, %v507_v11 }
 0x114   : > { %v4297_v22 = vpop.f32.mrf.mxu1  ;;  %v3447_v23 = vpop.f32.mrf.mxu0 }
 0x115   : > { %789 = vst.msk [vmem:[%s4246_s24 + $0x28] sm:$0xf] %vm778_vm2, %v3155_v19  ;;  %v3153_v24 = vpack.c.bf16 %v726_v20, %v726_v20  ;;  %v729_v25 = vmax.f32 %v717_v2, 0.0  ;;  %v715_v26 = vadd.f32 %v4234_v6, %v696_v4  ;;  %v1090_v27 = vadd.f32 %v3447_v23, %v4237_v9 }
 0x116   : > { %v3471_v29 = vpop.f32.mrf.mxu1  ;;  %v1081_v30 = vpop.f32.mrf.mxu0 }
 0x117   : > { %787 = vst.msk [vmem:[%s4246_s24 + $0x20] sm:$0xf] %vm778_vm2, %v3153_v24  ;;  %v3156_v31 = vpack.c.bf16 %v729_v25, %v729_v25  ;;  %v727_v32 = vmax.f32 %v715_v26, 0.0  ;;  %v1298_v33 = vadd.f32 %v3471_v29, %v1090_v27  ;;  %v1082_v34 = vadd.f32 %v1081_v30, %v4240_v14 }
 0x118   : > { %v1249_v36 = vpop.f32.mrf.mxu1  ;;  %v3448_v37 = vpop.f32.mrf.mxu0 }
 0x119   : > { %791 = vst.msk [vmem:[%s4246_s24 + $0x2c] sm:$0x1] %vm790_vm3, %v3156_v31  ;;  %v3154_v38 = vpack.c.bf16 %v727_v32, %v727_v32  ;;  %v1317_v39 = vadd.f32 %v4234_v6, %v1298_v33  ;;  %v1296_v40 = vadd.f32 %v1249_v36, %v1082_v34  ;;  %v1093_v9 = vadd.f32 %v3448_v37, %v4248_v21 }
 0x11a   : > { %v3472_v41 = vpop.f32.mrf.mxu1  ;;  %v1084_v43 = vpop.f32.mrf.mxu0 }
 0x11b   : > { %788 = vst.msk [vmem:[%s4246_s24 + $0x24] sm:$0xf] %vm778_vm2, %v3154_v38  ;;  %v1329_v44 = vmax.f32 %v1317_v39, 0.0  ;;  %v1315_v45 = vadd.f32 %v4234_v6, %v1296_v40  ;;  %v1299_v46 = vadd.f32 %v3472_v41, %v1093_v9  ;;  %v1085_v14 = vadd.f32 %v1084_v43, %v4251_v28 }
 0x11c   : > { %v1252_v47 = vpop.f32.mrf.mxu1  ;;  %v3451_v48 = vpop.f32.mrf.mxu0 }
 0x11d   : > { %v3159_v50 = vpack.c.bf16 %v1329_v44, %v1329_v44  ;;  %v1327_v51 = vmax.f32 %v1315_v45, 0.0  ;;  %v1318_v52 = vadd.f32 %v4234_v6, %v1299_v46  ;;  %v1297_v53 = vadd.f32 %v1252_v47, %v1085_v14 }
 0x11e   : > { %v1106_v21 = vadd.f32 %v3451_v48, %v4256_v35  ;;  %v3475_v54 = vpop.f32.mrf.mxu1  ;;  %v1097_v55 = vpop.f32.mrf.mxu0 }
 0x11f   : > { %2891 = vst.msk [vmem:[%s4246_s24 + $0x38] sm:$0xf] %vm778_vm2, %v3159_v50  ;;  %v3157_v57 = vpack.c.bf16 %v1327_v51, %v1327_v51  ;;  %v1330_v58 = vmax.f32 %v1318_v52, 0.0  ;;  %v1316_v59 = vadd.f32 %v4234_v6, %v1297_v53  ;;  %v1098_v28 = vadd.f32 %v1097_v55, %v4261_v42 }
 0x120   : > { %v1302_v60 = vadd.f32 %v3475_v54, %v1106_v21  ;;  %v1265_v61 = vpop.f32.mrf.mxu1  ;;  %v3452_v3 = vpop.f32.mrf.mxu0 }
 0x121   : > { %2889 = vst.msk [vmem:[%s4246_s24 + $0x30] sm:$0xf] %vm778_vm2, %v3157_v57  ;;  %v3160_v7 = vpack.c.bf16 %v1330_v58, %v1330_v58  ;;  %v1328_v62 = vmax.f32 %v1316_v59, 0.0  ;;  %v1300_v35 = vadd.f32 %v1265_v61, %v1098_v28  ;;  %v1109_v63 = vadd.f32 %v3452_v3, %v4266_v49 }
 0x122   : > { %v1321_v8 = vadd.f32 %v4234_v6, %v1302_v60  ;;  %v3476_v10 = vpop.f32.mrf.mxu1  ;;  %v1100_v11 = vpop.f32.mrf.mxu0 }
 0x123   : > { %2892 = vst.msk [vmem:[%s4246_s24 + $0x3c] sm:$0xf] %vm778_vm2, %v3160_v7  ;;  %v3158_v13 = vpack.c.bf16 %v1328_v62, %v1328_v62  ;;  %v1319_v42 = vadd.f32 %v4234_v6, %v1300_v35  ;;  %v1303_v0 = vadd.f32 %v3476_v10, %v1109_v63  ;;  %v1101_v1 = vadd.f32 %v1100_v11, %v4273_v56 }
 0x124   : > { %v1333_v15 = vmax.f32 %v1321_v8, 0.0  ;;  %v1268_v16 = vpop.f32.mrf.mxu1  ;;  %v3455_v18 = vpop.f32.mrf.mxu0 }
 0x125   : > { %2890 = vst.msk [vmem:[%s4246_s24 + $0x34] sm:$0xf] %vm778_vm2, %v3158_v13  ;;  %v1331_v49 = vmax.f32 %v1319_v42, 0.0  ;;  %v1322_v19 = vadd.f32 %v4234_v6, %v1303_v0  ;;  %v1301_v20 = vadd.f32 %v1268_v16, %v1101_v1  ;;  %v1122_v2 = vadd.f32 %v3455_v18, %v4280_v5 }
 0x126   : > { %v3163_v4 = vpack.c.bf16 %v1333_v15, %v1333_v15  ;;  %v3479_v23 = vpop.f32.mrf.mxu1  ;;  %v1113_v24 = vpop.f32.mrf.mxu0 }
 0x127   : > { %v3161_v25 = vpack.c.bf16 %v1331_v49, %v1331_v49  ;;  %v1334_v26 = vmax.f32 %v1322_v19, 0.0  ;;  %v1320_v56 = vadd.f32 %v4234_v6, %v1301_v20  ;;  %v1306_v27 = vadd.f32 %v3479_v23, %v1122_v2 }
 0x128   : > { %2895 = vst.msk [vmem:[%s4246_s24 + $0x48] sm:$0xf] %vm778_vm2, %v3163_v4  ;;  %v1114_v29 = vadd.f32 %v1113_v24, %v4287_v12  ;;  %v1281_v30 = vpop.f32.mrf.mxu1  ;;  %v3456_v31 = vpop.f32.mrf.mxu0 }
 0x129   : > { %2893 = vst.msk [vmem:[%s4246_s24 + $0x40] sm:$0xf] %vm778_vm2, %v3161_v25  ;;  %v3164_v32 = vpack.c.bf16 %v1334_v26, %v1334_v26  ;;  %v1332_v5 = vmax.f32 %v1320_v56, 0.0  ;;  %v1325_v33 = vadd.f32 %v4234_v6, %v1306_v27  ;;  %v1125_v34 = vadd.f32 %v3456_v31, %v4292_v17 }
 0x12a   : > { %v1304_v36 = vadd.f32 %v1281_v30, %v1114_v29  ;;  %v3480_v37 = vpop.f32.mrf.mxu1  ;;  %v1116_v38 = vpop.f32.mrf.mxu0 }
 0x12b   : > { %2896 = vst.msk [vmem:[%s4246_s24 + $0x4c] sm:$0xf] %vm778_vm2, %v3164_v32  ;;  %v3162_v39 = vpack.c.bf16 %v1332_v5, %v1332_v5  ;;  %v1337_v40 = vmax.f32 %v1325_v33, 0.0  ;;  %v1307_v12 = vadd.f32 %v3480_v37, %v1125_v34  ;;  %v1117_v9 = vadd.f32 %v1116_v38, %v4297_v22 }
 0x12c   : > { %v1323_v41 = vadd.f32 %v4234_v6, %v1304_v36  ;;  %v1284_v43 = vpop.f32.mrf.mxu1  ;;  %v3495_v44 = vpop.f32.mrf.mxu0 }
 0x12d   : > { %2894 = vst.msk [vmem:[%s4246_s24 + $0x44] sm:$0xf] %vm778_vm2, %v3162_v39  ;;  %v3167_v45 = vpack.c.bf16 %v1337_v40, %v1337_v40  ;;  %v1326_v17 = vadd.f32 %v4234_v6, %v1307_v12  ;;  %v1305_v46 = vadd.f32 %v1284_v43, %v1117_v9 }
 0x12e   : > { %v1335_v14 = vmax.f32 %v1323_v41, 0.0  ;;  %v3519_v47 = vpop.f32.mrf.mxu1  ;;  %v1552_v48 = vpop.f32.mrf.mxu0 }
 0x12f   : > { %2899 = vst.msk [vmem:[%s4246_s24 + $0x58] sm:$0xf] %vm778_vm2, %v3167_v45  ;;  %v1338_v50 = vmax.f32 %v1326_v17, 0.0  ;;  %v1324_v22 = vadd.f32 %v4234_v6, %v1305_v46  ;;  %v1698_v15 = vadd.f32 %v3519_v47, %v3495_v44 }
 0x130   : > { %v3165_v51 = vpack.c.bf16 %v1335_v14, %v1335_v14  ;;  %v1689_v52 = vpop.f32.mrf.mxu1  ;;  %v3496_v53 = vpop.f32.mrf.mxu0 }
 0x131   : > { %v3168_v21 = vpack.c.bf16 %v1338_v50, %v1338_v50  ;;  %v1336_v54 = vmax.f32 %v1324_v22, 0.0  ;;  %v1690_v49 = vadd.f32 %v1689_v52, %v1552_v48 }
 0x132   : > { %2897 = vst.msk [vmem:[%s4246_s24 + $0x50] sm:$0xf] %vm778_vm2, %v3165_v51  ;;  %v3520_v55 = vpop.f32.mrf.mxu1  ;;  %v1555_v57 = vpop.f32.mrf.mxu0 }
 0x133   : > { %2900 = vst.msk [vmem:[%s4246_s24 + $0x5c] sm:$0x1] %vm790_vm3, %v3168_v21  ;;  %v3166_v58 = vpack.c.bf16 %v1336_v54, %v1336_v54  ;;  %v1701_v4 = vadd.f32 %v3520_v55, %v3496_v53 }
 0x134   : > { %v1692_v59 = vpop.f32.mrf.mxu1  ;;  %v3499_v28 = vpop.f32.mrf.mxu0 }
 0x135   : > { %2898 = vst.msk [vmem:[%s4246_s24 + $0x54] sm:$0xf] %vm778_vm2, %v3166_v58  ;;  %v1693_v56 = vadd.f32 %v1692_v59, %v1555_v57 }
 0x136   : > { %v3523_v60 = vpop.f32.mrf.mxu1  ;;  %v1568_v61 = vpop.f32.mrf.mxu0 }
 0x137   : > { %v1714_v31 = vadd.f32 %v3523_v60, %v3499_v28 }
 0x138   : > { %v1705_v3 = vpop.f32.mrf.mxu1  ;;  %v3500_v7 = vpop.f32.mrf.mxu0 }
 0x139   : > { %v1706_v38 = vadd.f32 %v1705_v3, %v1568_v61 }
 0x13a   : > { %v3524_v62 = vpop.f32.mrf.mxu1  ;;  %v1571_v35 = vpop.f32.mrf.mxu0 }
 0x13b   : > { %v1717_v44 = vadd.f32 %v3524_v62, %v3500_v7 }
 0x13c   : > { %v1708_v63 = vpop.f32.mrf.mxu1  ;;  %v3503_v8 = vpop.f32.mrf.mxu0 }
 0x13d   : > { %v1709_v50 = vadd.f32 %v1708_v63, %v1571_v35 }
 0x13e   : > { %v3527_v10 = vpop.f32.mrf.mxu1  ;;  %v1584_v11 = vpop.f32.mrf.mxu0 }
 0x13f   : > { %v1730_v55 = vadd.f32 %v3527_v10, %v3503_v8 }
 0x140   : > { %v1721_v13 = vpop.f32.mrf.mxu1  ;;  %v4356_v42 = vpop.f32.mrf.mxu0 }
 0x141   : > { %v1722_v3 = vadd.f32 %v1721_v13, %v1584_v11 }
 0x142   : > { %v4358_v0 = vpop.f32.mrf.mxu1  ;;  %v4360_v1 = vpop.f32.mrf.mxu0 }
 0x144   : > { %v4362_v16 = vpop.f32.mrf.mxu1  ;;  %v3543_v18 = vpop.f32.mrf.mxu0 }
 0x145   : > { %v1906_v19 = vadd.f32 %v3543_v18, %v1698_v15  ;;  %v1733_v15 = vadd.f32 %v4358_v0, %v4356_v42 }
 0x146   : > { %v4364_v20 = vpop.f32.mrf.mxu1  ;;  %v1857_v2 = vpop.f32.mrf.mxu0 }
 0x147   : > { %v1925_v23 = vadd.f32 %v4234_v6, %v1906_v19  ;;  %v1904_v24 = vadd.f32 %v1857_v2, %v1690_v49 }
 0x148   : > { %v4367_v25 = vpop.f32.mrf.mxu1  ;;  %v3544_v26 = vpop.f32.mrf.mxu0 }
 0x149   : > { %v1937_v27 = vmax.f32 %v1925_v23, 0.0  ;;  %v1923_v29 = vadd.f32 %v4234_v6, %v1904_v24  ;;  %v1907_v30 = vadd.f32 %v3544_v26, %v1701_v4  ;;  %v1725_v4 = vadd.f32 %v4362_v16, %v4360_v1 }
 0x14a   : > { %v4370_v32 = vpop.f32.mrf.mxu1  ;;  %v1860_v5 = vpop.f32.mrf.mxu0 }
 0x14b   : > { %v3171_v33 = vpack.c.bf16 %v1937_v27, %v1937_v27  ;;  %v1935_v34 = vmax.f32 %v1923_v29, 0.0  ;;  %v1926_v36 = vadd.f32 %v4234_v6, %v1907_v30  ;;  %v1905_v37 = vadd.f32 %v1860_v5, %v1693_v56 }
 0x14c   : > { %v4373_v39 = vpop.f32.mrf.mxu1  ;;  %v3547_v40 = vpop.f32.mrf.mxu0 }
 0x14d   : > { %3012 = vst.msk [vmem:[%s4246_s24 + $0x68] sm:$0xf] %vm778_vm2, %v3171_v33  ;;  %v3169_v12 = vpack.c.bf16 %v1935_v34, %v1935_v34  ;;  %v1938_v9 = vmax.f32 %v1926_v36, 0.0  ;;  %v1924_v41 = vadd.f32 %v4234_v6, %v1905_v37  ;;  %v1910_v43 = vadd.f32 %v3547_v40, %v1714_v31 }
 0x14e   : > { %v4378_v45 = vpop.f32.mrf.mxu1  ;;  %v1873_v17 = vpop.f32.mrf.mxu0 }
 0x14f   : > { %3010 = vst.msk [vmem:[%s4246_s24 + $0x60] sm:$0xf] %vm778_vm2, %v3169_v12  ;;  %v3172_v46 = vpack.c.bf16 %v1938_v9, %v1938_v9  ;;  %v1936_v14 = vmax.f32 %v1924_v41, 0.0  ;;  %v1929_v47 = vadd.f32 %v4234_v6, %v1910_v43  ;;  %v1908_v48 = vadd.f32 %v1873_v17, %v1706_v38 }
 0x150   : > { %v4383_v22 = vpop.f32.mrf.mxu1  ;;  %v3548_v51 = vpop.f32.mrf.mxu0 }
 0x151   : > { %3013 = vst.msk [vmem:[%s4246_s24 + $0x6c] sm:$0xf] %vm778_vm2, %v3172_v46  ;;  %v3170_v52 = vpack.c.bf16 %v1936_v14, %v1936_v14  ;;  %v1941_v53 = vmax.f32 %v1929_v47, 0.0  ;;  %v1927_v21 = vadd.f32 %v4234_v6, %v1908_v48  ;;  %v1911_v54 = vadd.f32 %v3548_v51, %v1717_v44 }
 0x152   : > { %v4388_v57 = vpop.f32.mrf.mxu1  ;;  %v1876_v58 = vpop.f32.mrf.mxu0 }
 0x153   : > { %3011 = vst.msk [vmem:[%s4246_s24 + $0x64] sm:$0xf] %vm778_vm2, %v3170_v52  ;;  %v3175_v59 = vpack.c.bf16 %v1941_v53, %v1941_v53  ;;  %v1939_v28 = vmax.f32 %v1927_v21, 0.0  ;;  %v1930_v60 = vadd.f32 %v4234_v6, %v1911_v54  ;;  %v1909_v61 = vadd.f32 %v1876_v58, %v1709_v50 }
 0x154   : > { %v4393_v7 = vpop.f32.mrf.mxu1  ;;  %v3551_v62 = vpop.f32.mrf.mxu0 }
 0x155   : > { %3016 = vst.msk [vmem:[%s4246_s24 + $0x78] sm:$0xf] %vm778_vm2, %v3175_v59  ;;  %v3173_v35 = vpack.c.bf16 %v1939_v28, %v1939_v28  ;;  %v1942_v63 = vmax.f32 %v1930_v60, 0.0  ;;  %v1928_v8 = vadd.f32 %v4234_v6, %v1909_v61  ;;  %v1914_v10 = vadd.f32 %v3551_v62, %v1730_v55 }
 0x156   : > { %v4400_v18 = vpop.f32.mrf.mxu1  ;;  %v1889_v49 = vpop.f32.mrf.mxu0 }
 0x157   : > { %3014 = vst.msk [vmem:[%s4246_s24 + $0x70] sm:$0xf] %vm778_vm2, %v3173_v35  ;;  %v3176_v11 = vpack.c.bf16 %v1942_v63, %v1942_v63  ;;  %v1940_v13 = vmax.f32 %v1928_v8, 0.0  ;;  %v1933_v19 = vadd.f32 %v4234_v6, %v1914_v10  ;;  %v1912_v2 = vadd.f32 %v1889_v49, %v1722_v3 }
 0x158   : > { %v4407_v23 = vpop.f32.mrf.mxu1  ;;  %v3552_v24 = vpop.f32.mrf.mxu0 }
 0x159   : > { %3017 = vst.msk [vmem:[%s4246_s24 + $0x7c] sm:$0xf] %vm778_vm2, %v3176_v11  ;;  %v3174_v42 = vpack.c.bf16 %v1940_v13, %v1940_v13  ;;  %v1945_v0 = vmax.f32 %v1933_v19, 0.0  ;;  %v1931_v26 = vadd.f32 %v4234_v6, %v1912_v2  ;;  %v1915_v56 = vadd.f32 %v3552_v24, %v1733_v15 }
 0x15a   : > { %v4412_v27 = vpop.f32.mrf.mxu1  ;;  %v1892_v29 = vpop.f32.mrf.mxu0 }
 0x15b   : > { %3015 = vst.msk [vmem:[%s4246_s24 + $0x74] sm:$0xf] %vm778_vm2, %v3174_v42  ;;  %v3179_v30 = vpack.c.bf16 %v1945_v0, %v1945_v0  ;;  %v1943_v31 = vmax.f32 %v1931_v26, 0.0  ;;  %v1934_v1 = vadd.f32 %v4234_v6, %v1915_v56  ;;  %v1913_v16 = vadd.f32 %v1892_v29, %v1725_v4 }
 0x15c   : > { %v4417_v5 = vpop.f32.mrf.mxu1  ;;  %v3591_v33 = vpop.f32.mrf.mxu0 }
 0x15d   : > { %3020 = vst.msk [vmem:[%s4246_s24 + $0x88] sm:$0xf] %vm778_vm2, %v3179_v30  ;;  %v3177_v34 = vpack.c.bf16 %v1943_v31, %v1943_v31  ;;  %v1946_v36 = vmax.f32 %v1934_v1, 0.0  ;;  %v1932_v37 = vadd.f32 %v4234_v6, %v1913_v16  ;;  %v2306_v38 = vadd.f32 %v3591_v33, %v4364_v20 }
 0x15e   : > { %v3615_v40 = vpop.f32.mrf.mxu1  ;;  %v2297_v12 = vpop.f32.mrf.mxu0 }
 0x15f   : > { %3018 = vst.msk [vmem:[%s4246_s24 + $0x80] sm:$0xf] %vm778_vm2, %v3177_v34  ;;  %v3180_v9 = vpack.c.bf16 %v1946_v36, %v1946_v36  ;;  %v1944_v41 = vmax.f32 %v1932_v37, 0.0  ;;  %v2514_v43 = vadd.f32 %v3615_v40, %v2306_v38  ;;  %v2298_v44 = vadd.f32 %v2297_v12, %v4367_v25 }
 0x160   : > { %v2465_v17 = vpop.f32.mrf.mxu1  ;;  %v3592_v46 = vpop.f32.mrf.mxu0 }
 0x161   : > { %3021 = vst.msk [vmem:[%s4246_s24 + $0x8c] sm:$0x1] %vm790_vm3, %v3180_v9  ;;  %v3178_v14 = vpack.c.bf16 %v1944_v41, %v1944_v41  ;;  %v2533_v47 = vadd.f32 %v4234_v6, %v2514_v43  ;;  %v2512_v48 = vadd.f32 %v2465_v17, %v2298_v44  ;;  %v2309_v20 = vadd.f32 %v3592_v46, %v4370_v32 }
 0x162   : > { %v3616_v50 = vpop.f32.mrf.mxu1  ;;  %v2300_v51 = vpop.f32.mrf.mxu0 }
 0x163   : > { %3019 = vst.msk [vmem:[%s4246_s24 + $0x84] sm:$0xf] %vm778_vm2, %v3178_v14  ;;  %v2545_v52 = vmax.f32 %v2533_v47, 0.0  ;;  %v2531_v53 = vadd.f32 %v4234_v6, %v2512_v48  ;;  %v2515_v21 = vadd.f32 %v3616_v50, %v2309_v20  ;;  %v2301_v25 = vadd.f32 %v2300_v51, %v4373_v39 }
 0x164   : > { %v2468_v54 = vpop.f32.mrf.mxu1  ;;  %v3595_v55 = vpop.f32.mrf.mxu0 }
 0x165   : > { %v3183_v58 = vpack.c.bf16 %v2545_v52, %v2545_v52  ;;  %v2543_v59 = vmax.f32 %v2531_v53, 0.0  ;;  %v2534_v28 = vadd.f32 %v4234_v6, %v2515_v21  ;;  %v2513_v60 = vadd.f32 %v2468_v54, %v2301_v25 }
 0x166   : > { %v2322_v32 = vadd.f32 %v3595_v55, %v4378_v45  ;;  %v3619_v61 = vpop.f32.mrf.mxu1  ;;  %v2313_v3 = vpop.f32.mrf.mxu0 }
 0x167   : > { %3133 = vst.msk [vmem:[%s4246_s24 + $0x98] sm:$0xf] %vm778_vm2, %v3183_v58  ;;  %v3181_v62 = vpack.c.bf16 %v2543_v59, %v2543_v59  ;;  %v2546_v35 = vmax.f32 %v2534_v28, 0.0  ;;  %v2532_v63 = vadd.f32 %v4234_v6, %v2513_v60  ;;  %v2314_v39 = vadd.f32 %v2313_v3, %v4383_v22 }
 0x168   : > { %v2518_v8 = vadd.f32 %v3619_v61, %v2322_v32  ;;  %v2481_v10 = vpop.f32.mrf.mxu1  ;;  %v3596_v15 = vpop.f32.mrf.mxu0 }
 0x169   : > { %3131 = vst.msk [vmem:[%s4246_s24 + $0x90] sm:$0xf] %vm778_vm2, %v3181_v62  ;;  %v3184_v49 = vpack.c.bf16 %v2546_v35, %v2546_v35  ;;  %v2544_v11 = vmax.f32 %v2532_v63, 0.0  ;;  %v2516_v45 = vadd.f32 %v2481_v10, %v2314_v39  ;;  %v2325_v13 = vadd.f32 %v3596_v15, %v4388_v57 }
 0x16a   : > { %v2537_v19 = vadd.f32 %v4234_v6, %v2518_v8  ;;  %v3620_v2 = vpop.f32.mrf.mxu1  ;;  %v2316_v4 = vpop.f32.mrf.mxu0 }
 0x16b   : > { %3134 = vst.msk [vmem:[%s4246_s24 + $0x9c] sm:$0xf] %vm778_vm2, %v3184_v49  ;;  %v3182_v24 = vpack.c.bf16 %v2544_v11, %v2544_v11  ;;  %v2535_v22 = vadd.f32 %v4234_v6, %v2516_v45  ;;  %v2519_v42 = vadd.f32 %v3620_v2, %v2325_v13  ;;  %v2317_v0 = vadd.f32 %v2316_v4, %v4393_v7 }
 0x16c   : > { %v2549_v26 = vmax.f32 %v2537_v19, 0.0  ;;  %v2484_v56 = vpop.f32.mrf.mxu1  ;;  %v3599_v29 = vpop.f32.mrf.mxu0 }
 0x16d   : > { %3132 = vst.msk [vmem:[%s4246_s24 + $0x94] sm:$0xf] %vm778_vm2, %v3182_v24  ;;  %v2547_v57 = vmax.f32 %v2535_v22, 0.0  ;;  %v2538_v30 = vadd.f32 %v4234_v6, %v2519_v42  ;;  %v2517_v31 = vadd.f32 %v2484_v56, %v2317_v0  ;;  %v2338_v1 = vadd.f32 %v3599_v29, %v4400_v18 }
 0x16e   : > { %v3187_v16 = vpack.c.bf16 %v2549_v26, %v2549_v26  ;;  %v3623_v33 = vpop.f32.mrf.mxu1  ;;  %v2329_v34 = vpop.f32.mrf.mxu0 }
 0x16f   : > { %v3185_v36 = vpack.c.bf16 %v2547_v57, %v2547_v57  ;;  %v2550_v37 = vmax.f32 %v2538_v30, 0.0  ;;  %v2536_v7 = vadd.f32 %v4234_v6, %v2517_v31  ;;  %v2522_v38 = vadd.f32 %v3623_v33, %v2338_v1 }
 0x170   : > { %3137 = vst.msk [vmem:[%s4246_s24 + $0xa8] sm:$0xf] %vm778_vm2, %v3187_v16  ;;  %v2330_v40 = vadd.f32 %v2329_v34, %v4407_v23  ;;  %v2497_v12 = vpop.f32.mrf.mxu1  ;;  %v3600_v9 = vpop.f32.mrf.mxu0 }
 0x171   : > { %3135 = vst.msk [vmem:[%s4246_s24 + $0xa0] sm:$0xf] %vm778_vm2, %v3185_v36  ;;  %v3188_v41 = vpack.c.bf16 %v2550_v37, %v2550_v37  ;;  %v2548_v18 = vmax.f32 %v2536_v7, 0.0  ;;  %v2541_v43 = vadd.f32 %v4234_v6, %v2522_v38  ;;  %v2341_v44 = vadd.f32 %v3600_v9, %v4412_v27 }
 0x172   : > { %v2520_v17 = vadd.f32 %v2497_v12, %v2330_v40  ;;  %v3624_v46 = vpop.f32.mrf.mxu1  ;;  %v2332_v14 = vpop.f32.mrf.mxu0 }
 0x173   : > { %3138 = vst.msk [vmem:[%s4246_s24 + $0xac] sm:$0xf] %vm778_vm2, %v3188_v41  ;;  %v3186_v47 = vpack.c.bf16 %v2548_v18, %v2548_v18  ;;  %v2553_v48 = vmax.f32 %v2541_v43, 0.0  ;;  %v2523_v23 = vadd.f32 %v3624_v46, %v2341_v44  ;;  %v2333_v20 = vadd.f32 %v2332_v14, %v4417_v5 }
 0x174   : > { %v2539_v50 = vadd.f32 %v4234_v6, %v2520_v17  ;;  %v2500_v51 = vpop.f32.mrf.mxu1 }
 0x175   : > { %3136 = vst.msk [vmem:[%s4246_s24 + $0xa4] sm:$0xf] %vm778_vm2, %v3186_v47  ;;  %v3191_v27 = vpack.c.bf16 %v2553_v48, %v2553_v48  ;;  %v2542_v52 = vadd.f32 %v4234_v6, %v2523_v23  ;;  %v2521_v53 = vadd.f32 %v2500_v51, %v2333_v20 }
 0x176   : > { %v2551_v21 = vmax.f32 %v2539_v50, 0.0 }
 0x177   : > { %3141 = vst.msk [vmem:[%s4246_s24 + $0xb8] sm:$0xf] %vm778_vm2, %v3191_v27  ;;  %v2554_v25 = vmax.f32 %v2542_v52, 0.0  ;;  %v2540_v54 = vadd.f32 %v4234_v6, %v2521_v53 }
 0x178   : > { %v3189_v55 = vpack.c.bf16 %v2551_v21, %v2551_v21 }
 0x179   : > { %v3192_v58 = vpack.c.bf16 %v2554_v25, %v2554_v25  ;;  %v2552_v59 = vmax.f32 %v2540_v54, 0.0 }
 0x17a   : > { %3139 = vst.msk [vmem:[%s4246_s24 + $0xb0] sm:$0xf] %vm778_vm2, %v3189_v55 }
 0x17b   : > { %3142 = vst.msk [vmem:[%s4246_s24 + $0xbc] sm:$0x1] %vm790_vm3, %v3192_v58  ;;  %v3190_v5 = vpack.c.bf16 %v2552_v59, %v2552_v59 }
 0x17d   : > { %3140 = vst.msk [vmem:[%s4246_s24 + $0xb4] sm:$0xf] %vm778_vm2, %v3190_v5 }
 0x17e PF: > { %s13_s12 = sadd.s32 1, %s3725_s12  }
 0x17f   : > { %p10_p4 = scmp.ge.s32.totalorder %s13_s12, 4  }
 0x181   :  { %12 = sbr.rel (!%p10_p4) target bundleno = 1 (0x1), region = 78 }

// kernel: feature_extractor_forward.3
= control target key start
LH: loop header
LB: loop body
LE: loop exit
PB: predicated region body
PF: predicated region fallthrough
CT: control target
= control target key end

     0   :  { %vm5370_vm0 = vmmov 0   ;;  %s6559_s0 = inlined_call_operand.vmem [shape: bf16[8,5760], index: 0, kind: input, shape index: {}]   ;;  %s6560_s1 = inlined_call_operand.vmem [shape: bf16[5760,128], index: 1, kind: input, shape index: {}]   ;;  %s6561_s2 = inlined_call_operand.vmem [shape: f32[1,128], index: 2, kind: input, shape index: {}]   ;;  %s6562_s3 = inlined_call_operand.hbm [shape: f32[8,128], index: 3, kind: output, shape index: {}]  }
   0x1   :  { %v4942_v0 = vld [vmem:[%s6560_s1 + $0x78] sm:$0xff]   ;;  %v4946_v4 = vld [vmem:[%s6560_s1 + $0x70] sm:$0xff]   ;;  %v4950_v8 = vld [vmem:[%s6560_s1 + $0x68] sm:$0xff]  }
   0x2   :  { %v4943_v1 = vld [vmem:[%s6560_s1 + $0x38] sm:$0xff]   ;;  %4426 = vmatprep.subr.bf16.mxu0 %v4942_v0  ;;  %v4947_v5 = vld [vmem:[%s6560_s1 + $0x30] sm:$0xff]   ;;  %v4951_v9 = vld [vmem:[%s6560_s1 + $0x28] sm:$0xff]  }
   0x3   :  { %v4944_v2 = vld [vmem:[%s6560_s1 + $0xf8] sm:$0xff]   ;;  %4427 = vmatpush3.bf16.msra.mxu0 %v4943_v1  ;;  %v4948_v6 = vld [vmem:[%s6560_s1 + $0xf0] sm:$0xff]   ;;  %v4952_v10 = vld [vmem:[%s6560_s1 + $0xe8] sm:$0xff]  }
   0x4   :  { %v4945_v3 = vld [vmem:[%s6560_s1 + $0xb8] sm:$0xff]   ;;  %4448 = vmatprep.subr.bf16.mxu1 %v4944_v2  ;;  %4428 = vmatprep.subr.bf16.mxu0 %v4946_v4  ;;  %v4949_v7 = vld [vmem:[%s6560_s1 + $0xb0] sm:$0xff]   ;;  %v4953_v11 = vld [vmem:[%s6560_s1 + $0xa8] sm:$0xff]  }
   0x5   :  { %4449 = vmatpush3.bf16.msra.mxu1 %v4945_v3  ;;  %v4954_v12 = vld [vmem:[%s6560_s1 + $0x60] sm:$0xff]   ;;  %v4958_v16 = vld [vmem:[%s6560_s1 + $0x58] sm:$0xff]   ;;  %v4962_v20 = vld [vmem:[%s6560_s1 + $0x50] sm:$0xff]  }
   0x6   :  { %4450 = vmatprep.subr.bf16.mxu1 %v4948_v6  ;;  %v4955_v13 = vld [vmem:[%s6560_s1 + $0x20] sm:$0xff]   ;;  %v4959_v17 = vld [vmem:[%s6560_s1 + $0x18] sm:$0xff]   ;;  %v4963_v21 = vld [vmem:[%s6560_s1 + $0x10] sm:$0xff]  }
   0x7   :  { %4429 = vmatpush3.bf16.msra.mxu0 %v4947_v5  ;;  %v4956_v14 = vld [vmem:[%s6560_s1 + $0xe0] sm:$0xff]   ;;  %v4960_v18 = vld [vmem:[%s6560_s1 + $0xd8] sm:$0xff]   ;;  %v4964_v22 = vld [vmem:[%s6560_s1 + $0xd0] sm:$0xff]  }
   0x8   :  { %4430 = vmatprep.subr.bf16.mxu0 %v4950_v8  ;;  %v4957_v15 = vld [vmem:[%s6560_s1 + $0xa0] sm:$0xff]   ;;  %v4961_v19 = vld [vmem:[%s6560_s1 + $0x98] sm:$0xff]   ;;  %v4965_v23 = vld [vmem:[%s6560_s1 + $0x90] sm:$0xff]  }
   0x9   :  { %4451 = vmatpush3.bf16.msra.mxu1 %v4949_v7  ;;  %v4966_v24 = vld [vmem:[%s6560_s1 + $0x48] sm:$0xff]   ;;  %v4970_v28 = vld [vmem:[%s6560_s1 + $0x40] sm:$0xff]   ;;  %v4976_v35 = vld [vmem:[%s6560_s1 + $0x178] sm:$0xff]  }
   0xa   :  { %4452 = vmatprep.subr.bf16.mxu1 %v4952_v10  ;;  %v4967_v25 = vld [vmem:[%s6560_s1 + $0x8] sm:$0xff]   ;;  %v4971_v29 = vld [vmem:[%s6560_s1] sm:$0xff]   ;;  %v4979_v39 = vld [vmem:[%s6560_s1 + $0x138] sm:$0xff]  }
   0xb   :  { %4431 = vmatpush3.bf16.msra.mxu0 %v4951_v9  ;;  %v4968_v26 = vld [vmem:[%s6560_s1 + $0xc8] sm:$0xff]   ;;  %v4972_v30 = vld [vmem:[%s6560_s1 + $0xc0] sm:$0xff]   ;;  %v4980_v40 = vld [vmem:[%s6560_s1 + $0x1f8] sm:$0xff]  }
   0xc   :  { %4432 = vmatprep.subr.bf16.mxu0 %v4954_v12  ;;  %v4969_v27 = vld [vmem:[%s6560_s1 + $0x88] sm:$0xff]   ;;  %v16_v31 = vld [vmem:[%s6559_s0] sm:$0xff]  ;;  %v4981_v41 = vld [vmem:[%s6560_s1 + $0x1b8] sm:$0xff]  }
   0xd   :  { %4453 = vmatpush3.bf16.msra.mxu1 %v4953_v11  ;;  %v4021_v32 = vcombine.low %v16_v31, %v16_v31  ;;  %v4022_v33 = vcombine.high %v16_v31, %v16_v31  ;;  %v4975_v34 = vld [vmem:[%s6560_s1 + $0x80] sm:$0xff]   ;;  %v17_v36 = vld [vmem:[%s6559_s0 + $0x8] sm:$0xff]  ;;  %v4982_v42 = vld [vmem:[%s6560_s1 + $0x170] sm:$0xff]  }
   0xe   :  { %4454 = vmatprep.subr.bf16.mxu1 %v4956_v14  ;;  %v4023_v37 = vcombine.low %v17_v36, %v17_v36  ;;  %v4024_v38 = vcombine.high %v17_v36, %v17_v36  ;;  %v4983_v43 = vld [vmem:[%s6560_s1 + $0x130] sm:$0xff]   ;;  %v4986_v46 = vld [vmem:[%s6560_s1 + $0x168] sm:$0xff]   ;;  %v4990_v50 = vld [vmem:[%s6560_s1 + $0x160] sm:$0xff]  }
   0xf   :  { %4433 = vmatpush3.bf16.msra.mxu0 %v4955_v13  ;;  %3116 = vmatprep.mubr.bf16.mxu0 %v4022_v33  ;;  %v4984_v44 = vld [vmem:[%s6560_s1 + $0x1f0] sm:$0xff]   ;;  %v4987_v47 = vld [vmem:[%s6560_s1 + $0x128] sm:$0xff]   ;;  %v4991_v51 = vld [vmem:[%s6560_s1 + $0x120] sm:$0xff]  }
  0x10   :  { %4434 = vmatprep.subr.bf16.mxu0 %v4958_v16  ;;  %3156 = vmatprep.mubr.bf16.mxu1 %v4024_v38  ;;  %v4985_v45 = vld [vmem:[%s6560_s1 + $0x1b0] sm:$0xff]   ;;  %v4988_v48 = vld [vmem:[%s6560_s1 + $0x1e8] sm:$0xff]   ;;  %v4992_v52 = vld [vmem:[%s6560_s1 + $0x1e0] sm:$0xff]  }
  0x11   :  { %4455 = vmatpush3.bf16.msra.mxu1 %v4957_v15  ;;  %v4989_v49 = vld [vmem:[%s6560_s1 + $0x1a8] sm:$0xff]   ;;  %v4993_v53 = vld [vmem:[%s6560_s1 + $0x1a0] sm:$0xff]   ;;  %v4994_v54 = vld [vmem:[%s6560_s1 + $0x158] sm:$0xff]  }
  0x12   :  { %4456 = vmatprep.subr.bf16.mxu1 %v4960_v18  ;;  %v4995_v55 = vld [vmem:[%s6560_s1 + $0x118] sm:$0xff]   ;;  %v4998_v58 = vld [vmem:[%s6560_s1 + $0x150] sm:$0xff]   ;;  %v5002_v62 = vld [vmem:[%s6560_s1 + $0x148] sm:$0xff]  }
  0x13   :  { %4435 = vmatpush3.bf16.msra.mxu0 %v4959_v17  ;;  %v4996_v56 = vld [vmem:[%s6560_s1 + $0x1d8] sm:$0xff]   ;;  %v4999_v59 = vld [vmem:[%s6560_s1 + $0x110] sm:$0xff]   ;;  %v5003_v63 = vld [vmem:[%s6560_s1 + $0x108] sm:$0xff]  }
  0x14   :  { %4436 = vmatprep.subr.bf16.mxu0 %v4962_v20  ;;  %v4997_v57 = vld [vmem:[%s6560_s1 + $0x198] sm:$0xff]   ;;  %v5000_v60 = vld [vmem:[%s6560_s1 + $0x1d0] sm:$0xff]   ;;  %v5004_v0 = vld [vmem:[%s6560_s1 + $0x1c8] sm:$0xff]  }
  0x15   :  { %4457 = vmatpush3.bf16.msra.mxu1 %v4961_v19  ;;  %v5001_v61 = vld [vmem:[%s6560_s1 + $0x190] sm:$0xff]   ;;  %v5005_v1 = vld [vmem:[%s6560_s1 + $0x188] sm:$0xff]   ;;  %v5006_v2 = vld [vmem:[%s6560_s1 + $0x140] sm:$0xff]  }
  0x16   :  { %4458 = vmatprep.subr.bf16.mxu1 %v4964_v22  ;;  %v5007_v3 = vld [vmem:[%s6560_s1 + $0x100] sm:$0xff]   ;;  %v18_v5 = vld [vmem:[%s6559_s0 + $0x10] sm:$0xff]  ;;  %v5012_v9 = vld [vmem:[%s6560_s1 + $0x278] sm:$0xff]  }
  0x17   :  { %4437 = vmatpush3.bf16.msra.mxu0 %v4963_v21  ;;  %v5008_v4 = vld [vmem:[%s6560_s1 + $0x1c0] sm:$0xff]   ;;  %v4025_v6 = vcombine.low %v18_v5, %v18_v5  ;;  %v4026_v7 = vcombine.high %v18_v5, %v18_v5  ;;  %v19_v10 = vld [vmem:[%s6559_s0 + $0x18] sm:$0xff]  ;;  %v5018_v16 = vld [vmem:[%s6560_s1 + $0x270] sm:$0xff]  }
  0x18   :  { %4438 = vmatprep.subr.bf16.mxu0 %v4966_v24  ;;  %v5011_v8 = vld [vmem:[%s6560_s1 + $0x180] sm:$0xff]   ;;  %v4027_v11 = vcombine.low %v19_v10, %v19_v10  ;;  %v4028_v12 = vcombine.high %v19_v10, %v19_v10  ;;  %v5015_v13 = vld [vmem:[%s6560_s1 + $0x238] sm:$0xff]   ;;  %v5019_v17 = vld [vmem:[%s6560_s1 + $0x230] sm:$0xff]  }
  0x19   :  { %4459 = vmatpush3.bf16.msra.mxu1 %v4965_v23  ;;  %v5016_v14 = vld [vmem:[%s6560_s1 + $0x2f8] sm:$0xff]   ;;  %v5020_v18 = vld [vmem:[%s6560_s1 + $0x2f0] sm:$0xff]   ;;  %v5022_v20 = vld [vmem:[%s6560_s1 + $0x268] sm:$0xff]  }
  0x1a   :  { %4460 = vmatprep.subr.bf16.mxu1 %v4968_v26  ;;  %v5017_v15 = vld [vmem:[%s6560_s1 + $0x2b8] sm:$0xff]   ;;  %v5021_v19 = vld [vmem:[%s6560_s1 + $0x2b0] sm:$0xff]   ;;  %v5023_v21 = vld [vmem:[%s6560_s1 + $0x228] sm:$0xff]  }
  0x1b   :  { %4439 = vmatpush3.bf16.msra.mxu0 %v4967_v25  ;;  %v5024_v22 = vld [vmem:[%s6560_s1 + $0x2e8] sm:$0xff]   ;;  %v5026_v24 = vld [vmem:[%s6560_s1 + $0x260] sm:$0xff]   ;;  %v5033_v31 = vld [vmem:[%s6560_s1 + $0x298] sm:$0xff]  }
  0x1c   :  { %4440 = vmatprep.subr.bf16.mxu0 %v4970_v28  ;;  %v5025_v23 = vld [vmem:[%s6560_s1 + $0x2a8] sm:$0xff]   ;;  %v5027_v25 = vld [vmem:[%s6560_s1 + $0x220] sm:$0xff]   ;;  %v5030_v28 = vld [vmem:[%s6560_s1 + $0x258] sm:$0xff]  }
  0x1d   :  { %4461 = vmatpush3.bf16.msra.mxu1 %v4969_v27  ;;  %v5028_v26 = vld [vmem:[%s6560_s1 + $0x2e0] sm:$0xff]   ;;  %v5035_v33 = vld [vmem:[%s6560_s1 + $0x210] sm:$0xff]   ;;  %v5038_v36 = vld [vmem:[%s6560_s1 + $0x248] sm:$0xff]  }
  0x1e   :  { %4462 = vmatprep.subr.bf16.mxu1 %v4972_v30  ;;  %v5029_v27 = vld [vmem:[%s6560_s1 + $0x2a0] sm:$0xff]   ;;  %v5032_v30 = vld [vmem:[%s6560_s1 + $0x2d8] sm:$0xff]   ;;  %v5040_v38 = vld [vmem:[%s6560_s1 + $0x2c8] sm:$0xff]  }
  0x1f   :  { %4441 = vmatpush3.bf16.msra.mxu0 %v4971_v29  ;;  %v5031_v29 = vld [vmem:[%s6560_s1 + $0x218] sm:$0xff]   ;;  %v5074_v10 = vld [vmem:[%s6560_s1 + $0x348] sm:$0xff]  }
  0x20   :  { %4470 = vmatprep.subr.bf16.mxu0 %v4976_v35  ;;  %v5037_v35 = vld [vmem:[%s6560_s1 + $0x290] sm:$0xff]   ;;  %v5069_v5 = vld [vmem:[%s6560_s1 + $0x398] sm:$0xff]  }
  0x21   :  { %4463 = vmatpush3.bf16.msra.mxu1 %v4975_v34  ;;  %v5036_v34 = vld [vmem:[%s6560_s1 + $0x2d0] sm:$0xff]  }
  0x22   :  { %3117 = vmatmul.mubr.bf16.vlgmr.msra.gmra.mxu0 %v4021_v32  ;;  %4492 = vmatprep.subr.bf16.mxu1 %v4980_v40  ;;  %v5034_v32 = vld [vmem:[%s6560_s1 + $0x250] sm:$0xff]   ;;  %v5042_v40 = vld [vmem:[%s6560_s1 + $0x240] sm:$0xff]  }
  0x23   :  { %4471 = vmatpush3.bf16.msra.mxu0 %v4979_v39  ;;  %3196 = vmatprep.mubr.bf16.mxu0 %v4026_v7  ;;  %v5041_v39 = vld [vmem:[%s6560_s1 + $0x288] sm:$0xff]   ;;  %v5071_v7 = vld [vmem:[%s6560_s1 + $0x310] sm:$0xff]  }
  0x24   :  { %3157 = vmatmul.mubr.bf16.vlgmr.msra.gmra.mxu1 %v4023_v37  ;;  %4472 = vmatprep.subr.bf16.mxu0 %v4982_v42  ;;  %v5039_v37 = vld [vmem:[%s6560_s1 + $0x208] sm:$0xff]   ;;  %v5044_v42 = vld [vmem:[%s6560_s1 + $0x2c0] sm:$0xff]  }
  0x25   :  { %4493 = vmatpush3.bf16.msra.mxu1 %v4981_v41  ;;  %3236 = vmatprep.mubr.bf16.mxu1 %v4028_v12  ;;  %v5043_v41 = vld [vmem:[%s6560_s1 + $0x200] sm:$0xff]   ;;  %v5076_v12 = vld [vmem:[%s6560_s1 + $0x3c8] sm:$0xff]  }
  0x26   :  { %4494 = vmatprep.subr.bf16.mxu1 %v4984_v44 }
  0x27   :  { %4473 = vmatpush3.bf16.msra.mxu0 %v4983_v43  ;;  %v20_v43 = vld [vmem:[%s6559_s0 + $0x20] sm:$0xff] }
  0x28   :  { %4474 = vmatprep.subr.bf16.mxu0 %v4986_v46  ;;  %v4029_v44 = vcombine.low %v20_v43, %v20_v43  ;;  %v5047_v46 = vld [vmem:[%s6560_s1 + $0x280] sm:$0xff]  }
  0x29   :  { %4495 = vmatpush3.bf16.msra.mxu1 %v4985_v45  ;;  %v4030_v45 = vcombine.high %v20_v43, %v20_v43  ;;  %v5105_v43 = vld [vmem:[%s6560_s1 + $0x498] sm:$0xff]  }
  0x2a   :  { %4496 = vmatprep.subr.bf16.mxu1 %v4988_v48  ;;  %v21_v48 = vld [vmem:[%s6559_s0 + $0x28] sm:$0xff] }
  0x2b   :  { %4475 = vmatpush3.bf16.msra.mxu0 %v4987_v47  ;;  %v5048_v47 = vld [vmem:[%s6560_s1 + $0x378] sm:$0xff]  }
  0x2c   :  { %4476 = vmatprep.subr.bf16.mxu0 %v4990_v50  ;;  %v4032_v50 = vcombine.high %v21_v48, %v21_v48 }
  0x2d   :  { %4497 = vmatpush3.bf16.msra.mxu1 %v4989_v49  ;;  %v4031_v49 = vcombine.low %v21_v48, %v21_v48  ;;  %v5110_v48 = vld [vmem:[%s6560_s1 + $0x448] sm:$0xff]  }
  0x2e   :  { %4498 = vmatprep.subr.bf16.mxu1 %v4992_v52  ;;  %v5052_v52 = vld [vmem:[%s6560_s1 + $0x3f8] sm:$0xff]  }
  0x2f   :  { %4477 = vmatpush3.bf16.msra.mxu0 %v4991_v51  ;;  %v5051_v51 = vld [vmem:[%s6560_s1 + $0x338] sm:$0xff]  }
  0x30   :  { %4478 = vmatprep.subr.bf16.mxu0 %v4994_v54  ;;  %v5054_v54 = vld [vmem:[%s6560_s1 + $0x370] sm:$0xff]  }
  0x31   :  { %4499 = vmatpush3.bf16.msra.mxu1 %v4993_v53  ;;  %v5053_v53 = vld [vmem:[%s6560_s1 + $0x3b8] sm:$0xff]  }
  0x32   :  { %4500 = vmatprep.subr.bf16.mxu1 %v4996_v56  ;;  %v5056_v56 = vld [vmem:[%s6560_s1 + $0x3f0] sm:$0xff]  }
  0x33   :  { %4479 = vmatpush3.bf16.msra.mxu0 %v4995_v55  ;;  %v5055_v55 = vld [vmem:[%s6560_s1 + $0x330] sm:$0xff]  }
  0x34   :  { %4480 = vmatprep.subr.bf16.mxu0 %v4998_v58  ;;  %v5058_v58 = vld [vmem:[%s6560_s1 + $0x368] sm:$0xff]  }
  0x35   :  { %4501 = vmatpush3.bf16.msra.mxu1 %v4997_v57  ;;  %v5057_v57 = vld [vmem:[%s6560_s1 + $0x3b0] sm:$0xff]  }
  0x36   :  { %4502 = vmatprep.subr.bf16.mxu1 %v5000_v60  ;;  %v5060_v60 = vld [vmem:[%s6560_s1 + $0x3e8] sm:$0xff]  }
  0x37   :  { %4481 = vmatpush3.bf16.msra.mxu0 %v4999_v59  ;;  %v5059_v59 = vld [vmem:[%s6560_s1 + $0x328] sm:$0xff]  }
  0x38   :  { %4482 = vmatprep.subr.bf16.mxu0 %v5002_v62  ;;  %v5062_v62 = vld [vmem:[%s6560_s1 + $0x360] sm:$0xff]  }
  0x39   :  { %4503 = vmatpush3.bf16.msra.mxu1 %v5001_v61  ;;  %v5061_v61 = vld [vmem:[%s6560_s1 + $0x3a8] sm:$0xff]  }
  0x3a   :  { %4504 = vmatprep.subr.bf16.mxu1 %v5004_v0  ;;  %v5064_v0 = vld [vmem:[%s6560_s1 + $0x3e0] sm:$0xff]  }
  0x3b   :  { %4483 = vmatpush3.bf16.msra.mxu0 %v5003_v63  ;;  %v5063_v63 = vld [vmem:[%s6560_s1 + $0x320] sm:$0xff]  }
  0x3c   :  { %4484 = vmatprep.subr.bf16.mxu0 %v5006_v2  ;;  %v5066_v2 = vld [vmem:[%s6560_s1 + $0x358] sm:$0xff]  }
  0x3d   :  { %4505 = vmatpush3.bf16.msra.mxu1 %v5005_v1  ;;  %v5065_v1 = vld [vmem:[%s6560_s1 + $0x3a0] sm:$0xff]  }
  0x3e   :  { %4506 = vmatprep.subr.bf16.mxu1 %v5008_v4  ;;  %v5068_v4 = vld [vmem:[%s6560_s1 + $0x3d8] sm:$0xff]  }
  0x3f   :  { %4485 = vmatpush3.bf16.msra.mxu0 %v5007_v3  ;;  %v5067_v3 = vld [vmem:[%s6560_s1 + $0x318] sm:$0xff]  }
  0x40   :  { %4514 = vmatprep.subr.bf16.mxu0 %v5012_v9  ;;  %v5073_v9 = vld [vmem:[%s6560_s1 + $0x390] sm:$0xff]  }
  0x41   :  { %4507 = vmatpush3.bf16.msra.mxu1 %v5011_v8  ;;  %v5072_v8 = vld [vmem:[%s6560_s1 + $0x3d0] sm:$0xff]  }
  0x42   :  { %3197 = vmatmul.mubr.bf16.vlgmr.msra.gmra.mxu0 %v4025_v6  ;;  %4536 = vmatprep.subr.bf16.mxu1 %v5016_v14  ;;  %v5070_v6 = vld [vmem:[%s6560_s1 + $0x350] sm:$0xff]   ;;  %v5078_v14 = vld [vmem:[%s6560_s1 + $0x340] sm:$0xff]  }
  0x43   :  { %4515 = vmatpush3.bf16.msra.mxu0 %v5015_v13  ;;  %3276 = vmatprep.mubr.bf16.mxu0 %v4030_v45  ;;  %v5077_v13 = vld [vmem:[%s6560_s1 + $0x388] sm:$0xff]   ;;  %v5107_v45 = vld [vmem:[%s6560_s1 + $0x410] sm:$0xff]  }
  0x44   :  { %3237 = vmatmul.mubr.bf16.vlgmr.msra.gmra.mxu1 %v4027_v11  ;;  %4516 = vmatprep.subr.bf16.mxu0 %v5018_v16  ;;  %v5075_v11 = vld [vmem:[%s6560_s1 + $0x308] sm:$0xff]   ;;  %v5080_v16 = vld [vmem:[%s6560_s1 + $0x3c0] sm:$0xff]  }
  0x45   :  { %4537 = vmatpush3.bf16.msra.mxu1 %v5017_v15  ;;  %3316 = vmatprep.mubr.bf16.mxu1 %v4032_v50  ;;  %v5079_v15 = vld [vmem:[%s6560_s1 + $0x300] sm:$0xff]   ;;  %v5112_v50 = vld [vmem:[%s6560_s1 + $0x4c8] sm:$0xff]  }
  0x46   :  { %4538 = vmatprep.subr.bf16.mxu1 %v5020_v18 }
  0x47   :  { %4517 = vmatpush3.bf16.msra.mxu0 %v5019_v17  ;;  %v22_v17 = vld [vmem:[%s6559_s0 + $0x30] sm:$0xff] }
  0x48   :  { %4518 = vmatprep.subr.bf16.mxu0 %v5022_v20  ;;  %v4033_v18 = vcombine.low %v22_v17, %v22_v17  ;;  %v5083_v20 = vld [vmem:[%s6560_s1 + $0x380] sm:$0xff]  }
  0x49   :  { %4539 = vmatpush3.bf16.msra.mxu1 %v5021_v19  ;;  %v4034_v19 = vcombine.high %v22_v17, %v22_v17  ;;  %v5141_v17 = vld [vmem:[%s6560_s1 + $0x598] sm:$0xff]  }
  0x4a   :  { %4540 = vmatprep.subr.bf16.mxu1 %v5024_v22  ;;  %v23_v22 = vld [vmem:[%s6559_s0 + $0x38] sm:$0xff] }
  0x4b   :  { %4519 = vmatpush3.bf16.msra.mxu0 %v5023_v21  ;;  %v5084_v21 = vld [vmem:[%s6560_s1 + $0x478] sm:$0xff]  }
  0x4c   :  { %4520 = vmatprep.subr.bf16.mxu0 %v5026_v24  ;;  %v4036_v24 = vcombine.high %v23_v22, %v23_v22 }
  0x4d   :  { %4541 = vmatpush3.bf16.msra.mxu1 %v5025_v23  ;;  %v4035_v23 = vcombine.low %v23_v22, %v23_v22  ;;  %v5146_v22 = vld [vmem:[%s6560_s1 + $0x548] sm:$0xff]  }
  0x4e   :  { %4542 = vmatprep.subr.bf16.mxu1 %v5028_v26  ;;  %v5088_v26 = vld [vmem:[%s6560_s1 + $0x4f8] sm:$0xff]  }
  0x4f   :  { %4521 = vmatpush3.bf16.msra.mxu0 %v5027_v25  ;;  %v5087_v25 = vld [vmem:[%s6560_s1 + $0x438] sm:$0xff]  }
  0x50   :  { %4522 = vmatprep.subr.bf16.mxu0 %v5030_v28  ;;  %v5090_v28 = vld [vmem:[%s6560_s1 + $0x470] sm:$0xff]  }
  0x51   :  { %4543 = vmatpush3.bf16.msra.mxu1 %v5029_v27  ;;  %v5089_v27 = vld [vmem:[%s6560_s1 + $0x4b8] sm:$0xff]  }
  0x52   :  { %4544 = vmatprep.subr.bf16.mxu1 %v5032_v30  ;;  %v5092_v30 = vld [vmem:[%s6560_s1 + $0x4f0] sm:$0xff]  }
  0x53   :  { %4523 = vmatpush3.bf16.msra.mxu0 %v5031_v29  ;;  %v5091_v29 = vld [vmem:[%s6560_s1 + $0x430] sm:$0xff]  }
  0x54   :  { %4524 = vmatprep.subr.bf16.mxu0 %v5034_v32  ;;  %v5094_v32 = vld [vmem:[%s6560_s1 + $0x468] sm:$0xff]  }
  0x55   :  { %4545 = vmatpush3.bf16.msra.mxu1 %v5033_v31  ;;  %v5093_v31 = vld [vmem:[%s6560_s1 + $0x4b0] sm:$0xff]  }
  0x56   :  { %4546 = vmatprep.subr.bf16.mxu1 %v5036_v34  ;;  %v5096_v34 = vld [vmem:[%s6560_s1 + $0x4e8] sm:$0xff]  }
  0x57   :  { %4525 = vmatpush3.bf16.msra.mxu0 %v5035_v33  ;;  %v5095_v33 = vld [vmem:[%s6560_s1 + $0x428] sm:$0xff]  }
  0x58   :  { %4526 = vmatprep.subr.bf16.mxu0 %v5038_v36  ;;  %v5098_v36 = vld [vmem:[%s6560_s1 + $0x460] sm:$0xff]  }
  0x59   :  { %4547 = vmatpush3.bf16.msra.mxu1 %v5037_v35  ;;  %v5097_v35 = vld [vmem:[%s6560_s1 + $0x4a8] sm:$0xff]  }
  0x5a   :  { %4548 = vmatprep.subr.bf16.mxu1 %v5040_v38  ;;  %v5100_v38 = vld [vmem:[%s6560_s1 + $0x4e0] sm:$0xff]  }
  0x5b   :  { %4527 = vmatpush3.bf16.msra.mxu0 %v5039_v37  ;;  %v5099_v37 = vld [vmem:[%s6560_s1 + $0x420] sm:$0xff]  }
  0x5c   :  { %4528 = vmatprep.subr.bf16.mxu0 %v5042_v40  ;;  %v5102_v40 = vld [vmem:[%s6560_s1 + $0x458] sm:$0xff]  }
  0x5d   :  { %4549 = vmatpush3.bf16.msra.mxu1 %v5041_v39  ;;  %v5101_v39 = vld [vmem:[%s6560_s1 + $0x4a0] sm:$0xff]  }
  0x5e   :  { %4550 = vmatprep.subr.bf16.mxu1 %v5044_v42  ;;  %v5104_v42 = vld [vmem:[%s6560_s1 + $0x4d8] sm:$0xff]  }
  0x5f   :  { %4529 = vmatpush3.bf16.msra.mxu0 %v5043_v41  ;;  %v5103_v41 = vld [vmem:[%s6560_s1 + $0x418] sm:$0xff]  }
  0x60   :  { %4558 = vmatprep.subr.bf16.mxu0 %v5048_v47  ;;  %v5109_v47 = vld [vmem:[%s6560_s1 + $0x490] sm:$0xff]  }
  0x61   :  { %4551 = vmatpush3.bf16.msra.mxu1 %v5047_v46  ;;  %v5108_v46 = vld [vmem:[%s6560_s1 + $0x4d0] sm:$0xff]  }
  0x62   :  { %3277 = vmatmul.mubr.bf16.vlgmr.msra.gmra.mxu0 %v4029_v44  ;;  %4580 = vmatprep.subr.bf16.mxu1 %v5052_v52  ;;  %v5106_v44 = vld [vmem:[%s6560_s1 + $0x450] sm:$0xff]   ;;  %v5114_v52 = vld [vmem:[%s6560_s1 + $0x440] sm:$0xff]  }
  0x63   :  { %4559 = vmatpush3.bf16.msra.mxu0 %v5051_v51  ;;  %3356 = vmatprep.mubr.bf16.mxu0 %v4034_v19  ;;  %v5113_v51 = vld [vmem:[%s6560_s1 + $0x488] sm:$0xff]   ;;  %v5143_v19 = vld [vmem:[%s6560_s1 + $0x510] sm:$0xff]  }
  0x64   :  { %3317 = vmatmul.mubr.bf16.vlgmr.msra.gmra.mxu1 %v4031_v49  ;;  %4560 = vmatprep.subr.bf16.mxu0 %v5054_v54  ;;  %v5111_v49 = vld [vmem:[%s6560_s1 + $0x408] sm:$0xff]   ;;  %v5116_v54 = vld [vmem:[%s6560_s1 + $0x4c0] sm:$0xff]  }
  0x65   :  { %4581 = vmatpush3.bf16.msra.mxu1 %v5053_v53  ;;  %3396 = vmatprep.mubr.bf16.mxu1 %v4036_v24  ;;  %v5115_v53 = vld [vmem:[%s6560_s1 + $0x400] sm:$0xff]   ;;  %v5148_v24 = vld [vmem:[%s6560_s1 + $0x5c8] sm:$0xff]  }
  0x66   :  { %4582 = vmatprep.subr.bf16.mxu1 %v5056_v56 }
  0x67   :  { %4561 = vmatpush3.bf16.msra.mxu0 %v5055_v55  ;;  %v24_v55 = vld [vmem:[%s6559_s0 + $0x40] sm:$0xff] }
  0x68   :  { %4562 = vmatprep.subr.bf16.mxu0 %v5058_v58  ;;  %v4037_v56 = vcombine.low %v24_v55, %v24_v55  ;;  %v5119_v58 = vld [vmem:[%s6560_s1 + $0x480] sm:$0xff]  }
  0x69   :  { %4583 = vmatpush3.bf16.msra.mxu1 %v5057_v57  ;;  %v4038_v57 = vcombine.high %v24_v55, %v24_v55  ;;  %v5177_v55 = vld [vmem:[%s6560_s1 + $0x698] sm:$0xff]  }
  0x6a   :  { %4584 = vmatprep.subr.bf16.mxu1 %v5060_v60  ;;  %v25_v60 = vld [vmem:[%s6559_s0 + $0x48] sm:$0xff] }
  0x6b   :  { %4563 = vmatpush3.bf16.msra.mxu0 %v5059_v59  ;;  %v5120_v59 = vld [vmem:[%s6560_s1 + $0x578] sm:$0xff]  }
  0x6c   :  { %4564 = vmatprep.subr.bf16.mxu0 %v5062_v62  ;;  %v4040_v62 = vcombine.high %v25_v60, %v25_v60 }
  0x6d   :  { %4585 = vmatpush3.bf16.msra.mxu1 %v5061_v61  ;;  %v4039_v61 = vcombine.low %v25_v60, %v25_v60  ;;  %v5182_v60 = vld [vmem:[%s6560_s1 + $0x648] sm:$0xff]  }
  0x6e   :  { %4586 = vmatprep.subr.bf16.mxu1 %v5064_v0  ;;  %v5124_v0 = vld [vmem:[%s6560_s1 + $0x5f8] sm:$0xff]  }
  0x6f   :  { %4565 = vmatpush3.bf16.msra.mxu0 %v5063_v63  ;;  %v5123_v63 = vld [vmem:[%s6560_s1 + $0x538] sm:$0xff]  }
  0x70   :  { %4566 = vmatprep.subr.bf16.mxu0 %v5066_v2  ;;  %v5126_v2 = vld [vmem:[%s6560_s1 + $0x570] sm:$0xff]  }
  0x71   :  { %4587 = vmatpush3.bf16.msra.mxu1 %v5065_v1  ;;  %v5125_v1 = vld [vmem:[%s6560_s1 + $0x5b8] sm:$0xff]  }
  0x72   :  { %4588 = vmatprep.subr.bf16.mxu1 %v5068_v4  ;;  %v5128_v4 = vld [vmem:[%s6560_s1 + $0x5f0] sm:$0xff]  }
  0x73   :  { %4567 = vmatpush3.bf16.msra.mxu0 %v5067_v3  ;;  %v5127_v3 = vld [vmem:[%s6560_s1 + $0x530] sm:$0xff]  }
  0x74   :  { %4568 = vmatprep.subr.bf16.mxu0 %v5070_v6  ;;  %v5130_v6 = vld [vmem:[%s6560_s1 + $0x568] sm:$0xff]  }
  0x75   :  { %4589 = vmatpush3.bf16.msra.mxu1 %v5069_v5  ;;  %v5129_v5 = vld [vmem:[%s6560_s1 + $0x5b0] sm:$0xff]  }
  0x76   :  { %4590 = vmatprep.subr.bf16.mxu1 %v5072_v8  ;;  %v5132_v8 = vld [vmem:[%s6560_s1 + $0x5e8] sm:$0xff]  }
  0x77   :  { %4569 = vmatpush3.bf16.msra.mxu0 %v5071_v7  ;;  %v5131_v7 = vld [vmem:[%s6560_s1 + $0x528] sm:$0xff]  }
  0x78   :  { %4570 = vmatprep.subr.bf16.mxu0 %v5074_v10  ;;  %v5134_v10 = vld [vmem:[%s6560_s1 + $0x560] sm:$0xff]  }
  0x79   :  { %4591 = vmatpush3.bf16.msra.mxu1 %v5073_v9  ;;  %v5133_v9 = vld [vmem:[%s6560_s1 + $0x5a8] sm:$0xff]  }
  0x7a   :  { %4592 = vmatprep.subr.bf16.mxu1 %v5076_v12  ;;  %v5136_v12 = vld [vmem:[%s6560_s1 + $0x5e0] sm:$0xff]  }
  0x7b   :  { %4571 = vmatpush3.bf16.msra.mxu0 %v5075_v11  ;;  %v5135_v11 = vld [vmem:[%s6560_s1 + $0x520] sm:$0xff]  }
  0x7c   :  { %4572 = vmatprep.subr.bf16.mxu0 %v5078_v14  ;;  %v5138_v14 = vld [vmem:[%s6560_s1 + $0x558] sm:$0xff]  }
  0x7d   :  { %4593 = vmatpush3.bf16.msra.mxu1 %v5077_v13  ;;  %v5137_v13 = vld [vmem:[%s6560_s1 + $0x5a0] sm:$0xff]  }
  0x7e   :  { %4594 = vmatprep.subr.bf16.mxu1 %v5080_v16  ;;  %v5140_v16 = vld [vmem:[%s6560_s1 + $0x5d8] sm:$0xff]  }
  0x7f   :  { %4573 = vmatpush3.bf16.msra.mxu0 %v5079_v15  ;;  %v5139_v15 = vld [vmem:[%s6560_s1 + $0x518] sm:$0xff]  }
  0x80   :  { %4602 = vmatprep.subr.bf16.mxu0 %v5084_v21  ;;  %v5145_v21 = vld [vmem:[%s6560_s1 + $0x590] sm:$0xff]  }
  0x81   :  { %4595 = vmatpush3.bf16.msra.mxu1 %v5083_v20  ;;  %v5144_v20 = vld [vmem:[%s6560_s1 + $0x5d0] sm:$0xff]  }
  0x82   :  { %3357 = vmatmul.mubr.bf16.vlgmr.msra.gmra.mxu0 %v4033_v18  ;;  %4624 = vmatprep.subr.bf16.mxu1 %v5088_v26  ;;  %v5142_v18 = vld [vmem:[%s6560_s1 + $0x550] sm:$0xff]   ;;  %v5150_v26 = vld [vmem:[%s6560_s1 + $0x540] sm:$0xff]  }
  0x83   :  { %4603 = vmatpush3.bf16.msra.mxu0 %v5087_v25  ;;  %3436 = vmatprep.mubr.bf16.mxu0 %v4038_v57  ;;  %v5149_v25 = vld [vmem:[%s6560_s1 + $0x588] sm:$0xff]   ;;  %v5179_v57 = vld [vmem:[%s6560_s1 + $0x610] sm:$0xff]  }
  0x84   :  { %3397 = vmatmul.mubr.bf16.vlgmr.msra.gmra.mxu1 %v4035_v23  ;;  %4604 = vmatprep.subr.bf16.mxu0 %v5090_v28  ;;  %v5147_v23 = vld [vmem:[%s6560_s1 + $0x508] sm:$0xff]   ;;  %v5152_v28 = vld [vmem:[%s6560_s1 + $0x5c0] sm:$0xff]  }
  0x85   :  { %4625 = vmatpush3.bf16.msra.mxu1 %v5089_v27  ;;  %3476 = vmatprep.mubr.bf16.mxu1 %v4040_v62  ;;  %v5151_v27 = vld [vmem:[%s6560_s1 + $0x500] sm:$0xff]   ;;  %v5184_v62 = vld [vmem:[%s6560_s1 + $0x6c8] sm:$0xff]  }
  0x86   :  { %4626 = vmatprep.subr.bf16.mxu1 %v5092_v30 }
  0x87   :  { %4605 = vmatpush3.bf16.msra.mxu0 %v5091_v29  ;;  %v26_v29 = vld [vmem:[%s6559_s0 + $0x50] sm:$0xff] }
  0x88   :  { %4606 = vmatprep.subr.bf16.mxu0 %v5094_v32  ;;  %v4041_v30 = vcombine.low %v26_v29, %v26_v29  ;;  %v5155_v32 = vld [vmem:[%s6560_s1 + $0x580] sm:$0xff]  }
  0x89   :  { %4627 = vmatpush3.bf16.msra.mxu1 %v5093_v31  ;;  %v4042_v31 = vcombine.high %v26_v29, %v26_v29 }
  0x8a   :  { %4628 = vmatprep.subr.bf16.mxu1 %v5096_v34  ;;  %v27_v34 = vld [vmem:[%s6559_s0 + $0x58] sm:$0xff] }
  0x8b   :  { %4607 = vmatpush3.bf16.msra.mxu0 %v5095_v33  ;;  %v5156_v33 = vld [vmem:[%s6560_s1 + $0x678] sm:$0xff]  }
  0x8c   :  { %4608 = vmatprep.subr.bf16.mxu0 %v5098_v36  ;;  %v4044_v36 = vcombine.high %v27_v34, %v27_v34 }
  0x8d   :  { %4629 = vmatpush3.bf16.msra.mxu1 %v5097_v35  ;;  %v4043_v35 = vcombine.low %v27_v34, %v27_v34  ;;  %v5205_v34 = vld [vmem:[%s6560_s1 + $0x7a8] sm:$0xff]  }
  0x8e   :  { %4630 = vmatprep.subr.bf16.mxu1 %v5100_v38  ;;  %v5160_v38 = vld [vmem:[%s6560_s1 + $0x6f8] sm:$0xff]  }
  0x8f   :  { %4609 = vmatpush3.bf16.msra.mxu0 %v5099_v37  ;;  %v5159_v37 = vld [vmem:[%s6560_s1 + $0x638] sm:$0xff]  }
  0x90   :  { %4610 = vmatprep.subr.bf16.mxu0 %v5102_v40  ;;  %v5162_v40 = vld [vmem:[%s6560_s1 + $0x670] sm:$0xff]  }
  0x91   :  { %4631 = vmatpush3.bf16.msra.mxu1 %v5101_v39  ;;  %v5161_v39 = vld [vmem:[%s6560_s1 + $0x6b8] sm:$0xff]  }
  0x92   :  { %4632 = vmatprep.subr.bf16.mxu1 %v5104_v42  ;;  %v5164_v42 = vld [vmem:[%s6560_s1 + $0x6f0] sm:$0xff]  }
  0x93   :  { %4611 = vmatpush3.bf16.msra.mxu0 %v5103_v41  ;;  %v5163_v41 = vld [vmem:[%s6560_s1 + $0x630] sm:$0xff]  }
  0x94   :  { %4612 = vmatprep.subr.bf16.mxu0 %v5106_v44  ;;  %v5166_v44 = vld [vmem:[%s6560_s1 + $0x668] sm:$0xff]  }
  0x95   :  { %4633 = vmatpush3.bf16.msra.mxu1 %v5105_v43  ;;  %v5165_v43 = vld [vmem:[%s6560_s1 + $0x6b0] sm:$0xff]  }
  0x96   :  { %4634 = vmatprep.subr.bf16.mxu1 %v5108_v46  ;;  %v5168_v46 = vld [vmem:[%s6560_s1 + $0x6e8] sm:$0xff]  }
  0x97   :  { %4613 = vmatpush3.bf16.msra.mxu0 %v5107_v45  ;;  %v5167_v45 = vld [vmem:[%s6560_s1 + $0x628] sm:$0xff]  }
  0x98   :  { %4614 = vmatprep.subr.bf16.mxu0 %v5110_v48  ;;  %v5170_v48 = vld [vmem:[%s6560_s1 + $0x660] sm:$0xff]  }
  0x99   :  { %4635 = vmatpush3.bf16.msra.mxu1 %v5109_v47  ;;  %v5169_v47 = vld [vmem:[%s6560_s1 + $0x6a8] sm:$0xff]  }
  0x9a   :  { %4636 = vmatprep.subr.bf16.mxu1 %v5112_v50  ;;  %v5172_v50 = vld [vmem:[%s6560_s1 + $0x6e0] sm:$0xff]  }
  0x9b   :  { %4615 = vmatpush3.bf16.msra.mxu0 %v5111_v49  ;;  %v5171_v49 = vld [vmem:[%s6560_s1 + $0x620] sm:$0xff]  }
  0x9c   :  { %4616 = vmatprep.subr.bf16.mxu0 %v5114_v52  ;;  %v5174_v52 = vld [vmem:[%s6560_s1 + $0x658] sm:$0xff]  }
  0x9d   :  { %4637 = vmatpush3.bf16.msra.mxu1 %v5113_v51  ;;  %v5173_v51 = vld [vmem:[%s6560_s1 + $0x6a0] sm:$0xff]  }
  0x9e   :  { %4638 = vmatprep.subr.bf16.mxu1 %v5116_v54  ;;  %v5176_v54 = vld [vmem:[%s6560_s1 + $0x6d8] sm:$0xff]  }
  0x9f   :  { %4617 = vmatpush3.bf16.msra.mxu0 %v5115_v53  ;;  %v5175_v53 = vld [vmem:[%s6560_s1 + $0x618] sm:$0xff]  }
  0xa0   :  { %4646 = vmatprep.subr.bf16.mxu0 %v5120_v59  ;;  %v5181_v59 = vld [vmem:[%s6560_s1 + $0x690] sm:$0xff]  }
  0xa1   :  { %4639 = vmatpush3.bf16.msra.mxu1 %v5119_v58  ;;  %v5180_v58 = vld [vmem:[%s6560_s1 + $0x6d0] sm:$0xff]  }
  0xa2   :  { %3437 = vmatmul.mubr.bf16.vlgmr.msra.gmra.mxu0 %v4037_v56  ;;  %4668 = vmatprep.subr.bf16.mxu1 %v5124_v0  ;;  %v5178_v56 = vld [vmem:[%s6560_s1 + $0x650] sm:$0xff]   ;;  %v5186_v0 = vld [vmem:[%s6560_s1 + $0x640] sm:$0xff]  }
  0xa3   :  { %4647 = vmatpush3.bf16.msra.mxu0 %v5123_v63  ;;  %3516 = vmatprep.mubr.bf16.mxu0 %v4042_v31  ;;  %v5185_v63 = vld [vmem:[%s6560_s1 + $0x688] sm:$0xff]  }
  0xa4   :  { %3477 = vmatmul.mubr.bf16.vlgmr.msra.gmra.mxu1 %v4039_v61  ;;  %4648 = vmatprep.subr.bf16.mxu0 %v5126_v2  ;;  %v5183_v61 = vld [vmem:[%s6560_s1 + $0x608] sm:$0xff]   ;;  %v5188_v2 = vld [vmem:[%s6560_s1 + $0x6c0] sm:$0xff]  }
  0xa5   :  { %4669 = vmatpush3.bf16.msra.mxu1 %v5125_v1  ;;  %3556 = vmatprep.mubr.bf16.mxu1 %v4044_v36  ;;  %v5187_v1 = vld [vmem:[%s6560_s1 + $0x600] sm:$0xff]   ;;  %v5202_v31 = vld [vmem:[%s6560_s1 + $0x768] sm:$0xff]  }
  0xa6   :  { %4670 = vmatprep.subr.bf16.mxu1 %v5128_v4  ;;  %v5207_v36 = vld [vmem:[%s6560_s1 + $0x720] sm:$0xff]  }
  0xa7   :  { %4649 = vmatpush3.bf16.msra.mxu0 %v5127_v3  ;;  %v28_v3 = vld [vmem:[%s6559_s0 + $0x60] sm:$0xff] }
  0xa8   :  { %4650 = vmatprep.subr.bf16.mxu0 %v5130_v6  ;;  %v4046_v6 = vcombine.high %v28_v3, %v28_v3 }
  0xa9   :  { %4671 = vmatpush3.bf16.msra.mxu1 %v5129_v5  ;;  %v4045_v5 = vcombine.low %v28_v3, %v28_v3 }
  0xaa   :  { %4672 = vmatprep.subr.bf16.mxu1 %v5132_v8  ;;  %v5192_v8 = vld [vmem:[%s6560_s1 + $0x778] sm:$0xff]  }
  0xab   :  { %4651 = vmatpush3.bf16.msra.mxu0 %v5131_v7  ;;  %v5191_v7 = vld [vmem:[%s6560_s1 + $0x680] sm:$0xff]  }
  0xac   :  { %4652 = vmatprep.subr.bf16.mxu0 %v5134_v10 }
  0xad   :  { %4673 = vmatpush3.bf16.msra.mxu1 %v5133_v9  ;;  %v29_v9 = vld [vmem:[%s6559_s0 + $0x68] sm:$0xff] }
  0xae   :  { %4674 = vmatprep.subr.bf16.mxu1 %v5136_v12  ;;  %v4047_v12 = vcombine.low %v29_v9, %v29_v9 }
  0xaf   :  { %4653 = vmatpush3.bf16.msra.mxu0 %v5135_v11 }
  0xb0   :  { %4654 = vmatprep.subr.bf16.mxu0 %v5138_v14  ;;  %v5195_v14 = vld [vmem:[%s6560_s1 + $0x738] sm:$0xff]  }
  0xb1   :  { %4675 = vmatpush3.bf16.msra.mxu1 %v5137_v13  ;;  %v4048_v13 = vcombine.high %v29_v9, %v29_v9 }
  0xb2   :  { %4676 = vmatprep.subr.bf16.mxu1 %v5140_v16 }
  0xb3   :  { %4655 = vmatpush3.bf16.msra.mxu0 %v5139_v15  ;;  %v4020_v15 = vld [vmem:[%s6561_s2] ss:$0 sm:$0xff] }
  0xb4   :  { %4656 = vmatprep.subr.bf16.mxu0 %v5142_v18 }
  0xb5   :  { %4677 = vmatpush3.bf16.msra.mxu1 %v5141_v17  ;;  %v5196_v17 = vld [vmem:[%s6560_s1 + $0x7f8] sm:$0xff]  }
  0xb6   :  { %4678 = vmatprep.subr.bf16.mxu1 %v5144_v20 }
  0xb7   :  { %4657 = vmatpush3.bf16.msra.mxu0 %v5143_v19 }
  0xb8   :  { %4658 = vmatprep.subr.bf16.mxu0 %v5146_v22 }
  0xb9   :  { %4679 = vmatpush3.bf16.msra.mxu1 %v5145_v21  ;;  %v5197_v21 = vld [vmem:[%s6560_s1 + $0x7b8] sm:$0xff]  }
  0xba   :  { %4680 = vmatprep.subr.bf16.mxu1 %v5148_v24 }
  0xbb   :  { %4659 = vmatpush3.bf16.msra.mxu0 %v5147_v23  ;;  %v5198_v23 = vld [vmem:[%s6560_s1 + $0x770] sm:$0xff]  }
  0xbc   :  { %4660 = vmatprep.subr.bf16.mxu0 %v5150_v26 }
  0xbd   :  { %4681 = vmatpush3.bf16.msra.mxu1 %v5149_v25 }
  0xbe   :  { %4682 = vmatprep.subr.bf16.mxu1 %v5152_v28  ;;  %v5200_v28 = vld [vmem:[%s6560_s1 + $0x7f0] sm:$0xff]  }
  0xbf   :  { %4661 = vmatpush3.bf16.msra.mxu0 %v5151_v27  ;;  %v5199_v27 = vld [vmem:[%s6560_s1 + $0x730] sm:$0xff]  }
  0xc0   :  { %4690 = vmatprep.subr.bf16.mxu0 %v5156_v33  ;;  %v5204_v33 = vld [vmem:[%s6560_s1 + $0x7e8] sm:$0xff]  }
  0xc1   :  { %4683 = vmatpush3.bf16.msra.mxu1 %v5155_v32  ;;  %v5203_v32 = vld [vmem:[%s6560_s1 + $0x728] sm:$0xff]  }
  0xc2   :  { %3517 = vmatmul.mubr.bf16.vlgmr.msra.gmra.mxu0 %v4041_v30  ;;  %4712 = vmatprep.subr.bf16.mxu1 %v5160_v38  ;;  %v5201_v30 = vld [vmem:[%s6560_s1 + $0x7b0] sm:$0xff]   ;;  %v5209_v38 = vld [vmem:[%s6560_s1 + $0x7a0] sm:$0xff]  }
  0xc3   :  { %4691 = vmatpush3.bf16.msra.mxu0 %v5159_v37  ;;  %3596 = vmatprep.mubr.bf16.mxu0 %v4046_v6  ;;  %v5208_v37 = vld [vmem:[%s6560_s1 + $0x7e0] sm:$0xff]  }
  0xc4   :  { %3557 = vmatmul.mubr.bf16.vlgmr.msra.gmra.mxu1 %v4043_v35  ;;  %4692 = vmatprep.subr.bf16.mxu0 %v5162_v40  ;;  %v5206_v35 = vld [vmem:[%s6560_s1 + $0x760] sm:$0xff]   ;;  %v5211_v40 = vld [vmem:[%s6560_s1 + $0x718] sm:$0xff]  }
  0xc5   :  { %4713 = vmatpush3.bf16.msra.mxu1 %v5161_v39  ;;  %3636 = vmatprep.mubr.bf16.mxu1 %v4048_v13  ;;  %v5210_v39 = vld [vmem:[%s6560_s1 + $0x758] sm:$0xff]   ;;  %v5235_v13 = vld [vmem:[%s6560_s1 + $0x830] sm:$0xff]  }
  0xc6   :  { %4714 = vmatprep.subr.bf16.mxu1 %v5164_v42  ;;  %v5213_v42 = vld [vmem:[%s6560_s1 + $0x798] sm:$0xff]  }
  0xc7   :  { %4693 = vmatpush3.bf16.msra.mxu0 %v5163_v41  ;;  %v5212_v41 = vld [vmem:[%s6560_s1 + $0x7d8] sm:$0xff]  }
  0xc8   :  { %4694 = vmatprep.subr.bf16.mxu0 %v5166_v44  ;;  %v5215_v44 = vld [vmem:[%s6560_s1 + $0x710] sm:$0xff]  }
  0xc9   :  { %4715 = vmatpush3.bf16.msra.mxu1 %v5165_v43  ;;  %v5214_v43 = vld [vmem:[%s6560_s1 + $0x750] sm:$0xff]  }
  0xca   :  { %4716 = vmatprep.subr.bf16.mxu1 %v5168_v46  ;;  %v5217_v46 = vld [vmem:[%s6560_s1 + $0x790] sm:$0xff]  }
  0xcb   :  { %4695 = vmatpush3.bf16.msra.mxu0 %v5167_v45  ;;  %v5216_v45 = vld [vmem:[%s6560_s1 + $0x7d0] sm:$0xff]  }
  0xcc   :  { %4696 = vmatprep.subr.bf16.mxu0 %v5170_v48  ;;  %v5219_v48 = vld [vmem:[%s6560_s1 + $0x708] sm:$0xff]  }
  0xcd   :  { %4717 = vmatpush3.bf16.msra.mxu1 %v5169_v47  ;;  %v5218_v47 = vld [vmem:[%s6560_s1 + $0x748] sm:$0xff]  }
  0xce   :  { %4718 = vmatprep.subr.bf16.mxu1 %v5172_v50  ;;  %v5221_v50 = vld [vmem:[%s6560_s1 + $0x788] sm:$0xff]  }
  0xcf   :  { %4697 = vmatpush3.bf16.msra.mxu0 %v5171_v49  ;;  %v5220_v49 = vld [vmem:[%s6560_s1 + $0x7c8] sm:$0xff]  }
  0xd0   :  { %4698 = vmatprep.subr.bf16.mxu0 %v5174_v52  ;;  %v5223_v52 = vld [vmem:[%s6560_s1 + $0x700] sm:$0xff]  }
  0xd1   :  { %4719 = vmatpush3.bf16.msra.mxu1 %v5173_v51  ;;  %v5222_v51 = vld [vmem:[%s6560_s1 + $0x740] sm:$0xff]  }
  0xd2   :  { %4720 = vmatprep.subr.bf16.mxu1 %v5176_v54 }
  0xd3   :  { %4699 = vmatpush3.bf16.msra.mxu0 %v5175_v53  ;;  %v5224_v53 = vld [vmem:[%s6560_s1 + $0x7c0] sm:$0xff]  }
  0xd4   :  { %4700 = vmatprep.subr.bf16.mxu0 %v5178_v56 }
  0xd5   :  { %4721 = vmatpush3.bf16.msra.mxu1 %v5177_v55  ;;  %v30_v55 = vld [vmem:[%s6559_s0 + $0x70] sm:$0xff] }
  0xd6   :  { %4722 = vmatprep.subr.bf16.mxu1 %v5180_v58  ;;  %v4049_v56 = vcombine.low %v30_v55, %v30_v55  ;;  %v5227_v58 = vld [vmem:[%s6560_s1 + $0x780] sm:$0xff]  }
  0xd7   :  { %4701 = vmatpush3.bf16.msra.mxu0 %v5179_v57  ;;  %v4050_v57 = vcombine.high %v30_v55, %v30_v55 }
  0xd8   :  { %4702 = vmatprep.subr.bf16.mxu0 %v5182_v60  ;;  %v5228_v60 = vld [vmem:[%s6560_s1 + $0x878] sm:$0xff]  }
  0xd9   :  { %4723 = vmatpush3.bf16.msra.mxu1 %v5181_v59 }
  0xda   :  { %4724 = vmatprep.subr.bf16.mxu1 %v5184_v62 }
  0xdb   :  { %4703 = vmatpush3.bf16.msra.mxu0 %v5183_v61  ;;  %v31_v61 = vld [vmem:[%s6559_s0 + $0x78] sm:$0xff] }
  0xdc   :  { %4704 = vmatprep.subr.bf16.mxu0 %v5186_v0  ;;  %v4051_v0 = vcombine.low %v31_v61, %v31_v61 }
  0xdd   :  { %4725 = vmatpush3.bf16.msra.mxu1 %v5185_v63 }
  0xde   :  { %4726 = vmatprep.subr.bf16.mxu1 %v5188_v2  ;;  %v5231_v2 = vld [vmem:[%s6560_s1 + $0x838] sm:$0xff]  }
  0xdf   :  { %4705 = vmatpush3.bf16.msra.mxu0 %v5187_v1  ;;  %v4052_v1 = vcombine.high %v31_v61, %v31_v61 }
  0xe0   :  { %4734 = vmatprep.subr.bf16.mxu0 %v5192_v8 }
  0xe1   :  { %4727 = vmatpush3.bf16.msra.mxu1 %v5191_v7  ;;  %v5233_v7 = vld [vmem:[%s6560_s1 + $0x8b8] sm:$0xff]  }
  0xe2   :  { %v4442_v4 = vpop.f32.mrf.mxu0  ;;  %3597 = vmatmul.mubr.bf16.vlgmr.msra.gmra.mxu0 %v4045_v5  ;;  %4756 = vmatprep.subr.bf16.mxu1 %v5196_v17  ;;  %v5232_v5 = vld [vmem:[%s6560_s1 + $0x8f8] sm:$0xff]   ;;  %v5238_v17 = vld [vmem:[%s6560_s1 + $0x868] sm:$0xff]  }
  0xe3   :  { %4735 = vmatpush3.bf16.msra.mxu0 %v5195_v14  ;;  %3676 = vmatprep.mubr.bf16.mxu0 %v4050_v57  ;;  %v5236_v14 = vld [vmem:[%s6560_s1 + $0x8f0] sm:$0xff]  }
  0xe4   :  { %v4443_v10 = vpop.f32.mrf.mxu0  ;;  %v4464_v11 = vpop.f32.mrf.mxu1  ;;  %3637 = vmatmul.mubr.bf16.vlgmr.msra.gmra.mxu1 %v4047_v12  ;;  %4736 = vmatprep.subr.bf16.mxu0 %v5198_v23  ;;  %v5244_v23 = vld [vmem:[%s6560_s1 + $0x8e0] sm:$0xff]  }
  0xe5   :  { %v4444_v16 = vadd.f32 %v4443_v10, %v4442_v4  ;;  %4757 = vmatpush3.bf16.msra.mxu1 %v5197_v21  ;;  %3716 = vmatprep.mubr.bf16.mxu1 %v4052_v1  ;;  %v5234_v10 = vld [vmem:[%s6560_s1 + $0x870] sm:$0xff]   ;;  %v5242_v21 = vld [vmem:[%s6560_s1 + $0x860] sm:$0xff]  }
  0xe6   :  { %v4445_v18 = vpop.f32.mrf.mxu0  ;;  %v4465_v19 = vpop.f32.mrf.mxu1  ;;  %4758 = vmatprep.subr.bf16.mxu1 %v5200_v28  ;;  %v5249_v28 = vld [vmem:[%s6560_s1 + $0x898] sm:$0xff]   ;;  %v5272_v1 = vld [vmem:[%s6560_s1 + $0x9f0] sm:$0xff]  }
  0xe7   :  { %v3119_v20 = vadd.f32 %v4444_v16, %v4020_v15  ;;  %v4466_v22 = vadd.f32 %v4465_v19, %v4464_v11  ;;  %4737 = vmatpush3.bf16.msra.mxu0 %v5199_v27  ;;  %v5237_v16 = vld [vmem:[%s6560_s1 + $0x8b0] sm:$0xff]   ;;  %v5239_v18 = vld [vmem:[%s6560_s1 + $0x828] sm:$0xff]   ;;  %v5248_v27 = vld [vmem:[%s6560_s1 + $0x8d8] sm:$0xff]  }
  0xe8   :  { %v4446_v24 = vpop.f32.mrf.mxu0  ;;  %v4467_v25 = vpop.f32.mrf.mxu1  ;;  %4738 = vmatprep.subr.bf16.mxu0 %v5202_v31  ;;  %v5240_v19 = vld [vmem:[%s6560_s1 + $0x8e8] sm:$0xff]   ;;  %v5252_v31 = vld [vmem:[%s6560_s1 + $0x8d0] sm:$0xff]  }
  0xe9   :  { %v6124_v26 = vadd.f32 %v4466_v22, %v3119_v20  ;;  %4759 = vmatpush3.bf16.msra.mxu1 %v5201_v30  ;;  %v5241_v20 = vld [vmem:[%s6560_s1 + $0x8a8] sm:$0xff]   ;;  %v5243_v22 = vld [vmem:[%s6560_s1 + $0x820] sm:$0xff]   ;;  %v5246_v25 = vld [vmem:[%s6560_s1 + $0x858] sm:$0xff]  }
  0xea   :  { %v4468_v29 = vpop.f32.mrf.mxu1  ;;  %4760 = vmatprep.subr.bf16.mxu1 %v5204_v33  ;;  %v5245_v24 = vld [vmem:[%s6560_s1 + $0x8a0] sm:$0xff]   ;;  %v5251_v30 = vld [vmem:[%s6560_s1 + $0x810] sm:$0xff]   ;;  %v5254_v33 = vld [vmem:[%s6560_s1 + $0x848] sm:$0xff]  }
  0xeb   :  { %4739 = vmatpush3.bf16.msra.mxu0 %v5203_v32  ;;  %v5250_v29 = vld [vmem:[%s6560_s1 + $0x850] sm:$0xff]  }
  0xec   :  { %4740 = vmatprep.subr.bf16.mxu0 %v5206_v35  ;;  %v5253_v32 = vld [vmem:[%s6560_s1 + $0x890] sm:$0xff]   ;;  %v5256_v35 = vld [vmem:[%s6560_s1 + $0x8c8] sm:$0xff]  }
  0xed   :  { %4761 = vmatpush3.bf16.msra.mxu1 %v5205_v34  ;;  %v5255_v34 = vld [vmem:[%s6560_s1 + $0x808] sm:$0xff]  }
  0xee   :  { %4762 = vmatprep.subr.bf16.mxu1 %v5208_v37  ;;  %v5258_v37 = vld [vmem:[%s6560_s1 + $0x840] sm:$0xff]  }
  0xef   :  { %4741 = vmatpush3.bf16.msra.mxu0 %v5207_v36  ;;  %v5257_v36 = vld [vmem:[%s6560_s1 + $0x888] sm:$0xff]  }
  0xf0   :  { %4742 = vmatprep.subr.bf16.mxu0 %v5210_v39  ;;  %v5260_v39 = vld [vmem:[%s6560_s1 + $0x8c0] sm:$0xff]  }
  0xf1   :  { %4763 = vmatpush3.bf16.msra.mxu1 %v5209_v38  ;;  %v5259_v38 = vld [vmem:[%s6560_s1 + $0x800] sm:$0xff]  }
  0xf2   :  { %4764 = vmatprep.subr.bf16.mxu1 %v5212_v41 }
  0xf3   :  { %4743 = vmatpush3.bf16.msra.mxu0 %v5211_v40  ;;  %v32_v40 = vld [vmem:[%s6559_s0 + $0x80] sm:$0xff] }
  0xf4   :  { %4744 = vmatprep.subr.bf16.mxu0 %v5214_v43  ;;  %v4054_v43 = vcombine.high %v32_v40, %v32_v40 }
  0xf5   :  { %4765 = vmatpush3.bf16.msra.mxu1 %v5213_v42  ;;  %v4053_v42 = vcombine.low %v32_v40, %v32_v40 }
  0xf6   :  { %4766 = vmatprep.subr.bf16.mxu1 %v5216_v45  ;;  %v5264_v45 = vld [vmem:[%s6560_s1 + $0x978] sm:$0xff]  }
  0xf7   :  { %4745 = vmatpush3.bf16.msra.mxu0 %v5215_v44  ;;  %v5263_v44 = vld [vmem:[%s6560_s1 + $0x880] sm:$0xff]  }
  0xf8   :  { %4746 = vmatprep.subr.bf16.mxu0 %v5218_v47 }
  0xf9   :  { %4767 = vmatpush3.bf16.msra.mxu1 %v5217_v46 }
  0xfa   :  { %4768 = vmatprep.subr.bf16.mxu1 %v5220_v49 }
  0xfb   :  { %4747 = vmatpush3.bf16.msra.mxu0 %v5219_v48  ;;  %v33_v48 = vld [vmem:[%s6559_s0 + $0x88] sm:$0xff] }
  0xfc   :  { %4748 = vmatprep.subr.bf16.mxu0 %v5222_v51  ;;  %v4056_v51 = vcombine.high %v33_v48, %v33_v48 }
  0xfd   :  { %4769 = vmatpush3.bf16.msra.mxu1 %v5221_v50  ;;  %v4055_v50 = vcombine.low %v33_v48, %v33_v48 }
  0xfe   :  { %4770 = vmatprep.subr.bf16.mxu1 %v5224_v53 }
  0xff   :  { %4749 = vmatpush3.bf16.msra.mxu0 %v5223_v52  ;;  %v5267_v52 = vld [vmem:[%s6560_s1 + $0x938] sm:$0xff]  }
 0x100   :  { %4778 = vmatprep.subr.bf16.mxu0 %v5228_v60 }
 0x101   :  { %4771 = vmatpush3.bf16.msra.mxu1 %v5227_v58  ;;  %v5269_v58 = vld [vmem:[%s6560_s1 + $0x9b8] sm:$0xff]  }
 0x102   :  { %v4486_v54 = vpop.f32.mrf.mxu0  ;;  %3677 = vmatmul.mubr.bf16.vlgmr.msra.gmra.mxu0 %v4049_v56  ;;  %4800 = vmatprep.subr.bf16.mxu1 %v5232_v5  ;;  %v5268_v56 = vld [vmem:[%s6560_s1 + $0x9f8] sm:$0xff]   ;;  %v5276_v5 = vld [vmem:[%s6560_s1 + $0x9e8] sm:$0xff]  }
 0x103   :  { %4779 = vmatpush3.bf16.msra.mxu0 %v5231_v2  ;;  %3756 = vmatprep.mubr.bf16.mxu0 %v4054_v43  ;;  %v5273_v2 = vld [vmem:[%s6560_s1 + $0x9b0] sm:$0xff]   ;;  %v5305_v43 = vld [vmem:[%s6560_s1 + $0xab8] sm:$0xff]  }
 0x104   :  { %v4487_v59 = vpop.f32.mrf.mxu0  ;;  %v4508_v63 = vpop.f32.mrf.mxu1  ;;  %3717 = vmatmul.mubr.bf16.vlgmr.msra.gmra.mxu1 %v4051_v0  ;;  %4780 = vmatprep.subr.bf16.mxu0 %v5234_v10  ;;  %v5281_v10 = vld [vmem:[%s6560_s1 + $0x9a0] sm:$0xff]  }
 0x105   :  { %v4488_v62 = vadd.f32 %v4487_v59, %v4486_v54  ;;  %4801 = vmatpush3.bf16.msra.mxu1 %v5233_v7  ;;  %3796 = vmatprep.mubr.bf16.mxu1 %v4056_v51  ;;  %v5278_v7 = vld [vmem:[%s6560_s1 + $0x960] sm:$0xff]  }
 0x106   :  { %v4489_v3 = vpop.f32.mrf.mxu0  ;;  %v4509_v6 = vpop.f32.mrf.mxu1  ;;  %4802 = vmatprep.subr.bf16.mxu1 %v5236_v14  ;;  %v5285_v14 = vld [vmem:[%s6560_s1 + $0x998] sm:$0xff]  }
 0x107   :  { %v3199_v4 = vadd.f32 %v4488_v62, %v6124_v26  ;;  %v4510_v8 = vadd.f32 %v4509_v6, %v4508_v63  ;;  %4781 = vmatpush3.bf16.msra.mxu0 %v5235_v13  ;;  %v5247_v26 = vld [vmem:[%s6560_s1 + $0x818] sm:$0xff]   ;;  %v5270_v62 = vld [vmem:[%s6560_s1 + $0x970] sm:$0xff]   ;;  %v5274_v3 = vld [vmem:[%s6560_s1 + $0x968] sm:$0xff]  }
 0x108   :  { %v4490_v9 = vpop.f32.mrf.mxu0  ;;  %v4511_v11 = vpop.f32.mrf.mxu1  ;;  %4782 = vmatprep.subr.bf16.mxu0 %v5238_v17  ;;  %v5271_v63 = vld [vmem:[%s6560_s1 + $0x930] sm:$0xff]   ;;  %v5277_v6 = vld [vmem:[%s6560_s1 + $0x9a8] sm:$0xff]   ;;  %v5284_v13 = vld [vmem:[%s6560_s1 + $0x9d8] sm:$0xff]  }
 0x109   :  { %v6229_v12 = vadd.f32 %v4510_v8, %v3199_v4  ;;  %4803 = vmatpush3.bf16.msra.mxu1 %v5237_v16  ;;  %v5275_v4 = vld [vmem:[%s6560_s1 + $0x928] sm:$0xff]   ;;  %v5279_v8 = vld [vmem:[%s6560_s1 + $0x920] sm:$0xff]   ;;  %v5282_v11 = vld [vmem:[%s6560_s1 + $0x958] sm:$0xff]  }
 0x10a   :  { %v4512_v15 = vpop.f32.mrf.mxu1  ;;  %4804 = vmatprep.subr.bf16.mxu1 %v5240_v19  ;;  %v5280_v9 = vld [vmem:[%s6560_s1 + $0x9e0] sm:$0xff]   ;;  %v5287_v16 = vld [vmem:[%s6560_s1 + $0x910] sm:$0xff]   ;;  %v5290_v19 = vld [vmem:[%s6560_s1 + $0x948] sm:$0xff]  }
 0x10b   :  { %4783 = vmatpush3.bf16.msra.mxu0 %v5239_v18  ;;  %v5286_v15 = vld [vmem:[%s6560_s1 + $0x950] sm:$0xff]  }
 0x10c   :  { %4784 = vmatprep.subr.bf16.mxu0 %v5242_v21  ;;  %v5288_v17 = vld [vmem:[%s6560_s1 + $0x9d0] sm:$0xff]   ;;  %v5292_v21 = vld [vmem:[%s6560_s1 + $0x9c8] sm:$0xff]  }
 0x10d   :  { %4805 = vmatpush3.bf16.msra.mxu1 %v5241_v20  ;;  %v5289_v18 = vld [vmem:[%s6560_s1 + $0x990] sm:$0xff]   ;;  %v5291_v20 = vld [vmem:[%s6560_s1 + $0x908] sm:$0xff]  }
 0x10e   :  { %4806 = vmatprep.subr.bf16.mxu1 %v5244_v23  ;;  %v5294_v23 = vld [vmem:[%s6560_s1 + $0x940] sm:$0xff]  }
 0x10f   :  { %4785 = vmatpush3.bf16.msra.mxu0 %v5243_v22  ;;  %v5293_v22 = vld [vmem:[%s6560_s1 + $0x988] sm:$0xff]  }
 0x110   :  { %4786 = vmatprep.subr.bf16.mxu0 %v5246_v25  ;;  %v5296_v25 = vld [vmem:[%s6560_s1 + $0x9c0] sm:$0xff]  }
 0x111   :  { %4807 = vmatpush3.bf16.msra.mxu1 %v5245_v24  ;;  %v5295_v24 = vld [vmem:[%s6560_s1 + $0x900] sm:$0xff]  }
 0x112   :  { %4808 = vmatprep.subr.bf16.mxu1 %v5248_v27 }
 0x113   :  { %4787 = vmatpush3.bf16.msra.mxu0 %v5247_v26  ;;  %v34_v26 = vld [vmem:[%s6559_s0 + $0x90] sm:$0xff] }
 0x114   :  { %4788 = vmatprep.subr.bf16.mxu0 %v5250_v29  ;;  %v4058_v29 = vcombine.high %v34_v26, %v34_v26 }
 0x115   :  { %4809 = vmatpush3.bf16.msra.mxu1 %v5249_v28  ;;  %v4057_v28 = vcombine.low %v34_v26, %v34_v26 }
 0x116   :  { %4810 = vmatprep.subr.bf16.mxu1 %v5252_v31  ;;  %v5300_v31 = vld [vmem:[%s6560_s1 + $0xa78] sm:$0xff]  }
 0x117   :  { %4789 = vmatpush3.bf16.msra.mxu0 %v5251_v30  ;;  %v5299_v30 = vld [vmem:[%s6560_s1 + $0x980] sm:$0xff]  }
 0x118   :  { %4790 = vmatprep.subr.bf16.mxu0 %v5254_v33 }
 0x119   :  { %4811 = vmatpush3.bf16.msra.mxu1 %v5253_v32  ;;  %v35_v32 = vld [vmem:[%s6559_s0 + $0x98] sm:$0xff] }
 0x11a   :  { %4812 = vmatprep.subr.bf16.mxu1 %v5256_v35  ;;  %v4059_v35 = vcombine.low %v35_v32, %v35_v32 }
 0x11b   :  { %4791 = vmatpush3.bf16.msra.mxu0 %v5255_v34 }
 0x11c   :  { %4792 = vmatprep.subr.bf16.mxu0 %v5258_v37  ;;  %v5303_v37 = vld [vmem:[%s6560_s1 + $0xa38] sm:$0xff]  }
 0x11d   :  { %4813 = vmatpush3.bf16.msra.mxu1 %v5257_v36  ;;  %v4060_v36 = vcombine.high %v35_v32, %v35_v32 }
 0x11e   :  { %4814 = vmatprep.subr.bf16.mxu1 %v5260_v39  ;;  %v5304_v39 = vld [vmem:[%s6560_s1 + $0xaf8] sm:$0xff]  }
 0x11f   :  { %4793 = vmatpush3.bf16.msra.mxu0 %v5259_v38 }
 0x120   :  { %4822 = vmatprep.subr.bf16.mxu0 %v5264_v45  ;;  %v5306_v45 = vld [vmem:[%s6560_s1 + $0xa70] sm:$0xff]  }
 0x121   :  { %4815 = vmatpush3.bf16.msra.mxu1 %v5263_v44 }
 0x122   :  { %v4530_v41 = vpop.f32.mrf.mxu0  ;;  %3757 = vmatmul.mubr.bf16.vlgmr.msra.gmra.mxu0 %v4053_v42  ;;  %4844 = vmatprep.subr.bf16.mxu1 %v5268_v56  ;;  %v5313_v56 = vld [vmem:[%s6560_s1 + $0xaa8] sm:$0xff]  }
 0x123   :  { %4823 = vmatpush3.bf16.msra.mxu0 %v5267_v52  ;;  %3836 = vmatprep.mubr.bf16.mxu0 %v4058_v29  ;;  %v5309_v52 = vld [vmem:[%s6560_s1 + $0xab0] sm:$0xff]  }
 0x124   :  { %v4531_v46 = vpop.f32.mrf.mxu0  ;;  %v4552_v47 = vpop.f32.mrf.mxu1  ;;  %3797 = vmatmul.mubr.bf16.vlgmr.msra.gmra.mxu1 %v4055_v50  ;;  %4824 = vmatprep.subr.bf16.mxu0 %v5270_v62  ;;  %v5308_v50 = vld [vmem:[%s6560_s1 + $0xaf0] sm:$0xff]   ;;  %v5319_v62 = vld [vmem:[%s6560_s1 + $0xa18] sm:$0xff]  }
 0x125   :  { %v4532_v49 = vadd.f32 %v4531_v46, %v4530_v41  ;;  %4845 = vmatpush3.bf16.msra.mxu1 %v5269_v58  ;;  %3876 = vmatprep.mubr.bf16.mxu1 %v4060_v36  ;;  %v5315_v58 = vld [vmem:[%s6560_s1 + $0xa20] sm:$0xff]   ;;  %v5339_v29 = vld [vmem:[%s6560_s1 + $0xb30] sm:$0xff]  }
 0x126   :  { %v4533_v53 = vpop.f32.mrf.mxu0  ;;  %v4553_v54 = vpop.f32.mrf.mxu1  ;;  %4846 = vmatprep.subr.bf16.mxu1 %v5272_v1  ;;  %v5322_v1 = vld [vmem:[%s6560_s1 + $0xa50] sm:$0xff]  }
 0x127   :  { %v3279_v55 = vadd.f32 %v4532_v49, %v6229_v12  ;;  %v4554_v57 = vadd.f32 %v4553_v54, %v4552_v47  ;;  %4825 = vmatpush3.bf16.msra.mxu0 %v5271_v63  ;;  %v5283_v12 = vld [vmem:[%s6560_s1 + $0x918] sm:$0xff]   ;;  %v5307_v49 = vld [vmem:[%s6560_s1 + $0xa30] sm:$0xff]   ;;  %v5310_v53 = vld [vmem:[%s6560_s1 + $0xa68] sm:$0xff]  }
 0x128   :  { %v4534_v59 = vpop.f32.mrf.mxu0  ;;  %v4555_v60 = vpop.f32.mrf.mxu1  ;;  %4826 = vmatprep.subr.bf16.mxu0 %v5274_v3  ;;  %v5311_v54 = vld [vmem:[%s6560_s1 + $0xa28] sm:$0xff]   ;;  %v5320_v63 = vld [vmem:[%s6560_s1 + $0xad8] sm:$0xff]   ;;  %v5324_v3 = vld [vmem:[%s6560_s1 + $0xad0] sm:$0xff]  }
 0x129   :  { %v6331_v61 = vadd.f32 %v4554_v57, %v3279_v55  ;;  %4847 = vmatpush3.bf16.msra.mxu1 %v5273_v2  ;;  %v5312_v55 = vld [vmem:[%s6560_s1 + $0xae8] sm:$0xff]   ;;  %v5314_v57 = vld [vmem:[%s6560_s1 + $0xa60] sm:$0xff]   ;;  %v5323_v2 = vld [vmem:[%s6560_s1 + $0xa10] sm:$0xff]  }
 0x12a   :  { %v4556_v0 = vpop.f32.mrf.mxu1  ;;  %4848 = vmatprep.subr.bf16.mxu1 %v5276_v5  ;;  %v5316_v59 = vld [vmem:[%s6560_s1 + $0xae0] sm:$0xff]   ;;  %v5326_v5 = vld [vmem:[%s6560_s1 + $0xa48] sm:$0xff]  }
 0x12b   :  { %4827 = vmatpush3.bf16.msra.mxu0 %v5275_v4  ;;  %v5317_v60 = vld [vmem:[%s6560_s1 + $0xaa0] sm:$0xff]   ;;  %v5321_v0 = vld [vmem:[%s6560_s1 + $0xa98] sm:$0xff]   ;;  %v5325_v4 = vld [vmem:[%s6560_s1 + $0xa90] sm:$0xff]  }
 0x12c   :  { %4828 = vmatprep.subr.bf16.mxu0 %v5278_v7  ;;  %v5328_v7 = vld [vmem:[%s6560_s1 + $0xac8] sm:$0xff]  }
 0x12d   :  { %4849 = vmatpush3.bf16.msra.mxu1 %v5277_v6  ;;  %v5327_v6 = vld [vmem:[%s6560_s1 + $0xa08] sm:$0xff]  }
 0x12e   :  { %4850 = vmatprep.subr.bf16.mxu1 %v5280_v9  ;;  %v5330_v9 = vld [vmem:[%s6560_s1 + $0xa40] sm:$0xff]  }
 0x12f   :  { %4829 = vmatpush3.bf16.msra.mxu0 %v5279_v8  ;;  %v5329_v8 = vld [vmem:[%s6560_s1 + $0xa88] sm:$0xff]  }
 0x130   :  { %4830 = vmatprep.subr.bf16.mxu0 %v5282_v11  ;;  %v5332_v11 = vld [vmem:[%s6560_s1 + $0xac0] sm:$0xff]  }
 0x131   :  { %4851 = vmatpush3.bf16.msra.mxu1 %v5281_v10  ;;  %v5331_v10 = vld [vmem:[%s6560_s1 + $0xa00] sm:$0xff]  }
 0x132   :  { %4852 = vmatprep.subr.bf16.mxu1 %v5284_v13  ;;  %v36_v13 = vld [vmem:[%s6559_s0 + $0xa0] sm:$0xff] }
 0x133   :  { %4831 = vmatpush3.bf16.msra.mxu0 %v5283_v12 }
 0x134   :  { %4832 = vmatprep.subr.bf16.mxu0 %v5286_v15  ;;  %v4062_v15 = vcombine.high %v36_v13, %v36_v13 }
 0x135   :  { %4853 = vmatpush3.bf16.msra.mxu1 %v5285_v14  ;;  %v4061_v14 = vcombine.low %v36_v13, %v36_v13 }
 0x136   :  { %4854 = vmatprep.subr.bf16.mxu1 %v5288_v17  ;;  %v5369_v17 = vmov 0.0  }
 0x137   :  { %4833 = vmatpush3.bf16.msra.mxu0 %v5287_v16  ;;  %v5335_v16 = vld [vmem:[%s6560_s1 + $0xa80] sm:$0xff]  }
 0x138   :  { %4834 = vmatprep.subr.bf16.mxu0 %v5290_v19 }
 0x139   :  { %4855 = vmatpush3.bf16.msra.mxu1 %v5289_v18  ;;  %v37_v18 = vld [vmem:[%s6559_s0 + $0xa8] sm:$0xff] }
 0x13a   :  { %4856 = vmatprep.subr.bf16.mxu1 %v5292_v21  ;;  %v4064_v21 = vcombine.high %v37_v18, %v37_v18 }
 0x13b   :  { %4835 = vmatpush3.bf16.msra.mxu0 %v5291_v20  ;;  %v4063_v20 = vcombine.low %v37_v18, %v37_v18 }
 0x13c   :  { %4836 = vmatprep.subr.bf16.mxu0 %v5294_v23 }
 0x13d   :  { %4857 = vmatpush3.bf16.msra.mxu1 %v5293_v22  ;;  %v5338_v22 = vld [vmem:[%s6560_s1 + $0xb38] sm:$0xff]  }
 0x13e   :  { %4858 = vmatprep.subr.bf16.mxu1 %v5296_v25 }
 0x13f   :  { %4837 = vmatpush3.bf16.msra.mxu0 %v5295_v24 }
 0x140   :  { %4866 = vmatprep.subr.bf16.mxu0 %v5300_v31 }
 0x141   :  { %4859 = vmatpush3.bf16.msra.mxu1 %v5299_v30 }
 0x142   :  { %v4574_v27 = vpop.f32.mrf.mxu0  ;;  %3837 = vmatmul.mubr.bf16.vlgmr.msra.gmra.mxu0 %v4057_v28  ;;  %4888 = vmatprep.subr.bf16.mxu1 %v5304_v39 }
 0x143   :  { %4867 = vmatpush3.bf16.msra.mxu0 %v5303_v37  ;;  %3916 = vmatprep.mubr.bf16.mxu0 %v4062_v15 }
 0x144   :  { %v4575_v33 = vpop.f32.mrf.mxu0  ;;  %v4596_v34 = vpop.f32.mrf.mxu1  ;;  %3877 = vmatmul.mubr.bf16.vlgmr.msra.gmra.mxu1 %v4059_v35  ;;  %4868 = vmatprep.subr.bf16.mxu0 %v5306_v45 }
 0x145   :  { %v4576_v38 = vadd.f32 %v4575_v33, %v4574_v27  ;;  %4889 = vmatpush3.bf16.msra.mxu1 %v5305_v43  ;;  %3956 = vmatprep.mubr.bf16.mxu1 %v4064_v21 }
 0x146   :  { %v4577_v40 = vpop.f32.mrf.mxu0  ;;  %v4597_v41 = vpop.f32.mrf.mxu1  ;;  %4890 = vmatprep.subr.bf16.mxu1 %v5308_v50 }
 0x147   :  { %v3359_v42 = vadd.f32 %v4576_v38, %v6331_v61  ;;  %v4598_v44 = vadd.f32 %v4597_v41, %v4596_v34  ;;  %4869 = vmatpush3.bf16.msra.mxu0 %v5307_v49  ;;  %v5318_v61 = vld [vmem:[%s6560_s1 + $0xa58] sm:$0xff]   ;;  %v5340_v34 = vld [vmem:[%s6560_s1 + $0xb28] sm:$0xff]  }
 0x148   :  { %v4578_v46 = vpop.f32.mrf.mxu0  ;;  %v4599_v47 = vpop.f32.mrf.mxu1  ;;  %4870 = vmatprep.subr.bf16.mxu0 %v5310_v53 }
 0x149   :  { %v6439_v48 = vadd.f32 %v4598_v44, %v3359_v42  ;;  %4891 = vmatpush3.bf16.msra.mxu1 %v5309_v52 }
 0x14a   :  { %v4600_v51 = vpop.f32.mrf.mxu1  ;;  %4892 = vmatprep.subr.bf16.mxu1 %v5312_v55 }
 0x14b   :  { %4871 = vmatpush3.bf16.msra.mxu0 %v5311_v54 }
 0x14c   :  { %4872 = vmatprep.subr.bf16.mxu0 %v5314_v57 }
 0x14d   :  { %4893 = vmatpush3.bf16.msra.mxu1 %v5313_v56 }
 0x14e   :  { %4894 = vmatprep.subr.bf16.mxu1 %v5316_v59 }
 0x14f   :  { %4873 = vmatpush3.bf16.msra.mxu0 %v5315_v58 }
 0x150   :  { %4874 = vmatprep.subr.bf16.mxu0 %v5318_v61 }
 0x151   :  { %4895 = vmatpush3.bf16.msra.mxu1 %v5317_v60 }
 0x152   :  { %4896 = vmatprep.subr.bf16.mxu1 %v5320_v63 }
 0x153   :  { %4875 = vmatpush3.bf16.msra.mxu0 %v5319_v62 }
 0x154   :  { %4876 = vmatprep.subr.bf16.mxu0 %v5322_v1 }
 0x155   :  { %4897 = vmatpush3.bf16.msra.mxu1 %v5321_v0 }
 0x156   :  { %4898 = vmatprep.subr.bf16.mxu1 %v5324_v3 }
 0x157   :  { %4877 = vmatpush3.bf16.msra.mxu0 %v5323_v2 }
 0x158   :  { %4878 = vmatprep.subr.bf16.mxu0 %v5326_v5 }
 0x159   :  { %4899 = vmatpush3.bf16.msra.mxu1 %v5325_v4 }
 0x15a   :  { %4900 = vmatprep.subr.bf16.mxu1 %v5328_v7 }
 0x15b   :  { %4879 = vmatpush3.bf16.msra.mxu0 %v5327_v6 }
 0x15c   :  { %4880 = vmatprep.subr.bf16.mxu0 %v5330_v9 }
 0x15d   :  { %4901 = vmatpush3.bf16.msra.mxu1 %v5329_v8 }
 0x15e   :  { %4902 = vmatprep.subr.bf16.mxu1 %v5332_v11 }
 0x15f   :  { %4881 = vmatpush3.bf16.msra.mxu0 %v5331_v10 }
 0x160   :  { %4919 = vmatprep.subr.bf16.mxu0 %v5369_v17 }
 0x161   :  { %4903 = vmatpush3.bf16.msra.mxu1 %v5335_v16 }
 0x162   :  { %v4618_v12 = vpop.f32.mrf.mxu0  ;;  %3917 = vmatmul.mubr.bf16.vlgmr.msra.gmra.mxu0 %v4061_v14 }
 0x163   :  { %4920 = vmatpush3.bf16.msra.mxu0 %v5338_v22  ;;  %4935 = vmatprep.mubr.msk.bf16.mxu0 %vm5370_vm0, %v5369_v17 }
 0x164   :  { %v4619_v19 = vpop.f32.mrf.mxu0  ;;  %v4640_v24 = vpop.f32.mrf.mxu1  ;;  %3957 = vmatmul.mubr.bf16.vlgmr.msra.gmra.mxu1 %v4063_v20  ;;  %4921 = vmatprep.subr.bf16.mxu0 %v5369_v17 }
 0x165   :  { %v4620_v23 = vadd.f32 %v4619_v19, %v4618_v12 }
 0x166   :  { %v4621_v25 = vpop.f32.mrf.mxu0  ;;  %v4641_v27 = vpop.f32.mrf.mxu1 }
 0x167   :  { %v3439_v26 = vadd.f32 %v4620_v23, %v6439_v48  ;;  %v4642_v28 = vadd.f32 %v4641_v27, %v4640_v24  ;;  %4922 = vmatpush3.bf16.msra.mxu0 %v5339_v29 }
 0x168   :  { %v4622_v30 = vpop.f32.mrf.mxu0  ;;  %v4643_v31 = vpop.f32.mrf.mxu1  ;;  %4923 = vmatprep.subr.bf16.mxu0 %v5369_v17 }
 0x169   :  { %v3479_v32 = vadd.f32 %v4642_v28, %v3439_v26 }
 0x16a   :  { %v4644_v33 = vpop.f32.mrf.mxu1 }
 0x16b   :  { %8 = vsyncpa [#allocation3], 0  ;;  %4924 = vmatpush3.bf16.msra.mxu0 %v5340_v34  ;;  %v5341_v35 = vld [vmem:[%s6560_s1 + $0xb20] sm:$0xff]   ;;  %v5342_v36 = vld [vmem:[%s6560_s1 + $0xb18] sm:$0xff]  }
 0x16c   :  { %4925 = vmatprep.subr.bf16.mxu0 %v5369_v17  ;;  %v5343_v37 = vld [vmem:[%s6560_s1 + $0xb10] sm:$0xff]   ;;  %v5344_v38 = vld [vmem:[%s6560_s1 + $0xb08] sm:$0xff]   ;;  %v5345_v39 = vld [vmem:[%s6560_s1 + $0xb00] sm:$0xff]  }
 0x16d   :  { %v5346_v41 = vld [vmem:[%s6559_s0 + $0xb0] ss:$0 sps:$4 sm:$0xff]   ;;  %s5371_s0 = smov [#allocation2]  }
 0x16e   :  { %s4012_s1 = sshll.u32 %s5371_s0, 4  ;;  %s4013_s1 = int_to_ptr.vmem [resolvable:$true] %s4012_s1 }
 0x16f   :  { %4926 = vmatpush3.bf16.msra.mxu0 %v5341_v35  ;;  %s5347_s13 = scalar_lea.vmem %s4013_s1, 128  ;;  %p5352_p1 = scmp.lt.s32.totalorder %s4013_s1, %s4013_s1 }
 0x170   :  { %4927 = vmatprep.subr.bf16.mxu0 %v5369_v17  ;;  %p5348_p0 = scmp.ne.s32.totalorder %s4013_s1, %s5347_s13  ;;  %p5353_p2 = scmp.lt.s32.totalorder %s5347_s13, %s5347_s13 }
 0x172   :  { %p5354_p3 = por %p5353_p2, %p5352_p1 }
 0x173   :  { %4928 = vmatpush3.bf16.msra.mxu0 %v5342_v36 }
 0x174   :  { %4929 = vmatprep.subr.bf16.mxu0 %v5369_v17  ;;  %p5355_p4 = pnand %p5354_p3, %p5348_p0 }
 0x177   :  { %4930 = vmatpush3.bf16.msra.mxu0 %v5343_v37 }
 0x178   :  { %4931 = vmatprep.subr.bf16.mxu0 %v5369_v17 }
 0x17b   :  { %4932 = vmatpush3.bf16.msra.mxu0 %v5344_v38 }
 0x17c   :  { %4933 = vmatprep.subr.bf16.mxu0 %v5369_v17 }
 0x17f   :  { %4934 = vmatpush3.bf16.msra.mxu0 %v5345_v39 }
 0x182   :  { %v4662_v40 = vpop.f32.mrf.mxu0  ;;  %4936 = vmatmul.mubr.bf16.vlgmr.msra.gmra.mxu0 %v5346_v41 }
 0x184   :  { %v4663_v42 = vpop.f32.mrf.mxu0  ;;  %v4684_v43 = vpop.f32.mrf.mxu1 }
 0x185   :  { %v4664_v44 = vadd.f32 %v4663_v42, %v4662_v40 }
 0x186   :  { %v4665_v45 = vpop.f32.mrf.mxu0  ;;  %v4685_v46 = vpop.f32.mrf.mxu1 }
 0x187   :  { %v3519_v47 = vadd.f32 %v4664_v44, %v3479_v32  ;;  %v4686_v48 = vadd.f32 %v4685_v46, %v4684_v43 }
 0x188   :  { %v4666_v49 = vpop.f32.mrf.mxu0  ;;  %v4687_v50 = vpop.f32.mrf.mxu1 }
 0x189   :  { %v3559_v51 = vadd.f32 %v4686_v48, %v3519_v47 }
 0x18a   :  { %v4688_v52 = vpop.f32.mrf.mxu1 }
 0x1a2   :  { %v4706_v53 = vpop.f32.mrf.mxu0 }
 0x1a4   :  { %v4707_v54 = vpop.f32.mrf.mxu0  ;;  %v4728_v55 = vpop.f32.mrf.mxu1 }
 0x1a5   :  { %v4708_v56 = vadd.f32 %v4707_v54, %v4706_v53 }
 0x1a6   :  { %v4709_v57 = vpop.f32.mrf.mxu0  ;;  %v4729_v58 = vpop.f32.mrf.mxu1 }
 0x1a7   :  { %v3599_v59 = vadd.f32 %v4708_v56, %v3559_v51  ;;  %v4730_v60 = vadd.f32 %v4729_v58, %v4728_v55 }
 0x1a8   :  { %v4710_v61 = vpop.f32.mrf.mxu0  ;;  %v4731_v62 = vpop.f32.mrf.mxu1 }
 0x1a9   :  { %v3639_v63 = vadd.f32 %v4730_v60, %v3599_v59 }
 0x1aa   :  { %v4732_v0 = vpop.f32.mrf.mxu1 }
 0x1c2   :  { %v4750_v1 = vpop.f32.mrf.mxu0 }
 0x1c4   :  { %v4751_v2 = vpop.f32.mrf.mxu0  ;;  %v4772_v3 = vpop.f32.mrf.mxu1 }
 0x1c5   :  { %v4752_v4 = vadd.f32 %v4751_v2, %v4750_v1 }
 0x1c6   :  { %v4753_v5 = vpop.f32.mrf.mxu0  ;;  %v4773_v6 = vpop.f32.mrf.mxu1 }
 0x1c7   :  { %v3679_v7 = vadd.f32 %v4752_v4, %v3639_v63  ;;  %v4774_v8 = vadd.f32 %v4773_v6, %v4772_v3 }
 0x1c8   :  { %v4754_v9 = vpop.f32.mrf.mxu0  ;;  %v4775_v10 = vpop.f32.mrf.mxu1 }
 0x1c9   :  { %v3719_v11 = vadd.f32 %v4774_v8, %v3679_v7 }
 0x1ca   :  { %v4776_v12 = vpop.f32.mrf.mxu1 }
 0x1e2   :  { %v4794_v13 = vpop.f32.mrf.mxu0 }
 0x1e4   :  { %v4795_v14 = vpop.f32.mrf.mxu0  ;;  %v4816_v16 = vpop.f32.mrf.mxu1 }
 0x1e5   :  { %v4796_v15 = vadd.f32 %v4795_v14, %v4794_v13 }
 0x1e6   :  { %v4797_v17 = vpop.f32.mrf.mxu0  ;;  %v4817_v19 = vpop.f32.mrf.mxu1 }
 0x1e7   :  { %v3759_v18 = vadd.f32 %v4796_v15, %v3719_v11  ;;  %v4818_v20 = vadd.f32 %v4817_v19, %v4816_v16 }
 0x1e8   :  { %v4798_v21 = vpop.f32.mrf.mxu0  ;;  %v4819_v22 = vpop.f32.mrf.mxu1 }
 0x1e9   :  { %v3799_v23 = vadd.f32 %v4818_v20, %v3759_v18 }
 0x1ea   :  { %v4820_v24 = vpop.f32.mrf.mxu1 }
 0x202   :  { %v4838_v25 = vpop.f32.mrf.mxu0 }
 0x204   :  { %v4839_v26 = vpop.f32.mrf.mxu0  ;;  %v4860_v27 = vpop.f32.mrf.mxu1 }
 0x205   :  { %v4840_v41 = vadd.f32 %v4839_v26, %v4838_v25 }
 0x206   :  { %v4841_v28 = vpop.f32.mrf.mxu0  ;;  %v4861_v29 = vpop.f32.mrf.mxu1 }
 0x207   :  { %v3839_v42 = vadd.f32 %v4840_v41, %v3799_v23  ;;  %v4862_v43 = vadd.f32 %v4861_v29, %v4860_v27 }
 0x208   :  { %v4842_v30 = vpop.f32.mrf.mxu0  ;;  %v4863_v31 = vpop.f32.mrf.mxu1 }
 0x209   :  { %v3879_v45 = vadd.f32 %v4862_v43, %v3839_v42 }
 0x20a   :  { %v4864_v32 = vpop.f32.mrf.mxu1 }
 0x222   :  { %v4882_v33 = vpop.f32.mrf.mxu0 }
 0x224   :  { %v4883_v34 = vpop.f32.mrf.mxu0  ;;  %v4904_v35 = vpop.f32.mrf.mxu1 }
 0x225   :  { %v4884_v44 = vadd.f32 %v4883_v34, %v4882_v33 }
 0x226   :  { %v4885_v36 = vpop.f32.mrf.mxu0  ;;  %v4905_v37 = vpop.f32.mrf.mxu1 }
 0x227   :  { %v3919_v46 = vadd.f32 %v4884_v44, %v3879_v45  ;;  %v4906_v47 = vadd.f32 %v4905_v37, %v4904_v35 }
 0x228   :  { %v4886_v38 = vpop.f32.mrf.mxu0  ;;  %v4907_v39 = vpop.f32.mrf.mxu1 }
 0x229   :  { %v3959_v48 = vadd.f32 %v4906_v47, %v3919_v46 }
 0x22a   :  { %v4908_v40 = vpop.f32.mrf.mxu1 }
 0x242   :  { %v3998_v49 = vpop.f32.mrf.mxu0 }
 0x243   :  { %v3999_v50 = vadd.f32 %v3998_v49, %v3959_v48 }
 0x244   :  { %v4937_v51 = vpop.f32.mrf.mxu0 }
 0x245   :  { %v4004_v52 = vmax.f32 %v3999_v50, 0.0 }
 0x246   :  { %v4001_v53 = vpop.f32.mrf.mxu0 }
 0x247   :  { %4005 = vst [vmem:[#allocation2] sm:$0xff] %v4004_v52 }
 0x248   :  { %v4938_v54 = vpop.f32.mrf.mxu0 }
 0x249   :  { %5358 = shalt.err (!%p5355_p4)
}
 0x24a   :  { %4015 = dma.vmem_to_hbm [thread:$0]  %s4013_s1, 128, %s6562_s3, [#allocation3]  }
 0x24b   :  { %5367 = dma.done.wait [#allocation3], 128  }
 0x24c   :  { %5368 = vsyncadd [#allocation3], 4294967168 }
 0x24d   :  { %4019 = vsyncpa [#allocation3], 1 }

</bundles_post_ra>
